<compile_context>
chip_gen: v6e
topology: v6e:2x2x1
jax: 0.10.0
libtpu: 0.0.40
codegen_flags: <defaults>
</compile_context>

<pallas_src>
import functools

import jax
import jax.numpy as jnp
from jax.experimental import pallas as pl
from jax.experimental.pallas import tpu as pltpu


def cbam_kernel(x_ref, wmlp_ref, masks_ref, wsp_ref, out_ref, *, W, kernel_size):
    K = kernel_size
    pad = K // 2

    x = x_ref[...].astype(jnp.float32)                        # (Bt, C, HW)
    Bt, C, HW = x.shape

    # ---- channel attention: global avg pool -> 1x1-conv MLP -> sigmoid ----
    avg = jnp.sum(x, axis=2, keepdims=True) * jnp.float32(1.0 / HW)   # (Bt, C, 1)
    wmlp = wmlp_ref[...].astype(jnp.float32)                   # (2C, mid)
    w1t = wmlp[:C]                                             # (C, mid)  == w1.T
    w2 = wmlp[C:]                                              # (C, mid)
    hidden = jnp.sum(avg * w1t[None], axis=1, keepdims=True)   # (Bt, 1, mid)
    hidden = jnp.maximum(hidden, 0.0)
    logits = jnp.sum(w2[None] * hidden, axis=2, keepdims=True)  # (Bt, C, 1)
    ch_att = jax.nn.sigmoid(logits)                            # (Bt, C, 1)

    # Channel-gated features stay in vregs (no VMEM staging round trip).
    gated = x * ch_att                                         # (Bt, C, HW)

    # ---- spatial attention: channel max/mean -> KxK SAME conv -> sigmoid ----
    mp = jnp.max(gated, axis=1)                                # (Bt, HW)
    ap = jnp.sum(gated, axis=1) * jnp.float32(1.0 / C)         # (Bt, HW)

    masks = masks_ref[...]                                     # (2K, HW): [0:K] row-valid, [K:2K] col-valid

    # Separable SAME conv on the flattened HxW grid.
    # Stage 1 (2*K rolls): column-shifted, column-masked pooled maps.
    cmp, cap = [], []
    for tx in range(K):
        ox = tx - pad
        shift = (-ox) % HW
        sm = pltpu.roll(mp, shift, axis=1) if shift else mp
        sa = pltpu.roll(ap, shift, axis=1) if shift else ap
        if ox == 0:                                            # center column: mask is all-ones
            cmp.append(sm)
            cap.append(sa)
        else:
            colmask = masks[K + tx:K + tx + 1]                 # (1, HW)
            cmp.append(sm * colmask)
            cap.append(sa * colmask)

    # Stage 2 (K rolls): per-row-offset weighted sum, row shift, row mask.
    acc = jnp.zeros((Bt, HW), jnp.float32)
    for ty in range(K):
        oy = ty - pad
        s = jnp.zeros((Bt, HW), jnp.float32)
        for tx in range(K):
            w_max = wsp_ref[0 * K * K + ty * K + tx]           # scalars from SMEM
            w_avg = wsp_ref[1 * K * K + ty * K + tx]
            s = s + w_max * cmp[tx] + w_avg * cap[tx]
        shift = (-(oy * W)) % HW
        rs = pltpu.roll(s, shift, axis=1) if shift else s
        if oy == 0:                                            # center row: mask is all-ones
            acc = acc + rs
        else:
            acc = acc + rs * masks[ty:ty + 1]                  # (1, HW) row validity
    sp_att = jax.nn.sigmoid(acc)                               # (Bt, HW)

    # Single output store (lane-dense, unmasked).
    out_ref[...] = (gated * sp_att[:, None, :]).astype(out_ref.dtype)


def _num_tensorcores():
    # 1 TensorCore per device on v5e/v6e; >1 (e.g. v7x) means the grid should
    # have exactly that many parallel steps.  Default to 1 if unknown.
    try:
        n = getattr(jax.devices()[0], "num_cores", None)
        if n:
            return max(1, int(n))
    except Exception:
        pass
    return 1


def _pick_batch_block(B, bytes_per_image, *, target_bytes=4 << 20, min_steps=1):
    # Largest divisor of B keeping one block near target_bytes while leaving
    # `min_steps` grid steps (1 on single-TC chips, num cores otherwise).
    cap = max(1, int(target_bytes // max(bytes_per_image, 1)))
    if min_steps > 1 and B >= min_steps:
        cap = min(cap, B // min_steps)
    cap = max(1, min(cap, B))
    for bt in range(cap, 0, -1):
        if B % bt == 0:
            return bt
    return 1


def cbam_forward(x, w1, w2, w_sp, *, kernel_size=7, batch_block=None):
    """x: (B, C, H, W); w1: (mid, C); w2: (C, mid); w_sp: (2, K, K)."""
    B, C, H, W = x.shape
    mid = w1.shape[0]
    K = kernel_size
    pad = K // 2
    HW = H * W

    x_flat = x.reshape(B, C, HW)                                   # lane-dense layout
    w_mlp = jnp.concatenate([jnp.transpose(w1), w2], axis=0).astype(jnp.float32)  # (2C, mid)
    wsp_flat = w_sp.reshape(-1).astype(jnp.float32)                # (2*K*K,) -> SMEM

    # Edge-validity masks of the SAME conv per row/col offset (static; keeps
    # integer div/mod out of the kernel).
    h_idx = jnp.arange(HW, dtype=jnp.int32) // W
    w_idx = jnp.arange(HW, dtype=jnp.int32) % W
    offs = jnp.arange(K, dtype=jnp.int32)[:, None] - pad           # (K, 1)
    row_mask = (h_idx[None, :] + offs >= 0) & (h_idx[None, :] + offs < H)
    col_mask = (w_idx[None, :] + offs >= 0) & (w_idx[None, :] + offs < W)
    masks = jnp.concatenate([row_mask, col_mask], axis=0).astype(jnp.float32)  # (2K, HW)

    if batch_block is None:
        bt = _pick_batch_block(B, C * HW * x.dtype.itemsize,
                               min_steps=_num_tensorcores())
    else:
        bt = batch_block
    assert B % bt == 0, (B, bt)

    # Scoped-VMEM estimate: double-buffered in/out blocks + resident tables.
    block_bytes = bt * C * HW * x.dtype.itemsize
    aux_bytes = int(masks.size + w_mlp.size) * 4
    est_vmem = 4 * block_bytes + 2 * aux_bytes + (1 << 20)
    cp_kwargs = {}
    if est_vmem > (16 << 20):
        cp_kwargs["vmem_limit_bytes"] = int(min(est_vmem, 56 << 20))

    out_flat = pl.pallas_call(
        functools.partial(cbam_kernel, W=W, kernel_size=K),
        out_shape=jax.ShapeDtypeStruct((B, C, HW), x.dtype),
        grid=(B // bt,),
        in_specs=[
            pl.BlockSpec((bt, C, HW), lambda b: (b, 0, 0)),
            pl.BlockSpec((2 * C, mid), lambda b: (0, 0)),
            pl.BlockSpec((2 * K, HW), lambda b: (0, 0)),
            pl.BlockSpec(memory_space=pltpu.MemorySpace.SMEM),
        ],
        out_specs=pl.BlockSpec((bt, C, HW), lambda b: (b, 0, 0)),
        compiler_params=pltpu.CompilerParams(
            dimension_semantics=("parallel",), **cp_kwargs),
    )(x_flat, w_mlp, masks, wsp_flat)
    return out_flat.reshape(B, C, H, W)


def cbam_ref(x, w1, w2, w_sp):
    """Pure-JAX reference matching the PyTorch forward."""
    avg = jnp.mean(x, axis=(2, 3))                             # (B, C)
    hidden = jax.nn.relu(avg @ w1.T)                           # (B, mid)
    logits = hidden @ w2.T                                     # (B, C)
    ch_att = jax.nn.sigmoid(logits)[:, :, None, None]
    x_ch = x * ch_att
    max_pool = jnp.max(x_ch, axis=1, keepdims=True)
    mean_pool = jnp.mean(x_ch, axis=1, keepdims=True)
    sp_in = jnp.concatenate([max_pool, mean_pool], axis=1)     # (B, 2, H, W)
    sp = jax.lax.conv_general_dilated(
        sp_in, w_sp[None], window_strides=(1, 1), padding="SAME",
        dimension_numbers=("NCHW", "OIHW", "NCHW"))
    sp_att = jax.nn.sigmoid(sp)
    return x_ch * sp_att


if __name__ == "__main__":
    B, C, H, W = 4, 32, 16, 16
    reduction_ratio, kernel_size = 16, 7
    mid = C // reduction_ratio

    key = jax.random.PRNGKey(0)
    kx, k1, k2, k3 = jax.random.split(key, 4)
    x = jax.random.normal(kx, (B, C, H, W), jnp.float32)
    w1 = jax.random.normal(k1, (mid, C), jnp.float32) * 0.1     # Conv2d(C, mid, 1).weight squeezed
    w2 = jax.random.normal(k2, (C, mid), jnp.float32) * 0.1     # Conv2d(mid, C, 1).weight squeezed
    w_sp = jax.random.normal(k3, (2, kernel_size, kernel_size), jnp.float32) * 0.1  # Conv2d(2,1,7).weight squeezed

    out = jax.block_until_ready(cbam_forward(x, w1, w2, w_sp, kernel_size=kernel_size))

    ref = cbam_ref(x, w1, w2, w_sp)
    err = float(jnp.max(jnp.abs(out - ref)))
    assert jnp.allclose(out, ref, atol=1e-4, rtol=1e-4), f"max abs err {err}"
    print("KERNEL_OK")
</pallas_src>

<mosaic_0001>
module attributes {stable_mosaic.version = 11 : i64} {
  func.func @cbam_kernel(%arg0: i32, %arg1: memref<4x32x256xf32, #tpu.memory_space<vmem>>, %arg2: memref<64x2xf32, #tpu.memory_space<vmem>>, %arg3: memref<14x256xf32, #tpu.memory_space<vmem>>, %arg4: memref<98xf32, #tpu.memory_space<smem>>, %arg5: memref<4x32x256xf32, #tpu.memory_space<vmem>>) attributes {dimension_semantics = [#tpu.dimension_semantics<parallel>], iteration_bounds = array<i64: 1>, scalar_prefetch = 0 : i64, scratch_operands = 0 : i64, tpu.core_type = #tpu.core_type<tc>, window_params = [{transform_indices = @transform_0, window_bounds = array<i64: 4, 32, 256>}, {pipeline_mode = #tpu.pipeline_mode<synchronous>, transform_indices = @transform_1, window_bounds = array<i64: 64, 2>}, {pipeline_mode = #tpu.pipeline_mode<synchronous>, transform_indices = @transform_2, window_bounds = array<i64: 14, 256>}, {transform_indices = @transform_3, window_bounds = array<i64: 98>}, {transform_indices = @transform_4, window_bounds = array<i64: 4, 32, 256>}]} {
    %c0 = arith.constant 0 : index
    %c0_0 = arith.constant 0 : index
    %c0_1 = arith.constant 0 : index
    %0 = vector.load %arg1[%c0, %c0_0, %c0_1] : memref<4x32x256xf32, #tpu.memory_space<vmem>>, vector<4x32x256xf32>
    %cst = arith.constant dense<0.000000e+00> : vector<4x32xf32>
    %1 = vector.multi_reduction <add>, %0, %cst [2] : vector<4x32x256xf32> to vector<4x32xf32>
    %2 = vector.shape_cast %1 : vector<4x32xf32> to vector<4x32x1xf32>
    %cst_2 = arith.constant 3.906250e-03 : f32
    %3 = vector.broadcast %cst_2 : f32 to vector<4x32x1xf32>
    %4 = arith.mulf %2, %3 : vector<4x32x1xf32>
    %c0_3 = arith.constant 0 : index
    %c0_4 = arith.constant 0 : index
    %5 = vector.load %arg2[%c0_3, %c0_4] : memref<64x2xf32, #tpu.memory_space<vmem>>, vector<64x2xf32>
    %6 = vector.extract_strided_slice %5 {offsets = [0, 0], sizes = [32, 2], strides = [1, 1]} : vector<64x2xf32> to vector<32x2xf32>
    %7 = vector.extract_strided_slice %5 {offsets = [32, 0], sizes = [32, 2], strides = [1, 1]} : vector<64x2xf32> to vector<32x2xf32>
    %8 = vector.shape_cast %6 : vector<32x2xf32> to vector<1x32x2xf32>
    %9 = vector.broadcast %4 : vector<4x32x1xf32> to vector<4x32x2xf32>
    %10 = vector.broadcast %8 : vector<1x32x2xf32> to vector<4x32x2xf32>
    %11 = arith.mulf %9, %10 : vector<4x32x2xf32>
    %cst_5 = arith.constant dense<0.000000e+00> : vector<4x2xf32>
    %12 = vector.multi_reduction <add>, %11, %cst_5 [1] : vector<4x32x2xf32> to vector<4x2xf32>
    %13 = vector.shape_cast %12 : vector<4x2xf32> to vector<4x1x2xf32>
    %cst_6 = arith.constant 0.000000e+00 : f32
    %14 = vector.broadcast %cst_6 : f32 to vector<4x1x2xf32>
    %15 = arith.maximumf %13, %14 : vector<4x1x2xf32>
    %16 = vector.shape_cast %7 : vector<32x2xf32> to vector<1x32x2xf32>
    %17 = vector.broadcast %16 : vector<1x32x2xf32> to vector<4x32x2xf32>
    %18 = vector.broadcast %15 : vector<4x1x2xf32> to vector<4x32x2xf32>
    %19 = arith.mulf %17, %18 : vector<4x32x2xf32>
    %cst_7 = arith.constant dense<0.000000e+00> : vector<4x32xf32>
    %20 = vector.multi_reduction <add>, %19, %cst_7 [2] : vector<4x32x2xf32> to vector<4x32xf32>
    %21 = vector.shape_cast %20 : vector<4x32xf32> to vector<4x32x1xf32>
    %22 = arith.negf %21 : vector<4x32x1xf32>
    %23 = math.exp %22 : vector<4x32x1xf32>
    %cst_8 = arith.constant 1.000000e+00 : f32
    %24 = vector.broadcast %cst_8 : f32 to vector<4x32x1xf32>
    %25 = arith.addf %24, %23 : vector<4x32x1xf32>
    %26 = arith.divf %24, %25 : vector<4x32x1xf32>
    %27 = vector.broadcast %26 : vector<4x32x1xf32> to vector<4x32x256xf32>
    %28 = arith.mulf %0, %27 : vector<4x32x256xf32>
    %cst_9 = arith.constant dense<0xFF800000> : vector<4x256xf32>
    %29 = vector.multi_reduction <maximumf>, %28, %cst_9 [1] : vector<4x32x256xf32> to vector<4x256xf32>
    %cst_10 = arith.constant dense<0.000000e+00> : vector<4x256xf32>
    %30 = vector.multi_reduction <add>, %28, %cst_10 [1] : vector<4x32x256xf32> to vector<4x256xf32>
    %cst_11 = arith.constant 3.125000e-02 : f32
    %31 = vector.broadcast %cst_11 : f32 to vector<4x256xf32>
    %32 = arith.mulf %30, %31 : vector<4x256xf32>
    %c0_12 = arith.constant 0 : index
    %c0_13 = arith.constant 0 : index
    %33 = vector.load %arg3[%c0_12, %c0_13] : memref<14x256xf32, #tpu.memory_space<vmem>>, vector<14x256xf32>
    %c3_i32 = arith.constant 3 : i32
    %34 = tpu.dynamic_rotate %29 by %c3_i32 dim 1 : vector<4x256xf32>, i32 -> vector<4x256xf32>
    %c3_i32_14 = arith.constant 3 : i32
    %35 = tpu.dynamic_rotate %32 by %c3_i32_14 dim 1 : vector<4x256xf32>, i32 -> vector<4x256xf32>
    %36 = vector.extract_strided_slice %33 {offsets = [7, 0], sizes = [1, 256], strides = [1, 1]} : vector<14x256xf32> to vector<1x256xf32>
    %37 = vector.broadcast %36 : vector<1x256xf32> to vector<4x256xf32>
    %38 = arith.mulf %34, %37 : vector<4x256xf32>
    %39 = vector.broadcast %36 : vector<1x256xf32> to vector<4x256xf32>
    %40 = arith.mulf %35, %39 : vector<4x256xf32>
    %c2_i32 = arith.constant 2 : i32
    %41 = tpu.dynamic_rotate %29 by %c2_i32 dim 1 : vector<4x256xf32>, i32 -> vector<4x256xf32>
    %c2_i32_15 = arith.constant 2 : i32
    %42 = tpu.dynamic_rotate %32 by %c2_i32_15 dim 1 : vector<4x256xf32>, i32 -> vector<4x256xf32>
    %43 = vector.extract_strided_slice %33 {offsets = [8, 0], sizes = [1, 256], strides = [1, 1]} : vector<14x256xf32> to vector<1x256xf32>
    %44 = vector.broadcast %43 : vector<1x256xf32> to vector<4x256xf32>
    %45 = arith.mulf %41, %44 : vector<4x256xf32>
    %46 = vector.broadcast %43 : vector<1x256xf32> to vector<4x256xf32>
    %47 = arith.mulf %42, %46 : vector<4x256xf32>
    %c1_i32 = arith.constant 1 : i32
    %48 = tpu.dynamic_rotate %29 by %c1_i32 dim 1 : vector<4x256xf32>, i32 -> vector<4x256xf32>
    %c1_i32_16 = arith.constant 1 : i32
    %49 = tpu.dynamic_rotate %32 by %c1_i32_16 dim 1 : vector<4x256xf32>, i32 -> vector<4x256xf32>
    %50 = vector.extract_strided_slice %33 {offsets = [9, 0], sizes = [1, 256], strides = [1, 1]} : vector<14x256xf32> to vector<1x256xf32>
    %51 = vector.broadcast %50 : vector<1x256xf32> to vector<4x256xf32>
    %52 = arith.mulf %48, %51 : vector<4x256xf32>
    %53 = vector.broadcast %50 : vector<1x256xf32> to vector<4x256xf32>
    %54 = arith.mulf %49, %53 : vector<4x256xf32>
    %c255_i32 = arith.constant 255 : i32
    %55 = tpu.dynamic_rotate %29 by %c255_i32 dim 1 : vector<4x256xf32>, i32 -> vector<4x256xf32>
    %c255_i32_17 = arith.constant 255 : i32
    %56 = tpu.dynamic_rotate %32 by %c255_i32_17 dim 1 : vector<4x256xf32>, i32 -> vector<4x256xf32>
    %57 = vector.extract_strided_slice %33 {offsets = [11, 0], sizes = [1, 256], strides = [1, 1]} : vector<14x256xf32> to vector<1x256xf32>
    %58 = vector.broadcast %57 : vector<1x256xf32> to vector<4x256xf32>
    %59 = arith.mulf %55, %58 : vector<4x256xf32>
    %60 = vector.broadcast %57 : vector<1x256xf32> to vector<4x256xf32>
    %61 = arith.mulf %56, %60 : vector<4x256xf32>
    %c254_i32 = arith.constant 254 : i32
    %62 = tpu.dynamic_rotate %29 by %c254_i32 dim 1 : vector<4x256xf32>, i32 -> vector<4x256xf32>
    %c254_i32_18 = arith.constant 254 : i32
    %63 = tpu.dynamic_rotate %32 by %c254_i32_18 dim 1 : vector<4x256xf32>, i32 -> vector<4x256xf32>
    %64 = vector.extract_strided_slice %33 {offsets = [12, 0], sizes = [1, 256], strides = [1, 1]} : vector<14x256xf32> to vector<1x256xf32>
    %65 = vector.broadcast %64 : vector<1x256xf32> to vector<4x256xf32>
    %66 = arith.mulf %62, %65 : vector<4x256xf32>
    %67 = vector.broadcast %64 : vector<1x256xf32> to vector<4x256xf32>
    %68 = arith.mulf %63, %67 : vector<4x256xf32>
    %c253_i32 = arith.constant 253 : i32
    %69 = tpu.dynamic_rotate %29 by %c253_i32 dim 1 : vector<4x256xf32>, i32 -> vector<4x256xf32>
    %c253_i32_19 = arith.constant 253 : i32
    %70 = tpu.dynamic_rotate %32 by %c253_i32_19 dim 1 : vector<4x256xf32>, i32 -> vector<4x256xf32>
    %71 = vector.extract_strided_slice %33 {offsets = [13, 0], sizes = [1, 256], strides = [1, 1]} : vector<14x256xf32> to vector<1x256xf32>
    %72 = vector.broadcast %71 : vector<1x256xf32> to vector<4x256xf32>
    %73 = arith.mulf %69, %72 : vector<4x256xf32>
    %74 = vector.broadcast %71 : vector<1x256xf32> to vector<4x256xf32>
    %75 = arith.mulf %70, %74 : vector<4x256xf32>
    %cst_20 = arith.constant 0.000000e+00 : f32
    %76 = vector.broadcast %cst_20 : f32 to vector<4x256xf32>
    %cst_21 = arith.constant 0.000000e+00 : f32
    %77 = vector.broadcast %cst_21 : f32 to vector<4x256xf32>
    %c0_22 = arith.constant 0 : index
    %78 = memref.load %arg4[%c0_22] : memref<98xf32, #tpu.memory_space<smem>>
    %c49 = arith.constant 49 : index
    %79 = memref.load %arg4[%c49] : memref<98xf32, #tpu.memory_space<smem>>
    %80 = vector.broadcast %78 : f32 to vector<4x256xf32>
    %81 = arith.mulf %80, %38 : vector<4x256xf32>
    %82 = arith.addf %77, %81 : vector<4x256xf32>
    %83 = vector.broadcast %79 : f32 to vector<4x256xf32>
    %84 = arith.mulf %83, %40 : vector<4x256xf32>
    %85 = arith.addf %82, %84 : vector<4x256xf32>
    %c1 = arith.constant 1 : index
    %86 = memref.load %arg4[%c1] : memref<98xf32, #tpu.memory_space<smem>>
    %c50 = arith.constant 50 : index
    %87 = memref.load %arg4[%c50] : memref<98xf32, #tpu.memory_space<smem>>
    %88 = vector.broadcast %86 : f32 to vector<4x256xf32>
    %89 = arith.mulf %88, %45 : vector<4x256xf32>
    %90 = arith.addf %85, %89 : vector<4x256xf32>
    %91 = vector.broadcast %87 : f32 to vector<4x256xf32>
    %92 = arith.mulf %91, %47 : vector<4x256xf32>
    %93 = arith.addf %90, %92 : vector<4x256xf32>
    %c2 = arith.constant 2 : index
    %94 = memref.load %arg4[%c2] : memref<98xf32, #tpu.memory_space<smem>>
    %c51 = arith.constant 51 : index
    %95 = memref.load %arg4[%c51] : memref<98xf32, #tpu.memory_space<smem>>
    %96 = vector.broadcast %94 : f32 to vector<4x256xf32>
    %97 = arith.mulf %96, %52 : vector<4x256xf32>
    %98 = arith.addf %93, %97 : vector<4x256xf32>
    %99 = vector.broadcast %95 : f32 to vector<4x256xf32>
    %100 = arith.mulf %99, %54 : vector<4x256xf32>
    %101 = arith.addf %98, %100 : vector<4x256xf32>
    %c3 = arith.constant 3 : index
    %102 = memref.load %arg4[%c3] : memref<98xf32, #tpu.memory_space<smem>>
    %c52 = arith.constant 52 : index
    %103 = memref.load %arg4[%c52] : memref<98xf32, #tpu.memory_space<smem>>
    %104 = vector.broadcast %102 : f32 to vector<4x256xf32>
    %105 = arith.mulf %104, %29 : vector<4x256xf32>
    %106 = arith.addf %101, %105 : vector<4x256xf32>
    %107 = vector.broadcast %103 : f32 to vector<4x256xf32>
    %108 = arith.mulf %107, %32 : vector<4x256xf32>
    %109 = arith.addf %106, %108 : vector<4x256xf32>
    %c4 = arith.constant 4 : index
    %110 = memref.load %arg4[%c4] : memref<98xf32, #tpu.memory_space<smem>>
    %c53 = arith.constant 53 : index
    %111 = memref.load %arg4[%c53] : memref<98xf32, #tpu.memory_space<smem>>
    %112 = vector.broadcast %110 : f32 to vector<4x256xf32>
    %113 = arith.mulf %112, %59 : vector<4x256xf32>
    %114 = arith.addf %109, %113 : vector<4x256xf32>
    %115 = vector.broadcast %111 : f32 to vector<4x256xf32>
    %116 = arith.mulf %115, %61 : vector<4x256xf32>
    %117 = arith.addf %114, %116 : vector<4x256xf32>
    %c5 = arith.constant 5 : index
    %118 = memref.load %arg4[%c5] : memref<98xf32, #tpu.memory_space<smem>>
    %c54 = arith.constant 54 : index
    %119 = memref.load %arg4[%c54] : memref<98xf32, #tpu.memory_space<smem>>
    %120 = vector.broadcast %118 : f32 to vector<4x256xf32>
    %121 = arith.mulf %120, %66 : vector<4x256xf32>
    %122 = arith.addf %117, %121 : vector<4x256xf32>
    %123 = vector.broadcast %119 : f32 to vector<4x256xf32>
    %124 = arith.mulf %123, %68 : vector<4x256xf32>
    %125 = arith.addf %122, %124 : vector<4x256xf32>
    %c6 = arith.constant 6 : index
    %126 = memref.load %arg4[%c6] : memref<98xf32, #tpu.memory_space<smem>>
    %c55 = arith.constant 55 : index
    %127 = memref.load %arg4[%c55] : memref<98xf32, #tpu.memory_space<smem>>
    %128 = vector.broadcast %126 : f32 to vector<4x256xf32>
    %129 = arith.mulf %128, %73 : vector<4x256xf32>
    %130 = arith.addf %125, %129 : vector<4x256xf32>
    %131 = vector.broadcast %127 : f32 to vector<4x256xf32>
    %132 = arith.mulf %131, %75 : vector<4x256xf32>
    %133 = arith.addf %130, %132 : vector<4x256xf32>
    %c48_i32 = arith.constant 48 : i32
    %134 = tpu.dynamic_rotate %133 by %c48_i32 dim 1 : vector<4x256xf32>, i32 -> vector<4x256xf32>
    %135 = vector.extract_strided_slice %33 {offsets = [0, 0], sizes = [1, 256], strides = [1, 1]} : vector<14x256xf32> to vector<1x256xf32>
    %136 = vector.broadcast %135 : vector<1x256xf32> to vector<4x256xf32>
    %137 = arith.mulf %134, %136 : vector<4x256xf32>
    %138 = arith.addf %76, %137 : vector<4x256xf32>
    %cst_23 = arith.constant 0.000000e+00 : f32
    %139 = vector.broadcast %cst_23 : f32 to vector<4x256xf32>
    %c7 = arith.constant 7 : index
    %140 = memref.load %arg4[%c7] : memref<98xf32, #tpu.memory_space<smem>>
    %c56 = arith.constant 56 : index
    %141 = memref.load %arg4[%c56] : memref<98xf32, #tpu.memory_space<smem>>
    %142 = vector.broadcast %140 : f32 to vector<4x256xf32>
    %143 = arith.mulf %142, %38 : vector<4x256xf32>
    %144 = arith.addf %139, %143 : vector<4x256xf32>
    %145 = vector.broadcast %141 : f32 to vector<4x256xf32>
    %146 = arith.mulf %145, %40 : vector<4x256xf32>
    %147 = arith.addf %144, %146 : vector<4x256xf32>
    %c8 = arith.constant 8 : index
    %148 = memref.load %arg4[%c8] : memref<98xf32, #tpu.memory_space<smem>>
    %c57 = arith.constant 57 : index
    %149 = memref.load %arg4[%c57] : memref<98xf32, #tpu.memory_space<smem>>
    %150 = vector.broadcast %148 : f32 to vector<4x256xf32>
    %151 = arith.mulf %150, %45 : vector<4x256xf32>
    %152 = arith.addf %147, %151 : vector<4x256xf32>
    %153 = vector.broadcast %149 : f32 to vector<4x256xf32>
    %154 = arith.mulf %153, %47 : vector<4x256xf32>
    %155 = arith.addf %152, %154 : vector<4x256xf32>
    %c9 = arith.constant 9 : index
    %156 = memref.load %arg4[%c9] : memref<98xf32, #tpu.memory_space<smem>>
    %c58 = arith.constant 58 : index
    %157 = memref.load %arg4[%c58] : memref<98xf32, #tpu.memory_space<smem>>
    %158 = vector.broadcast %156 : f32 to vector<4x256xf32>
    %159 = arith.mulf %158, %52 : vector<4x256xf32>
    %160 = arith.addf %155, %159 : vector<4x256xf32>
    %161 = vector.broadcast %157 : f32 to vector<4x256xf32>
    %162 = arith.mulf %161, %54 : vector<4x256xf32>
    %163 = arith.addf %160, %162 : vector<4x256xf32>
    %c10 = arith.constant 10 : index
    %164 = memref.load %arg4[%c10] : memref<98xf32, #tpu.memory_space<smem>>
    %c59 = arith.constant 59 : index
    %165 = memref.load %arg4[%c59] : memref<98xf32, #tpu.memory_space<smem>>
    %166 = vector.broadcast %164 : f32 to vector<4x256xf32>
    %167 = arith.mulf %166, %29 : vector<4x256xf32>
    %168 = arith.addf %163, %167 : vector<4x256xf32>
    %169 = vector.broadcast %165 : f32 to vector<4x256xf32>
    %170 = arith.mulf %169, %32 : vector<4x256xf32>
    %171 = arith.addf %168, %170 : vector<4x256xf32>
    %c11 = arith.constant 11 : index
    %172 = memref.load %arg4[%c11] : memref<98xf32, #tpu.memory_space<smem>>
    %c60 = arith.constant 60 : index
    %173 = memref.load %arg4[%c60] : memref<98xf32, #tpu.memory_space<smem>>
    %174 = vector.broadcast %172 : f32 to vector<4x256xf32>
    %175 = arith.mulf %174, %59 : vector<4x256xf32>
    %176 = arith.addf %171, %175 : vector<4x256xf32>
    %177 = vector.broadcast %173 : f32 to vector<4x256xf32>
    %178 = arith.mulf %177, %61 : vector<4x256xf32>
    %179 = arith.addf %176, %178 : vector<4x256xf32>
    %c12 = arith.constant 12 : index
    %180 = memref.load %arg4[%c12] : memref<98xf32, #tpu.memory_space<smem>>
    %c61 = arith.constant 61 : index
    %181 = memref.load %arg4[%c61] : memref<98xf32, #tpu.memory_space<smem>>
    %182 = vector.broadcast %180 : f32 to vector<4x256xf32>
    %183 = arith.mulf %182, %66 : vector<4x256xf32>
    %184 = arith.addf %179, %183 : vector<4x256xf32>
    %185 = vector.broadcast %181 : f32 to vector<4x256xf32>
    %186 = arith.mulf %185, %68 : vector<4x256xf32>
    %187 = arith.addf %184, %186 : vector<4x256xf32>
    %c13 = arith.constant 13 : index
    %188 = memref.load %arg4[%c13] : memref<98xf32, #tpu.memory_space<smem>>
    %c62 = arith.constant 62 : index
    %189 = memref.load %arg4[%c62] : memref<98xf32, #tpu.memory_space<smem>>
    %190 = vector.broadcast %188 : f32 to vector<4x256xf32>
    %191 = arith.mulf %190, %73 : vector<4x256xf32>
    %192 = arith.addf %187, %191 : vector<4x256xf32>
    %193 = vector.broadcast %189 : f32 to vector<4x256xf32>
    %194 = arith.mulf %193, %75 : vector<4x256xf32>
    %195 = arith.addf %192, %194 : vector<4x256xf32>
    %c32_i32 = arith.constant 32 : i32
    %196 = tpu.dynamic_rotate %195 by %c32_i32 dim 1 : vector<4x256xf32>, i32 -> vector<4x256xf32>
    %197 = vector.extract_strided_slice %33 {offsets = [1, 0], sizes = [1, 256], strides = [1, 1]} : vector<14x256xf32> to vector<1x256xf32>
    %198 = vector.broadcast %197 : vector<1x256xf32> to vector<4x256xf32>
    %199 = arith.mulf %196, %198 : vector<4x256xf32>
    %200 = arith.addf %138, %199 : vector<4x256xf32>
    %cst_24 = arith.constant 0.000000e+00 : f32
    %201 = vector.broadcast %cst_24 : f32 to vector<4x256xf32>
    %c14 = arith.constant 14 : index
    %202 = memref.load %arg4[%c14] : memref<98xf32, #tpu.memory_space<smem>>
    %c63 = arith.constant 63 : index
    %203 = memref.load %arg4[%c63] : memref<98xf32, #tpu.memory_space<smem>>
    %204 = vector.broadcast %202 : f32 to vector<4x256xf32>
    %205 = arith.mulf %204, %38 : vector<4x256xf32>
    %206 = arith.addf %201, %205 : vector<4x256xf32>
    %207 = vector.broadcast %203 : f32 to vector<4x256xf32>
    %208 = arith.mulf %207, %40 : vector<4x256xf32>
    %209 = arith.addf %206, %208 : vector<4x256xf32>
    %c15 = arith.constant 15 : index
    %210 = memref.load %arg4[%c15] : memref<98xf32, #tpu.memory_space<smem>>
    %c64 = arith.constant 64 : index
    %211 = memref.load %arg4[%c64] : memref<98xf32, #tpu.memory_space<smem>>
    %212 = vector.broadcast %210 : f32 to vector<4x256xf32>
    %213 = arith.mulf %212, %45 : vector<4x256xf32>
    %214 = arith.addf %209, %213 : vector<4x256xf32>
    %215 = vector.broadcast %211 : f32 to vector<4x256xf32>
    %216 = arith.mulf %215, %47 : vector<4x256xf32>
    %217 = arith.addf %214, %216 : vector<4x256xf32>
    %c16 = arith.constant 16 : index
    %218 = memref.load %arg4[%c16] : memref<98xf32, #tpu.memory_space<smem>>
    %c65 = arith.constant 65 : index
    %219 = memref.load %arg4[%c65] : memref<98xf32, #tpu.memory_space<smem>>
    %220 = vector.broadcast %218 : f32 to vector<4x256xf32>
    %221 = arith.mulf %220, %52 : vector<4x256xf32>
    %222 = arith.addf %217, %221 : vector<4x256xf32>
    %223 = vector.broadcast %219 : f32 to vector<4x256xf32>
    %224 = arith.mulf %223, %54 : vector<4x256xf32>
    %225 = arith.addf %222, %224 : vector<4x256xf32>
    %c17 = arith.constant 17 : index
    %226 = memref.load %arg4[%c17] : memref<98xf32, #tpu.memory_space<smem>>
    %c66 = arith.constant 66 : index
    %227 = memref.load %arg4[%c66] : memref<98xf32, #tpu.memory_space<smem>>
    %228 = vector.broadcast %226 : f32 to vector<4x256xf32>
    %229 = arith.mulf %228, %29 : vector<4x256xf32>
    %230 = arith.addf %225, %229 : vector<4x256xf32>
    %231 = vector.broadcast %227 : f32 to vector<4x256xf32>
    %232 = arith.mulf %231, %32 : vector<4x256xf32>
    %233 = arith.addf %230, %232 : vector<4x256xf32>
    %c18 = arith.constant 18 : index
    %234 = memref.load %arg4[%c18] : memref<98xf32, #tpu.memory_space<smem>>
    %c67 = arith.constant 67 : index
    %235 = memref.load %arg4[%c67] : memref<98xf32, #tpu.memory_space<smem>>
    %236 = vector.broadcast %234 : f32 to vector<4x256xf32>
    %237 = arith.mulf %236, %59 : vector<4x256xf32>
    %238 = arith.addf %233, %237 : vector<4x256xf32>
    %239 = vector.broadcast %235 : f32 to vector<4x256xf32>
    %240 = arith.mulf %239, %61 : vector<4x256xf32>
    %241 = arith.addf %238, %240 : vector<4x256xf32>
    %c19 = arith.constant 19 : index
    %242 = memref.load %arg4[%c19] : memref<98xf32, #tpu.memory_space<smem>>
    %c68 = arith.constant 68 : index
    %243 = memref.load %arg4[%c68] : memref<98xf32, #tpu.memory_space<smem>>
    %244 = vector.broadcast %242 : f32 to vector<4x256xf32>
    %245 = arith.mulf %244, %66 : vector<4x256xf32>
    %246 = arith.addf %241, %245 : vector<4x256xf32>
    %247 = vector.broadcast %243 : f32 to vector<4x256xf32>
    %248 = arith.mulf %247, %68 : vector<4x256xf32>
    %249 = arith.addf %246, %248 : vector<4x256xf32>
    %c20 = arith.constant 20 : index
    %250 = memref.load %arg4[%c20] : memref<98xf32, #tpu.memory_space<smem>>
    %c69 = arith.constant 69 : index
    %251 = memref.load %arg4[%c69] : memref<98xf32, #tpu.memory_space<smem>>
    %252 = vector.broadcast %250 : f32 to vector<4x256xf32>
    %253 = arith.mulf %252, %73 : vector<4x256xf32>
    %254 = arith.addf %249, %253 : vector<4x256xf32>
    %255 = vector.broadcast %251 : f32 to vector<4x256xf32>
    %256 = arith.mulf %255, %75 : vector<4x256xf32>
    %257 = arith.addf %254, %256 : vector<4x256xf32>
    %c16_i32 = arith.constant 16 : i32
    %258 = tpu.dynamic_rotate %257 by %c16_i32 dim 1 : vector<4x256xf32>, i32 -> vector<4x256xf32>
    %259 = vector.extract_strided_slice %33 {offsets = [2, 0], sizes = [1, 256], strides = [1, 1]} : vector<14x256xf32> to vector<1x256xf32>
    %260 = vector.broadcast %259 : vector<1x256xf32> to vector<4x256xf32>
    %261 = arith.mulf %258, %260 : vector<4x256xf32>
    %262 = arith.addf %200, %261 : vector<4x256xf32>
    %cst_25 = arith.constant 0.000000e+00 : f32
    %263 = vector.broadcast %cst_25 : f32 to vector<4x256xf32>
    %c21 = arith.constant 21 : index
    %264 = memref.load %arg4[%c21] : memref<98xf32, #tpu.memory_space<smem>>
    %c70 = arith.constant 70 : index
    %265 = memref.load %arg4[%c70] : memref<98xf32, #tpu.memory_space<smem>>
    %266 = vector.broadcast %264 : f32 to vector<4x256xf32>
    %267 = arith.mulf %266, %38 : vector<4x256xf32>
    %268 = arith.addf %263, %267 : vector<4x256xf32>
    %269 = vector.broadcast %265 : f32 to vector<4x256xf32>
    %270 = arith.mulf %269, %40 : vector<4x256xf32>
    %271 = arith.addf %268, %270 : vector<4x256xf32>
    %c22 = arith.constant 22 : index
    %272 = memref.load %arg4[%c22] : memref<98xf32, #tpu.memory_space<smem>>
    %c71 = arith.constant 71 : index
    %273 = memref.load %arg4[%c71] : memref<98xf32, #tpu.memory_space<smem>>
    %274 = vector.broadcast %272 : f32 to vector<4x256xf32>
    %275 = arith.mulf %274, %45 : vector<4x256xf32>
    %276 = arith.addf %271, %275 : vector<4x256xf32>
    %277 = vector.broadcast %273 : f32 to vector<4x256xf32>
    %278 = arith.mulf %277, %47 : vector<4x256xf32>
    %279 = arith.addf %276, %278 : vector<4x256xf32>
    %c23 = arith.constant 23 : index
    %280 = memref.load %arg4[%c23] : memref<98xf32, #tpu.memory_space<smem>>
    %c72 = arith.constant 72 : index
    %281 = memref.load %arg4[%c72] : memref<98xf32, #tpu.memory_space<smem>>
    %282 = vector.broadcast %280 : f32 to vector<4x256xf32>
    %283 = arith.mulf %282, %52 : vector<4x256xf32>
    %284 = arith.addf %279, %283 : vector<4x256xf32>
    %285 = vector.broadcast %281 : f32 to vector<4x256xf32>
    %286 = arith.mulf %285, %54 : vector<4x256xf32>
    %287 = arith.addf %284, %286 : vector<4x256xf32>
    %c24 = arith.constant 24 : index
    %288 = memref.load %arg4[%c24] : memref<98xf32, #tpu.memory_space<smem>>
    %c73 = arith.constant 73 : index
    %289 = memref.load %arg4[%c73] : memref<98xf32, #tpu.memory_space<smem>>
    %290 = vector.broadcast %288 : f32 to vector<4x256xf32>
    %291 = arith.mulf %290, %29 : vector<4x256xf32>
    %292 = arith.addf %287, %291 : vector<4x256xf32>
    %293 = vector.broadcast %289 : f32 to vector<4x256xf32>
    %294 = arith.mulf %293, %32 : vector<4x256xf32>
    %295 = arith.addf %292, %294 : vector<4x256xf32>
    %c25 = arith.constant 25 : index
    %296 = memref.load %arg4[%c25] : memref<98xf32, #tpu.memory_space<smem>>
    %c74 = arith.constant 74 : index
    %297 = memref.load %arg4[%c74] : memref<98xf32, #tpu.memory_space<smem>>
    %298 = vector.broadcast %296 : f32 to vector<4x256xf32>
    %299 = arith.mulf %298, %59 : vector<4x256xf32>
    %300 = arith.addf %295, %299 : vector<4x256xf32>
    %301 = vector.broadcast %297 : f32 to vector<4x256xf32>
    %302 = arith.mulf %301, %61 : vector<4x256xf32>
    %303 = arith.addf %300, %302 : vector<4x256xf32>
    %c26 = arith.constant 26 : index
    %304 = memref.load %arg4[%c26] : memref<98xf32, #tpu.memory_space<smem>>
    %c75 = arith.constant 75 : index
    %305 = memref.load %arg4[%c75] : memref<98xf32, #tpu.memory_space<smem>>
    %306 = vector.broadcast %304 : f32 to vector<4x256xf32>
    %307 = arith.mulf %306, %66 : vector<4x256xf32>
    %308 = arith.addf %303, %307 : vector<4x256xf32>
    %309 = vector.broadcast %305 : f32 to vector<4x256xf32>
    %310 = arith.mulf %309, %68 : vector<4x256xf32>
    %311 = arith.addf %308, %310 : vector<4x256xf32>
    %c27 = arith.constant 27 : index
    %312 = memref.load %arg4[%c27] : memref<98xf32, #tpu.memory_space<smem>>
    %c76 = arith.constant 76 : index
    %313 = memref.load %arg4[%c76] : memref<98xf32, #tpu.memory_space<smem>>
    %314 = vector.broadcast %312 : f32 to vector<4x256xf32>
    %315 = arith.mulf %314, %73 : vector<4x256xf32>
    %316 = arith.addf %311, %315 : vector<4x256xf32>
    %317 = vector.broadcast %313 : f32 to vector<4x256xf32>
    %318 = arith.mulf %317, %75 : vector<4x256xf32>
    %319 = arith.addf %316, %318 : vector<4x256xf32>
    %320 = arith.addf %262, %319 : vector<4x256xf32>
    %cst_26 = arith.constant 0.000000e+00 : f32
    %321 = vector.broadcast %cst_26 : f32 to vector<4x256xf32>
    %c28 = arith.constant 28 : index
    %322 = memref.load %arg4[%c28] : memref<98xf32, #tpu.memory_space<smem>>
    %c77 = arith.constant 77 : index
    %323 = memref.load %arg4[%c77] : memref<98xf32, #tpu.memory_space<smem>>
    %324 = vector.broadcast %322 : f32 to vector<4x256xf32>
    %325 = arith.mulf %324, %38 : vector<4x256xf32>
    %326 = arith.addf %321, %325 : vector<4x256xf32>
    %327 = vector.broadcast %323 : f32 to vector<4x256xf32>
    %328 = arith.mulf %327, %40 : vector<4x256xf32>
    %329 = arith.addf %326, %328 : vector<4x256xf32>
    %c29 = arith.constant 29 : index
    %330 = memref.load %arg4[%c29] : memref<98xf32, #tpu.memory_space<smem>>
    %c78 = arith.constant 78 : index
    %331 = memref.load %arg4[%c78] : memref<98xf32, #tpu.memory_space<smem>>
    %332 = vector.broadcast %330 : f32 to vector<4x256xf32>
    %333 = arith.mulf %332, %45 : vector<4x256xf32>
    %334 = arith.addf %329, %333 : vector<4x256xf32>
    %335 = vector.broadcast %331 : f32 to vector<4x256xf32>
    %336 = arith.mulf %335, %47 : vector<4x256xf32>
    %337 = arith.addf %334, %336 : vector<4x256xf32>
    %c30 = arith.constant 30 : index
    %338 = memref.load %arg4[%c30] : memref<98xf32, #tpu.memory_space<smem>>
    %c79 = arith.constant 79 : index
    %339 = memref.load %arg4[%c79] : memref<98xf32, #tpu.memory_space<smem>>
    %340 = vector.broadcast %338 : f32 to vector<4x256xf32>
    %341 = arith.mulf %340, %52 : vector<4x256xf32>
    %342 = arith.addf %337, %341 : vector<4x256xf32>
    %343 = vector.broadcast %339 : f32 to vector<4x256xf32>
    %344 = arith.mulf %343, %54 : vector<4x256xf32>
    %345 = arith.addf %342, %344 : vector<4x256xf32>
    %c31 = arith.constant 31 : index
    %346 = memref.load %arg4[%c31] : memref<98xf32, #tpu.memory_space<smem>>
    %c80 = arith.constant 80 : index
    %347 = memref.load %arg4[%c80] : memref<98xf32, #tpu.memory_space<smem>>
    %348 = vector.broadcast %346 : f32 to vector<4x256xf32>
    %349 = arith.mulf %348, %29 : vector<4x256xf32>
    %350 = arith.addf %345, %349 : vector<4x256xf32>
    %351 = vector.broadcast %347 : f32 to vector<4x256xf32>
    %352 = arith.mulf %351, %32 : vector<4x256xf32>
    %353 = arith.addf %350, %352 : vector<4x256xf32>
    %c32 = arith.constant 32 : index
    %354 = memref.load %arg4[%c32] : memref<98xf32, #tpu.memory_space<smem>>
    %c81 = arith.constant 81 : index
    %355 = memref.load %arg4[%c81] : memref<98xf32, #tpu.memory_space<smem>>
    %356 = vector.broadcast %354 : f32 to vector<4x256xf32>
    %357 = arith.mulf %356, %59 : vector<4x256xf32>
    %358 = arith.addf %353, %357 : vector<4x256xf32>
    %359 = vector.broadcast %355 : f32 to vector<4x256xf32>
    %360 = arith.mulf %359, %61 : vector<4x256xf32>
    %361 = arith.addf %358, %360 : vector<4x256xf32>
    %c33 = arith.constant 33 : index
    %362 = memref.load %arg4[%c33] : memref<98xf32, #tpu.memory_space<smem>>
    %c82 = arith.constant 82 : index
    %363 = memref.load %arg4[%c82] : memref<98xf32, #tpu.memory_space<smem>>
    %364 = vector.broadcast %362 : f32 to vector<4x256xf32>
    %365 = arith.mulf %364, %66 : vector<4x256xf32>
    %366 = arith.addf %361, %365 : vector<4x256xf32>
    %367 = vector.broadcast %363 : f32 to vector<4x256xf32>
    %368 = arith.mulf %367, %68 : vector<4x256xf32>
    %369 = arith.addf %366, %368 : vector<4x256xf32>
    %c34 = arith.constant 34 : index
    %370 = memref.load %arg4[%c34] : memref<98xf32, #tpu.memory_space<smem>>
    %c83 = arith.constant 83 : index
    %371 = memref.load %arg4[%c83] : memref<98xf32, #tpu.memory_space<smem>>
    %372 = vector.broadcast %370 : f32 to vector<4x256xf32>
    %373 = arith.mulf %372, %73 : vector<4x256xf32>
    %374 = arith.addf %369, %373 : vector<4x256xf32>
    %375 = vector.broadcast %371 : f32 to vector<4x256xf32>
    %376 = arith.mulf %375, %75 : vector<4x256xf32>
    %377 = arith.addf %374, %376 : vector<4x256xf32>
    %c240_i32 = arith.constant 240 : i32
    %378 = tpu.dynamic_rotate %377 by %c240_i32 dim 1 : vector<4x256xf32>, i32 -> vector<4x256xf32>
    %379 = vector.extract_strided_slice %33 {offsets = [4, 0], sizes = [1, 256], strides = [1, 1]} : vector<14x256xf32> to vector<1x256xf32>
    %380 = vector.broadcast %379 : vector<1x256xf32> to vector<4x256xf32>
    %381 = arith.mulf %378, %380 : vector<4x256xf32>
    %382 = arith.addf %320, %381 : vector<4x256xf32>
    %cst_27 = arith.constant 0.000000e+00 : f32
    %383 = vector.broadcast %cst_27 : f32 to vector<4x256xf32>
    %c35 = arith.constant 35 : index
    %384 = memref.load %arg4[%c35] : memref<98xf32, #tpu.memory_space<smem>>
    %c84 = arith.constant 84 : index
    %385 = memref.load %arg4[%c84] : memref<98xf32, #tpu.memory_space<smem>>
    %386 = vector.broadcast %384 : f32 to vector<4x256xf32>
    %387 = arith.mulf %386, %38 : vector<4x256xf32>
    %388 = arith.addf %383, %387 : vector<4x256xf32>
    %389 = vector.broadcast %385 : f32 to vector<4x256xf32>
    %390 = arith.mulf %389, %40 : vector<4x256xf32>
    %391 = arith.addf %388, %390 : vector<4x256xf32>
    %c36 = arith.constant 36 : index
    %392 = memref.load %arg4[%c36] : memref<98xf32, #tpu.memory_space<smem>>
    %c85 = arith.constant 85 : index
    %393 = memref.load %arg4[%c85] : memref<98xf32, #tpu.memory_space<smem>>
    %394 = vector.broadcast %392 : f32 to vector<4x256xf32>
    %395 = arith.mulf %394, %45 : vector<4x256xf32>
    %396 = arith.addf %391, %395 : vector<4x256xf32>
    %397 = vector.broadcast %393 : f32 to vector<4x256xf32>
    %398 = arith.mulf %397, %47 : vector<4x256xf32>
    %399 = arith.addf %396, %398 : vector<4x256xf32>
    %c37 = arith.constant 37 : index
    %400 = memref.load %arg4[%c37] : memref<98xf32, #tpu.memory_space<smem>>
    %c86 = arith.constant 86 : index
    %401 = memref.load %arg4[%c86] : memref<98xf32, #tpu.memory_space<smem>>
    %402 = vector.broadcast %400 : f32 to vector<4x256xf32>
    %403 = arith.mulf %402, %52 : vector<4x256xf32>
    %404 = arith.addf %399, %403 : vector<4x256xf32>
    %405 = vector.broadcast %401 : f32 to vector<4x256xf32>
    %406 = arith.mulf %405, %54 : vector<4x256xf32>
    %407 = arith.addf %404, %406 : vector<4x256xf32>
    %c38 = arith.constant 38 : index
    %408 = memref.load %arg4[%c38] : memref<98xf32, #tpu.memory_space<smem>>
    %c87 = arith.constant 87 : index
    %409 = memref.load %arg4[%c87] : memref<98xf32, #tpu.memory_space<smem>>
    %410 = vector.broadcast %408 : f32 to vector<4x256xf32>
    %411 = arith.mulf %410, %29 : vector<4x256xf32>
    %412 = arith.addf %407, %411 : vector<4x256xf32>
    %413 = vector.broadcast %409 : f32 to vector<4x256xf32>
    %414 = arith.mulf %413, %32 : vector<4x256xf32>
    %415 = arith.addf %412, %414 : vector<4x256xf32>
    %c39 = arith.constant 39 : index
    %416 = memref.load %arg4[%c39] : memref<98xf32, #tpu.memory_space<smem>>
    %c88 = arith.constant 88 : index
    %417 = memref.load %arg4[%c88] : memref<98xf32, #tpu.memory_space<smem>>
    %418 = vector.broadcast %416 : f32 to vector<4x256xf32>
    %419 = arith.mulf %418, %59 : vector<4x256xf32>
    %420 = arith.addf %415, %419 : vector<4x256xf32>
    %421 = vector.broadcast %417 : f32 to vector<4x256xf32>
    %422 = arith.mulf %421, %61 : vector<4x256xf32>
    %423 = arith.addf %420, %422 : vector<4x256xf32>
    %c40 = arith.constant 40 : index
    %424 = memref.load %arg4[%c40] : memref<98xf32, #tpu.memory_space<smem>>
    %c89 = arith.constant 89 : index
    %425 = memref.load %arg4[%c89] : memref<98xf32, #tpu.memory_space<smem>>
    %426 = vector.broadcast %424 : f32 to vector<4x256xf32>
    %427 = arith.mulf %426, %66 : vector<4x256xf32>
    %428 = arith.addf %423, %427 : vector<4x256xf32>
    %429 = vector.broadcast %425 : f32 to vector<4x256xf32>
    %430 = arith.mulf %429, %68 : vector<4x256xf32>
    %431 = arith.addf %428, %430 : vector<4x256xf32>
    %c41 = arith.constant 41 : index
    %432 = memref.load %arg4[%c41] : memref<98xf32, #tpu.memory_space<smem>>
    %c90 = arith.constant 90 : index
    %433 = memref.load %arg4[%c90] : memref<98xf32, #tpu.memory_space<smem>>
    %434 = vector.broadcast %432 : f32 to vector<4x256xf32>
    %435 = arith.mulf %434, %73 : vector<4x256xf32>
    %436 = arith.addf %431, %435 : vector<4x256xf32>
    %437 = vector.broadcast %433 : f32 to vector<4x256xf32>
    %438 = arith.mulf %437, %75 : vector<4x256xf32>
    %439 = arith.addf %436, %438 : vector<4x256xf32>
    %c224_i32 = arith.constant 224 : i32
    %440 = tpu.dynamic_rotate %439 by %c224_i32 dim 1 : vector<4x256xf32>, i32 -> vector<4x256xf32>
    %441 = vector.extract_strided_slice %33 {offsets = [5, 0], sizes = [1, 256], strides = [1, 1]} : vector<14x256xf32> to vector<1x256xf32>
    %442 = vector.broadcast %441 : vector<1x256xf32> to vector<4x256xf32>
    %443 = arith.mulf %440, %442 : vector<4x256xf32>
    %444 = arith.addf %382, %443 : vector<4x256xf32>
    %cst_28 = arith.constant 0.000000e+00 : f32
    %445 = vector.broadcast %cst_28 : f32 to vector<4x256xf32>
    %c42 = arith.constant 42 : index
    %446 = memref.load %arg4[%c42] : memref<98xf32, #tpu.memory_space<smem>>
    %c91 = arith.constant 91 : index
    %447 = memref.load %arg4[%c91] : memref<98xf32, #tpu.memory_space<smem>>
    %448 = vector.broadcast %446 : f32 to vector<4x256xf32>
    %449 = arith.mulf %448, %38 : vector<4x256xf32>
    %450 = arith.addf %445, %449 : vector<4x256xf32>
    %451 = vector.broadcast %447 : f32 to vector<4x256xf32>
    %452 = arith.mulf %451, %40 : vector<4x256xf32>
    %453 = arith.addf %450, %452 : vector<4x256xf32>
    %c43 = arith.constant 43 : index
    %454 = memref.load %arg4[%c43] : memref<98xf32, #tpu.memory_space<smem>>
    %c92 = arith.constant 92 : index
    %455 = memref.load %arg4[%c92] : memref<98xf32, #tpu.memory_space<smem>>
    %456 = vector.broadcast %454 : f32 to vector<4x256xf32>
    %457 = arith.mulf %456, %45 : vector<4x256xf32>
    %458 = arith.addf %453, %457 : vector<4x256xf32>
    %459 = vector.broadcast %455 : f32 to vector<4x256xf32>
    %460 = arith.mulf %459, %47 : vector<4x256xf32>
    %461 = arith.addf %458, %460 : vector<4x256xf32>
    %c44 = arith.constant 44 : index
    %462 = memref.load %arg4[%c44] : memref<98xf32, #tpu.memory_space<smem>>
    %c93 = arith.constant 93 : index
    %463 = memref.load %arg4[%c93] : memref<98xf32, #tpu.memory_space<smem>>
    %464 = vector.broadcast %462 : f32 to vector<4x256xf32>
    %465 = arith.mulf %464, %52 : vector<4x256xf32>
    %466 = arith.addf %461, %465 : vector<4x256xf32>
    %467 = vector.broadcast %463 : f32 to vector<4x256xf32>
    %468 = arith.mulf %467, %54 : vector<4x256xf32>
    %469 = arith.addf %466, %468 : vector<4x256xf32>
    %c45 = arith.constant 45 : index
    %470 = memref.load %arg4[%c45] : memref<98xf32, #tpu.memory_space<smem>>
    %c94 = arith.constant 94 : index
    %471 = memref.load %arg4[%c94] : memref<98xf32, #tpu.memory_space<smem>>
    %472 = vector.broadcast %470 : f32 to vector<4x256xf32>
    %473 = arith.mulf %472, %29 : vector<4x256xf32>
    %474 = arith.addf %469, %473 : vector<4x256xf32>
    %475 = vector.broadcast %471 : f32 to vector<4x256xf32>
    %476 = arith.mulf %475, %32 : vector<4x256xf32>
    %477 = arith.addf %474, %476 : vector<4x256xf32>
    %c46 = arith.constant 46 : index
    %478 = memref.load %arg4[%c46] : memref<98xf32, #tpu.memory_space<smem>>
    %c95 = arith.constant 95 : index
    %479 = memref.load %arg4[%c95] : memref<98xf32, #tpu.memory_space<smem>>
    %480 = vector.broadcast %478 : f32 to vector<4x256xf32>
    %481 = arith.mulf %480, %59 : vector<4x256xf32>
    %482 = arith.addf %477, %481 : vector<4x256xf32>
    %483 = vector.broadcast %479 : f32 to vector<4x256xf32>
    %484 = arith.mulf %483, %61 : vector<4x256xf32>
    %485 = arith.addf %482, %484 : vector<4x256xf32>
    %c47 = arith.constant 47 : index
    %486 = memref.load %arg4[%c47] : memref<98xf32, #tpu.memory_space<smem>>
    %c96 = arith.constant 96 : index
    %487 = memref.load %arg4[%c96] : memref<98xf32, #tpu.memory_space<smem>>
    %488 = vector.broadcast %486 : f32 to vector<4x256xf32>
    %489 = arith.mulf %488, %66 : vector<4x256xf32>
    %490 = arith.addf %485, %489 : vector<4x256xf32>
    %491 = vector.broadcast %487 : f32 to vector<4x256xf32>
    %492 = arith.mulf %491, %68 : vector<4x256xf32>
    %493 = arith.addf %490, %492 : vector<4x256xf32>
    %c48 = arith.constant 48 : index
    %494 = memref.load %arg4[%c48] : memref<98xf32, #tpu.memory_space<smem>>
    %c97 = arith.constant 97 : index
    %495 = memref.load %arg4[%c97] : memref<98xf32, #tpu.memory_space<smem>>
    %496 = vector.broadcast %494 : f32 to vector<4x256xf32>
    %497 = arith.mulf %496, %73 : vector<4x256xf32>
    %498 = arith.addf %493, %497 : vector<4x256xf32>
    %499 = vector.broadcast %495 : f32 to vector<4x256xf32>
    %500 = arith.mulf %499, %75 : vector<4x256xf32>
    %501 = arith.addf %498, %500 : vector<4x256xf32>
    %c208_i32 = arith.constant 208 : i32
    %502 = tpu.dynamic_rotate %501 by %c208_i32 dim 1 : vector<4x256xf32>, i32 -> vector<4x256xf32>
    %503 = vector.extract_strided_slice %33 {offsets = [6, 0], sizes = [1, 256], strides = [1, 1]} : vector<14x256xf32> to vector<1x256xf32>
    %504 = vector.broadcast %503 : vector<1x256xf32> to vector<4x256xf32>
    %505 = arith.mulf %502, %504 : vector<4x256xf32>
    %506 = arith.addf %444, %505 : vector<4x256xf32>
    %507 = arith.negf %506 : vector<4x256xf32>
    %508 = math.exp %507 : vector<4x256xf32>
    %cst_29 = arith.constant 1.000000e+00 : f32
    %509 = vector.broadcast %cst_29 : f32 to vector<4x256xf32>
    %510 = arith.addf %509, %508 : vector<4x256xf32>
    %511 = arith.divf %509, %510 : vector<4x256xf32>
    %512 = vector.shape_cast %511 : vector<4x256xf32> to vector<4x1x256xf32>
    %513 = vector.broadcast %512 : vector<4x1x256xf32> to vector<4x32x256xf32>
    %514 = arith.mulf %28, %513 : vector<4x32x256xf32>
    %c0_30 = arith.constant 0 : index
    %c0_31 = arith.constant 0 : index
    %c0_32 = arith.constant 0 : index
    %515 = vector.load %arg5[%c0_30, %c0_31, %c0_32] : memref<4x32x256xf32, #tpu.memory_space<vmem>>, vector<4x32x256xf32>
    tpu.vector_store %arg5[%c0_30, %c0_31, %c0_32], %514 {strides = array<i32>} : memref<4x32x256xf32, #tpu.memory_space<vmem>>, vector<4x32x256xf32>,
    return
  }
  func.func @transform_0(%arg0: i32) -> (i32, i32, i32) {
    %c0_i32 = arith.constant 0 : i32
    %c0_i32_0 = arith.constant 0 : i32
    %c0_i32_1 = arith.constant 0 : i32
    return %arg0, %c0_i32, %c0_i32_0 : i32, i32, i32
  }
  func.func @transform_1(%arg0: i32) -> (i32, i32) {
    %c0_i32 = arith.constant 0 : i32
    %c0_i32_0 = arith.constant 0 : i32
    %c0_i32_1 = arith.constant 0 : i32
    return %c0_i32, %c0_i32_0 : i32, i32
  }
  func.func @transform_2(%arg0: i32) -> (i32, i32) {
    %c0_i32 = arith.constant 0 : i32
    %c0_i32_0 = arith.constant 0 : i32
    %c0_i32_1 = arith.constant 0 : i32
    return %c0_i32, %c0_i32_0 : i32, i32
  }
  func.func @transform_3(%arg0: i32) -> i32 {
    %c0_i32 = arith.constant 0 : i32
    %c0_i32_0 = arith.constant 0 : i32
    return %c0_i32 : i32
  }
  func.func @transform_4(%arg0: i32) -> (i32, i32, i32) {
    %c0_i32 = arith.constant 0 : i32
    %c0_i32_0 = arith.constant 0 : i32
    %c0_i32_1 = arith.constant 0 : i32
    return %arg0, %c0_i32, %c0_i32_0 : i32, i32, i32
  }
}

</mosaic_0001>

<bundles_post_ra>
// kernel: tpu_custom_call.1
= control target key start
LH: loop header
LB: loop body
LE: loop exit
PB: predicated region body
PF: predicated region fallthrough
CT: control target
= control target key end

     0   :  { %s4170_s0 = inlined_call_operand.hbm [shape: f32[4,32,256], index: 0, kind: input, shape index: {}]   ;;  %s4171_s1 = inlined_call_operand.vmem [shape: f32[64,2], index: 1, kind: input, shape index: {}]   ;;  %s4172_s2 = inlined_call_operand.vmem [shape: f32[14,256], index: 2, kind: input, shape index: {}]   ;;  %s4173_s3 = inlined_call_operand.vmem [shape: f32[98], index: 3, kind: input, shape index: {}]   ;;  %s4174_s4 = inlined_call_operand.hbm [shape: f32[4,32,256], index: 4, kind: output, shape index: {}]  }
   0x1   :  { %4321 = sst [smem:[#allocation175_spill]] %s4172_s2 }
   0x2   :  { %4322 = sst [smem:[#allocation176_spill]] %s4174_s4 }
   0x3   :  { %9 = vsyncpa [#allocation3], 0 }
   0x4   :  { %10 = vsyncpa [#allocation5], 0 }
   0x5   :  { %11 = vsyncpa [#allocation4], 0  ;;  %s2194_s15 = smov [#allocation2]   ;;  %s34_s19 = sshll.u32 %s4173_s3, 4  ;;  %s35_s19 = int_to_ptr.vmem [resolvable:$true] %s34_s19 }
   0x6   :  { %s17_s16 = sshll.u32 %s2194_s15, 4  ;;  %s18_s16 = int_to_ptr.vmem [resolvable:$true] %s17_s16 }
   0x7   :  { %s2144_s20 = scalar_lea.vmem %s18_s16, 4096  ;;  %p2149_p1 = scmp.lt.s32.totalorder %s18_s16, %s18_s16 }
   0x8   :  { %p2145_p0 = scmp.ne.s32.totalorder %s18_s16, %s2144_s20  ;;  %p2150_p2 = scmp.lt.s32.totalorder %s2144_s20, %s2144_s20 }
   0xa   :  { %p2151_p3 = por %p2150_p2, %p2149_p1 }
   0xc   :  { %p2152_p4 = pnand %p2151_p3, %p2145_p0 }
   0xe   :  { %2155 = shalt.err (!%p2152_p4)
}
   0xf   :  { %s4196_s21 = smov 256   ;;  %s4197_s22 = smov 16  }
  0x10   :  { %23 = dma.hbm_to_vmem [thread:$0]  %s4170_s0, 4096, %s18_s16, [#allocation3], %s4196_s21, %s4196_s21, %s4197_s22  }
  0x11   :  { %s2156_s25 = scalar_lea.vmem %s35_s19, 16  ;;  %p2161_p6 = scmp.lt.s32.totalorder %s35_s19, %s35_s19 }
  0x12   :  { %p2157_p5 = scmp.ne.s32.totalorder %s35_s19, %s2156_s25  ;;  %p2162_p7 = scmp.lt.s32.totalorder %s2156_s25, %s2156_s25 }
  0x14   :  { %p2163_p8 = por %p2162_p7, %p2161_p6 }
  0x16   :  { %p2164_p9 = pnand %p2163_p8, %p2157_p5 }
  0x18   :  { %2167 = shalt.err (!%p2164_p9)
}
  0x19   :  { %s2197_s3 = smov [#allocation6]  }
  0x1a   :  { %37 = dma.vmem_to_smem %s35_s19, 16, %s2197_s3, [#allocation5]  }
  0x1b   :  { %2188 = dma.done.wait [#allocation3], 4096  }
  0x1c   :  { %2189 = vsyncadd [#allocation3], 4294963200 }
  0x1d   :  { %2190 = dma.done.wait [#allocation5], 16  }
  0x1e   :  { %2191 = vsyncadd [#allocation5], 4294967280 }
  0x1f   :  { %44 = sfence }
  0x20   :  { %v2245_v0 = vld [vmem:[#allocation2 + $0x40] sm:$0xff]  ;;  %v2247_v1 = vld [vmem:[#allocation2 + $0x48] sm:$0xff]  ;;  %v2255_v5 = vld [vmem:[#allocation2 + $0x50] sm:$0xff]  ;;  %vm165_vm0 = vcmask 15360   ;;  %vm578_vm1 = vcmask 1041409   ;;  %vm580_vm2 = vcmask 1042434  }
  0x21   :  { %v2249_v2 = vld [vmem:[#allocation2] sm:$0xff]  ;;  %v89_v3 = vadd.f32 %v2247_v1, %v2245_v0  ;;  %v2253_v4 = vld [vmem:[#allocation2 + $0x8] sm:$0xff]  ;;  %v2257_v6 = vld [vmem:[#allocation2 + $0x58] sm:$0xff]  ;;  %vm582_vm3 = vcmask 1043459   ;;  %s2580_s15 = sld [smem:[#allocation6 + $0x34]]  ;;  %s2198_s16 = smov 3  }
  0x22   :  { %v77_v7 = vadd.f32 %v2253_v4, %v2249_v2  ;;  %v2261_v8 = vld [vmem:[#allocation2 + $0x10] sm:$0xff]  ;;  %v2263_v9 = vld [vmem:[#allocation2 + $0x18] sm:$0xff]  ;;  %v92_v10 = vadd.f32 %v2257_v6, %v2255_v5  ;;  %v2273_v14 = vld [vmem:[#allocation2 + $0x80] sm:$0xff]  ;;  %s2613_s17 = sld [smem:[#allocation6 + $0xa]]  ;;  %s2199_s18 = smov 2  }
  0x23   :  { %90 = vadd.xlane.f32.xlu1 %v89_v3  ;;  %v80_v11 = vadd.f32 %v2263_v9, %v2261_v8  ;;  %v2269_v12 = vld [vmem:[#allocation2 + $0x90] sm:$0xff]  ;;  %v2271_v13 = vld [vmem:[#allocation2 + $0x98] sm:$0xff]  ;;  %v2275_v15 = vld [vmem:[#allocation2 + $0x88] sm:$0xff]  ;;  %s2632_s19 = sld [smem:[#allocation6 + $0x3b]]  ;;  %s2200_s20 = smov 1  }
  0x24   :  { %78 = vadd.xlane.f32.xlu0 %v77_v7  ;;  %v104_v16 = vadd.f32 %v2271_v13, %v2269_v12  ;;  %v101_v17 = vadd.f32 %v2275_v15, %v2273_v14  ;;  %v2281_v18 = vld [vmem:[#allocation2 + $0x60] sm:$0xff]  ;;  %v2283_v19 = vld [vmem:[#allocation2 + $0x68] sm:$0xff]  ;;  %v2293_v24 = vld [vmem:[#allocation2 + $0xd0] sm:$0xff]  ;;  %s2201_s23 = smov 127   ;;  %s2684_s24 = sld [smem:[#allocation6 + $0x11]] }
  0x25   :  { %v2285_v20 = vld [vmem:[#allocation2 + $0x20] sm:$0xff]  ;;  %v2287_v21 = vld [vmem:[#allocation2 + $0x28] sm:$0xff]  ;;  %v95_v22 = vadd.f32 %v2283_v19, %v2281_v18  ;;  %v2295_v25 = vld [vmem:[#allocation2 + $0xd8] sm:$0xff]  ;;  %s2698_s25 = sld [smem:[#allocation6 + $0x42]]  ;;  %s2202_s3 = smov 126  }
  0x26   :  { %v83_v23 = vadd.f32 %v2287_v21, %v2285_v20  ;;  %v2297_v26 = vld [vmem:[#allocation2 + $0xc0] sm:$0xff]  ;;  %v2299_v27 = vld [vmem:[#allocation2 + $0xc8] sm:$0xff]  ;;  %v116_v28 = vadd.f32 %v2295_v25, %v2293_v24  ;;  %v2305_v30 = vld [vmem:[#allocation2 + $0x30] sm:$0xff]  ;;  %s2007_s0 = sld [smem:[#allocation6 + $0x1f]]  ;;  %s2203_s27 = smov 125  }
  0x27   :  { %93 = vadd.xlane.f32.xlu1 %v92_v10  ;;  %v113_v29 = vadd.f32 %v2299_v27, %v2297_v26  ;;  %v2307_v31 = vld [vmem:[#allocation2 + $0x38] sm:$0xff]  ;;  %v2309_v32 = vld [vmem:[#allocation2 + $0xa0] sm:$0xff]  ;;  %v2311_v33 = vld [vmem:[#allocation2 + $0xa8] sm:$0xff]  ;;  %s2008_s26 = sld [smem:[#allocation6 + $0x50]] }
  0x28   :  { %81 = vadd.xlane.f32.xlu0 %v80_v11  ;;  %v86_v34 = vadd.f32 %v2307_v31, %v2305_v30  ;;  %v107_v35 = vadd.f32 %v2311_v33, %v2309_v32  ;;  %v2317_v36 = vld [vmem:[#allocation2 + $0xe0] sm:$0xff]  ;;  %v2319_v37 = vld [vmem:[#allocation2 + $0xe8] sm:$0xff]  ;;  %v2321_v38 = vld [vmem:[#allocation2 + $0x70] sm:$0xff]  ;;  %s2780_s28 = sld [smem:[#allocation6 + $0x26]] }
  0x29   :  { %v2323_v39 = vld [vmem:[#allocation2 + $0x78] sm:$0xff]  ;;  %v119_v40 = vadd.f32 %v2319_v37, %v2317_v36  ;;  %v2329_v42 = vld [vmem:[#allocation2 + $0xf0] sm:$0xff]  ;;  %v142_v56 = vld [vmem:[%s4171_s1 + $0x8] sm:$0xff]  ;;  %s2798_s29 = sld [smem:[#allocation6 + $0x57]] }
  0x2a   :  { %v98_v41 = vadd.f32 %v2323_v39, %v2321_v38  ;;  %v2331_v43 = vld [vmem:[#allocation2 + $0xf8] sm:$0xff]  ;;  %v2333_v44 = vld [vmem:[#allocation2 + $0xb0] sm:$0xff]  ;;  %v141_v58 = vld [vmem:[%s4171_s1] sm:$0xff]  ;;  %s2829_s30 = sld [smem:[#allocation6 + $0x2d]] }
  0x2b   :  { %105 = vadd.xlane.f32.xlu1 %v104_v16  ;;  %v2335_v45 = vld [vmem:[#allocation2 + $0xb8] sm:$0xff]  ;;  %v122_v46 = vadd.f32 %v2331_v43, %v2329_v42  ;;  %v143_v60 = vld [vmem:[%s4171_s1 + $0x10] sm:$0xff]  ;;  %s2837_s5 = sld [smem:[#allocation6 + $0x5e]] }
  0x2c   :  { %102 = vadd.xlane.f32.xlu0 %v101_v17  ;;  %v110_v47 = vadd.f32 %v2335_v45, %v2333_v44  ;;  %s2842_s6 = sld [smem:[#allocation6 + $0x18]] }
  0x2d   :  { %s2850_s7 = sld [smem:[#allocation6 + $0x49]] }
  0x2e   :  { %s2856_s8 = sld [smem:[#allocation6]] }
  0x2f   :  { %96 = vadd.xlane.f32.xlu1 %v95_v22  ;;  %s2861_s9 = sld [smem:[#allocation6 + $0x7]] }
  0x30   :  { %84 = vadd.xlane.f32.xlu0 %v83_v23  ;;  %s2867_s10 = sld [smem:[#allocation6 + $0xe]] }
  0x31   :  { %s2873_s11 = sld [smem:[#allocation6 + $0x15]] }
  0x32   :  { %s2879_s12 = sld [smem:[#allocation6 + $0x1c]] }
  0x33   :  { %117 = vadd.xlane.f32.xlu1 %v116_v28  ;;  %s2887_s13 = sld [smem:[#allocation6 + $0x23]] }
  0x34   :  { %114 = vadd.xlane.f32.xlu0 %v113_v29  ;;  %4365 = sst [smem:[#allocation52_spill]] %s2856_s8 }
  0x35   :  { %4366 = sst [smem:[#allocation53_spill]] %s2861_s9 }
  0x36   :  { %4368 = sst [smem:[#allocation55_spill]] %s2867_s10 }
  0x37   :  { %87 = vadd.xlane.f32.xlu1 %v86_v34  ;;  %4369 = sst [smem:[#allocation56_spill]] %s2873_s11 }
  0x38   :  { %108 = vadd.xlane.f32.xlu0 %v107_v35  ;;  %4370 = sst [smem:[#allocation57_spill]] %s2879_s12 }
  0x39   :  { %4372 = sst [smem:[#allocation59_spill]] %s2887_s13 }
  0x3a   :  { %s2892_s14 = sld [smem:[#allocation6 + $0x2a]] }
  0x3b   :  { %120 = vadd.xlane.f32.xlu1 %v119_v40  ;;  %s3022_s21 = sld [smem:[#allocation6 + $0xb]] }
  0x3c   :  { %99 = vadd.xlane.f32.xlu0 %v98_v41  ;;  %s3028_s22 = sld [smem:[#allocation6 + $0x33]] }
  0x3d   :  { %s3033_s4 = sld [smem:[#allocation6 + $0xf]] }
  0x3e   :  { %s3127_s10 = sld [smem:[#allocation6 + $0x55]] }
  0x3f   :  { %123 = vadd.xlane.f32.xlu1 %v122_v46  ;;  %v144_v46 = vld [vmem:[%s4171_s1 + $0x18] sm:$0xff]  ;;  %s3189_s8 = sld [smem:[#allocation6 + $0x53]] }
  0x40   :  { %111 = vadd.xlane.f32.xlu0 %v110_v47  ;;  %4373 = sst [smem:[#allocation60_spill]] %s2892_s14 }
  0x41   :  { %4403 = sst [smem:[#allocation90_spill]] %s3022_s21 }
  0x42   :  { %4405 = sst [smem:[#allocation92_spill]] %s3028_s22 }
  0x43   :  { %4407 = sst [smem:[#allocation94_spill]] %s3033_s4 }
  0x44   :  { %s3043_s21 = sld [smem:[#allocation6 + $0x1e]] }
  0x45   :  { %s3049_s22 = sld [smem:[#allocation6 + $0x13]] }
  0x46   :  { %s3055_s4 = sld [smem:[#allocation6 + $0x36]] }
  0x47   :  { %s3183_s14 = sld [smem:[#allocation6 + $0x29]] }
  0x48   :  { %4458 = sst [smem:[#allocation133_spill]] %s3189_s8 }
  0x49   :  { %s4499_s8 = sld [smem:[#allocation59_spill]] }
  0x4a   :  { %4412 = sst [smem:[#allocation99_spill]] %s3043_s21 }
  0x4b   :  { %4415 = sst [smem:[#allocation102_spill]] %s3049_s22 }
  0x4c   :  { %4417 = sst [smem:[#allocation104_spill]] %s3055_s4 }
  0x4d   :  { %s3065_s21 = sld [smem:[#allocation6 + $0x41]] }
  0x4e   :  { %s3071_s22 = sld [smem:[#allocation6 + $0x3c]] }
  0x4f   :  { %s3075_s4 = sld [smem:[#allocation6 + $0x3e]] }
  0x50   :  { %4453 = sst [smem:[#allocation132_spill]] %s3183_s14 }
  0x51   :  { %s3218_s14 = sld [smem:[#allocation6 + $0x5a]] }
  0x53   :  { %4422 = sst [smem:[#allocation109_spill]] %s3065_s21 }
  0x54   :  { %4425 = sst [smem:[#allocation112_spill]] %s3071_s22 }
  0x55   :  { %4427 = sst [smem:[#allocation114_spill]] %s3075_s4 }
  0x56   :  { %s3083_s21 = sld [smem:[#allocation6 + $0x2c]] }
  0x57   :  { %s3089_s22 = sld [smem:[#allocation6 + $0x2e]] }
  0x58   :  { %s3092_s4 = sld [smem:[#allocation6 + $0x43]] }
  0x59   :  { %s4477_s11 = sld [smem:[#allocation112_spill]] }
  0x5c   :  { %4431 = sst [smem:[#allocation118_spill]] %s3083_s21 }
  0x5d   :  { %4434 = sst [smem:[#allocation121_spill]] %s3089_s22 }
  0x5e   :  { %s3105_s22 = sld [smem:[#allocation6 + $0x45]] }
  0x5f   :  { %s3115_s21 = sld [smem:[#allocation6 + $0x22]] }
  0x64   :  { %4436 = sst [smem:[#allocation123_spill]] %s3105_s22 }
  0x65   :  { %4437 = sst [smem:[#allocation124_spill]] %s3115_s21 }
  0x66   :  { %s3144_s22 = sld [smem:[#allocation6 + $0x2f]] }
  0x67   :  { %s4495_s21 = sld [smem:[#allocation53_spill]] }
  0x6c   :  { %4441 = sst [smem:[#allocation128_spill]] %s3144_s22 }
  0x6d   :  { %s3195_s22 = sld [smem:[#allocation6 + $0x5d]] }
  0xac   :  { %v91_v48 = vpop.xlane.xlu1 %90 }
  0xad   :  { %v79_v49 = vpop.xlane.xlu0 %78  ;;  %v129_v62 = vmul.f32 0.00390625, %v91_v48 }
  0xae   :  { %v125_v55 = vmul.f32 0.00390625, %v79_v49 }
  0xaf   :  { %v153_v28 = vmul.f32 %v141_v58, %v129_v62 }
  0xb0   :  { %v94_v50 = vpop.xlane.xlu1 %93  ;;  %v149_v3 = vmul.f32 %v141_v58, %v125_v55 }
  0xb1   :  { %v82_v51 = vpop.xlane.xlu0 %81  ;;  %v130_v7 = vmul.f32 0.00390625, %v94_v50 }
  0xb2   :  { %v126_v54 = vmul.f32 0.00390625, %v82_v51  ;;  %v166_v34 = vsel %vm165_vm0, %v149_v3, 0.0 }
  0xb3   :  { %v154_v35 = vmul.f32 %v142_v56, %v130_v7 }
  0xb4   :  { %v106_v52 = vpop.xlane.xlu1 %105  ;;  %v150_v63 = vmul.f32 %v142_v56, %v126_v54 }
  0xb5   :  { %v103_v53 = vpop.xlane.xlu0 %102  ;;  %v134_v40 = vmul.f32 0.00390625, %v106_v52  ;;  %v180_v52 = vsel %vm165_vm0, %v154_v35, 0.0 }
  0xb6   :  { %v167_v29 = vsel %vm165_vm0, %v150_v63, 0.0  ;;  %v133_v41 = vmul.f32 0.00390625, %v103_v53 }
  0xb7   :  { %v168_v55 = vadd.f32 %v167_v29, %v166_v34  ;;  %v158_v53 = vmul.f32 %v142_v56, %v134_v40 }
  0xb8   :  { %v97_v57 = vpop.xlane.xlu1 %96  ;;  %v157_v63 = vmul.f32 %v141_v58, %v133_v41 }
  0xb9   :  { %v85_v59 = vpop.xlane.xlu0 %84  ;;  %v131_v11 = vmul.f32 0.00390625, %v97_v57 }
  0xba   :  { %v127_v61 = vmul.f32 0.00390625, %v85_v59 }
  0xbb   :  { %v155_v48 = vmul.f32 %v143_v60, %v131_v11 }
  0xbc   :  { %v118_v10 = vpop.xlane.xlu1 %117  ;;  %v151_v16 = vmul.f32 %v143_v60, %v127_v61  ;;  %v179_v61 = vsel %vm165_vm0, %v153_v28, 0.0 }
  0xbd   :  { %v138_v17 = vmul.f32 0.00390625, %v118_v10  ;;  %v115_v22 = vpop.xlane.xlu0 %114  ;;  %v182_v10 = vsel %vm165_vm0, %v155_v48, 0.0 }
  0xbe   :  { %v137_v23 = vmul.f32 0.00390625, %v115_v22  ;;  %v169_v49 = vsel %vm165_vm0, %v151_v16, 0.0 }
  0xbf   :  { %v162_v50 = vmul.f32 %v142_v56, %v138_v17  ;;  %v170_v3 = vadd.f32 %v169_v49, %v168_v55  ;;  %v193_v56 = vsel %vm165_vm0, %v158_v53, 0.0 }
  0xc0   :  { %v88_v47 = vpop.xlane.xlu1 %87  ;;  %v161_v57 = vmul.f32 %v141_v58, %v137_v23  ;;  %v192_v58 = vsel %vm165_vm0, %v157_v63, 0.0 }
  0xc1   :  { %v128_v51 = vmul.f32 0.00390625, %v88_v47  ;;  %v109_v54 = vpop.xlane.xlu0 %108  ;;  %v206_v11 = vsel %vm165_vm0, %v162_v50, 0.0  ;;  %v181_v47 = vadd.f32 %v180_v52, %v179_v61 }
  0xc2   :  { %v135_v59 = vmul.f32 0.00390625, %v109_v54  ;;  %v205_v23 = vsel %vm165_vm0, %v161_v57, 0.0 }
  0xc3   :  { %v152_v62 = vmul.f32 %v144_v46, %v128_v51  ;;  %v183_v48 = vadd.f32 %v182_v10, %v181_v47  ;;  %v207_v49 = vadd.f32 %v206_v11, %v205_v23 }
  0xc4   :  { %v121_v7 = vpop.xlane.xlu1 %120  ;;  %v159_v34 = vmul.f32 %v143_v60, %v135_v59 }
  0xc5   :  { %v171_v16 = vsel %vm165_vm0, %v152_v62, 0.0  ;;  %v139_v17 = vmul.f32 0.00390625, %v121_v7  ;;  %v100_v22 = vpop.xlane.xlu0 %99 }
  0xc6   :  { %v172_v29 = vadd.f32 %v171_v16, %v170_v3  ;;  %v132_v28 = vmul.f32 0.00390625, %v100_v22  ;;  %v195_v57 = vsel %vm165_vm0, %v159_v34, 0.0 }
  0xc7   :  { %v163_v51 = vmul.f32 %v143_v60, %v139_v17  ;;  %v194_v60 = vadd.f32 %v193_v56, %v192_v58 }
  0xc8   :  { %v173_v35 = vrot.slane %v172_v29, 4  ;;  %v156_v40 = vmul.f32 %v144_v46, %v132_v28  ;;  %v124_v41 = vpop.xlane.xlu1 %123 }
  0xc9   :  { %v208_v50 = vsel %vm165_vm0, %v163_v51, 0.0  ;;  %v140_v54 = vmul.f32 0.00390625, %v124_v41  ;;  %v112_v55 = vpop.xlane.xlu0 %111  ;;  %v196_v16 = vadd.f32 %v195_v57, %v194_v60 }
  0xca   :  { %v174_v62 = vadd.f32 %v173_v35, %v172_v29  ;;  %v184_v59 = vsel %vm165_vm0, %v156_v40, 0.0  ;;  %v136_v61 = vmul.f32 0.00390625, %v112_v55  ;;  %v209_v63 = vadd.f32 %v208_v50, %v207_v49 }
  0xcb   :  { %v185_v52 = vadd.f32 %v184_v59, %v183_v48  ;;  %v164_v53 = vmul.f32 %v144_v46, %v140_v54  ;;  %v145_v48 = vld [vmem:[%s4171_s1 + $0x20] sm:$0xff] }
  0xcc   :  { %v175_v3 = vrot.slane %v174_v62, 2  ;;  %v160_v7 = vmul.f32 %v144_v46, %v136_v61  ;;  %v146_v46 = vld [vmem:[%s4171_s1 + $0x28] sm:$0xff] }
  0xcd   :  { %v186_v17 = vrot.slane %v185_v52, 4  ;;  %v210_v10 = vsel %vm165_vm0, %v164_v53, 0.0 }
  0xce   :  { %v176_v11 = vadd.f32 %v175_v3, %v174_v62  ;;  %v211_v22 = vadd.f32 %v210_v10, %v209_v63  ;;  %v197_v23 = vsel %vm165_vm0, %v160_v7, 0.0 }
  0xcf   :  { %v187_v29 = vadd.f32 %v186_v17, %v185_v52  ;;  %v198_v28 = vadd.f32 %v197_v23, %v196_v16 }
  0xd0   :  { %v177_v34 = vrot.slane %v176_v11, 1  ;;  %v212_v47 = vrot.slane %v211_v22, 4 }
  0xd1   :  { %v188_v51 = vrot.slane %v187_v29, 2  ;;  %v199_v35 = vrot.slane %v198_v28, 4 }
  0xd2   :  { %v213_v56 = vadd.f32 %v212_v47, %v211_v22  ;;  %v178_v58 = vadd.f32 %v177_v34, %v176_v11 }
  0xd3   :  { %v189_v40 = vadd.f32 %v188_v51, %v187_v29  ;;  %v200_v41 = vadd.f32 %v199_v35, %v198_v28  ;;  %v147_v29 = vld [vmem:[%s4171_s1 + $0x30] sm:$0xff] }
  0xd4   :  { %v214_v49 = vrot.slane %v213_v56, 2  ;;  %v218_v50 = vmax.f32 %v178_v58, 0.0 }
  0xd5   :  { %v190_v54 = vrot.slane %v189_v40, 1  ;;  %v201_v55 = vrot.slane %v200_v41, 2 }
  0xd6   :  { %v215_v62 = vadd.f32 %v214_v49, %v213_v56  ;;  %v223_v57 = vmul.f32 %v218_v50, %v146_v46  ;;  %v222_v59 = vmul.f32 %v218_v50, %v145_v48  ;;  %v224_v51 = vmul.f32 %v218_v50, %v147_v29 }
  0xd7   :  { %v202_v61 = vadd.f32 %v201_v55, %v200_v41  ;;  %v191_v60 = vadd.f32 %v190_v54, %v189_v40 }
  0xd8   :  { %v241_v52 = vsel %vm165_vm0, %v223_v57, 0.0  ;;  %v238_v53 = vsel %vm165_vm0, %v222_v59, 0.0  ;;  %v216_v3 = vrot.slane %v215_v62, 1  ;;  %v244_v49 = vsel %vm165_vm0, %v224_v51, 0.0 }
  0xd9   :  { %v203_v63 = vrot.slane %v202_v61, 1  ;;  %242 = vadd.xlane.f32.xlu1 %v241_v52  ;;  %239 = vadd.xlane.f32.xlu0 %v238_v53  ;;  %v219_v7 = vmax.f32 %v191_v60, 0.0 }
  0xda   :  { %v217_v28 = vadd.f32 %v216_v3, %v215_v62  ;;  %v148_v62 = vld [vmem:[%s4171_s1 + $0x38] sm:$0xff]  ;;  %s2567_s1 = sld [smem:[#allocation6 + $0x3]] }
  0xdb   :  { %v227_v16 = vmul.f32 %v219_v7, %v146_v46  ;;  %v226_v17 = vmul.f32 %v219_v7, %v145_v48  ;;  %v204_v10 = vadd.f32 %v203_v63, %v202_v61  ;;  %v228_v58 = vmul.f32 %v219_v7, %v147_v29 }
  0xdc   :  { %v221_v40 = vmax.f32 %v217_v28, 0.0  ;;  %v225_v61 = vmul.f32 %v218_v50, %v148_v62 }
  0xdd   :  { %v253_v11 = vsel %vm165_vm0, %v227_v16, 0.0  ;;  %v250_v22 = vsel %vm165_vm0, %v226_v17, 0.0  ;;  %v220_v23 = vmax.f32 %v204_v10, 0.0  ;;  %v256_v41 = vsel %vm165_vm0, %v228_v58, 0.0 }
  0xde   :  { %254 = vadd.xlane.f32.xlu1 %v253_v11  ;;  %251 = vadd.xlane.f32.xlu0 %v250_v22  ;;  %v235_v54 = vmul.f32 %v221_v40, %v146_v46  ;;  %v234_v55 = vmul.f32 %v221_v40, %v145_v48  ;;  %v247_v52 = vsel %vm165_vm0, %v225_v61, 0.0  ;;  %v237_v16 = vmul.f32 %v221_v40, %v148_v62 }
  0xdf   :  { %v231_v34 = vmul.f32 %v220_v23, %v146_v46  ;;  %v230_v47 = vmul.f32 %v220_v23, %v145_v48  ;;  %v232_v60 = vmul.f32 %v220_v23, %v147_v29  ;;  %v236_v46 = vmul.f32 %v221_v40, %v147_v29 }
  0xe0   :  { %v277_v57 = vsel %vm165_vm0, %v235_v54, 0.0  ;;  %v274_v59 = vsel %vm165_vm0, %v234_v55, 0.0  ;;  %v229_v48 = vmul.f32 %v219_v7, %v148_v62  ;;  %v233_v17 = vmul.f32 %v220_v23, %v148_v62 }
  0xe1   :  { %v265_v35 = vsel %vm165_vm0, %v231_v34, 0.0  ;;  %v262_v56 = vsel %vm165_vm0, %v230_v47, 0.0  ;;  %v268_v53 = vsel %vm165_vm0, %v232_v60, 0.0  ;;  %v280_v3 = vsel %vm165_vm0, %v236_v46, 0.0 }
  0xe2   :  { %266 = vadd.xlane.f32.xlu1 %v265_v35  ;;  %263 = vadd.xlane.f32.xlu0 %v262_v56  ;;  %v259_v63 = vsel %vm165_vm0, %v229_v48, 0.0  ;;  %v283_v50 = vsel %vm165_vm0, %v237_v16, 0.0  ;;  %v271_v10 = vsel %vm165_vm0, %v233_v17, 0.0 }
  0xe6   :  { %257 = vadd.xlane.f32.xlu1 %v256_v41  ;;  %245 = vadd.xlane.f32.xlu0 %v244_v49 }
  0xea   :  { %278 = vadd.xlane.f32.xlu1 %v277_v57  ;;  %275 = vadd.xlane.f32.xlu0 %v274_v59 }
  0xee   :  { %248 = vadd.xlane.f32.xlu1 %v247_v52  ;;  %269 = vadd.xlane.f32.xlu0 %v268_v53 }
  0xf2   :  { %281 = vadd.xlane.f32.xlu1 %v280_v3  ;;  %260 = vadd.xlane.f32.xlu0 %v259_v63 }
  0xf6   :  { %284 = vadd.xlane.f32.xlu1 %v283_v50  ;;  %272 = vadd.xlane.f32.xlu0 %v271_v10 }
 0x162   :  { %v243_v11 = vpop.xlane.xlu1 %242  ;;  %v240_v22 = vpop.xlane.xlu0 %239 }
 0x163   :  { %v1931_v47 = vmul.f32 -1.442695, %v243_v11  ;;  %v1930_v51 = vmul.f32 -1.442695, %v240_v22 }
 0x165   :  { %2062 = vpow2.f32 %v1931_v47 }
 0x166   :  { %2064 = vpow2.f32 %v1930_v51 }
 0x167   :  { %v255_v29 = vpop.xlane.xlu1 %254  ;;  %v252_v7 = vpop.xlane.xlu0 %251 }
 0x168   :  { %v1935_v58 = vmul.f32 -1.442695, %v255_v29  ;;  %v1934_v40 = vmul.f32 -1.442695, %v252_v7 }
 0x16a   :  { %2066 = vpow2.f32 %v1935_v58 }
 0x16b   :  { %v267_v28 = vpop.xlane.xlu1 %266  ;;  %v264_v34 = vpop.xlane.xlu0 %263 }
 0x16c   :  { %v1939_v54 = vmul.f32 -1.442695, %v267_v28  ;;  %v1938_v55 = vmul.f32 -1.442695, %v264_v34 }
 0x16f   :  { %v258_v35 = vpop.xlane.xlu1 %257  ;;  %v246_v56 = vpop.xlane.xlu0 %245 }
 0x170   :  { %v1932_v23 = vmul.f32 -1.442695, %v246_v56  ;;  %v1936_v62 = vmul.f32 -1.442695, %v258_v35 }
 0x172   :  { %2068 = vpow2.f32 %v1932_v23  ;;  %v2063_v63 = vpop.eup %2062 }
 0x173   :  { %v279_v41 = vpop.xlane.xlu1 %278  ;;  %v276_v49 = vpop.xlane.xlu0 %275  ;;  %2070 = vpow2.f32 %v1934_v40  ;;  %v335_v11 = vadd.f32 1.0, %v2063_v63 }
 0x174   :  { %2072 = vpow2.f32 %v1939_v54  ;;  %v1943_v60 = vmul.f32 -1.442695, %v279_v41  ;;  %v1942_v52 = vmul.f32 -1.442695, %v276_v49  ;;  %v2065_v16 = vpop.eup %2064 }
 0x175   :  { %2074 = vpow2.f32 %v1938_v55  ;;  %v334_v29 = vadd.f32 1.0, %v2065_v16 }
 0x176   :  { %2076 = vpow2.f32 %v1936_v62 }
 0x177   :  { %v249_v57 = vpop.xlane.xlu1 %248  ;;  %v270_v59 = vpop.xlane.xlu0 %269 }
 0x178   :  { %v1933_v61 = vmul.f32 -1.442695, %v249_v57  ;;  %v2067_v10 = vpop.eup %2066  ;;  %v1940_v28 = vmul.f32 -1.442695, %v270_v59 }
 0x179   :  { %v339_v34 = vadd.f32 1.0, %v2067_v10 }
 0x17a   :  { %2078 = vpow2.f32 %v1933_v61 }
 0x17b   :  { %v282_v53 = vpop.xlane.xlu1 %281  ;;  %v261_v46 = vpop.xlane.xlu0 %260  ;;  %2080 = vpow2.f32 %v1943_v60 }
 0x17c   :  { %v1944_v48 = vmul.f32 -1.442695, %v282_v53  ;;  %v1937_v3 = vmul.f32 -1.442695, %v261_v46  ;;  %2082 = vpow2.f32 %v1942_v52 }
 0x17e   :  { %2084 = vpow2.f32 %v1944_v48 }
 0x17f   :  { %v285_v17 = vpop.xlane.xlu1 %284  ;;  %2086 = vpow2.f32 %v1937_v3  ;;  %v2069_v22 = vpop.eup %2068 }
 0x180   :  { %v1945_v50 = vmul.f32 -1.442695, %v285_v17  ;;  %v2071_v7 = vpop.eup %2070  ;;  %v336_v47 = vadd.f32 1.0, %v2069_v22  ;;  %v273_v41 = vpop.xlane.xlu0 %272 }
 0x181   :  { %v2073_v51 = vpop.eup %2072  ;;  %v338_v35 = vadd.f32 1.0, %v2071_v7  ;;  %v1941_v59 = vmul.f32 -1.442695, %v273_v41 }
 0x182   :  { %2088 = vpow2.f32 %v1945_v50  ;;  %v2075_v56 = vpop.eup %2074  ;;  %v343_v40 = vadd.f32 1.0, %v2073_v51 }
 0x183   :  { %2090 = vrcp.f32 %v335_v11  ;;  %v2077_v58 = vpop.eup %2076  ;;  %v342_v54 = vadd.f32 1.0, %v2075_v56 }
 0x184   :  { %2092 = vrcp.f32 %v334_v29  ;;  %v340_v57 = vadd.f32 1.0, %v2077_v58 }
 0x185   :  { %2094 = vpow2.f32 %v1940_v28 }
 0x186   :  { %2096 = vrcp.f32 %v339_v34 }
 0x187   :  { %v2079_v23 = vpop.eup %2078  ;;  %2098 = vrcp.f32 %v336_v47 }
 0x188   :  { %v2081_v49 = vpop.eup %2080  ;;  %2100 = vrcp.f32 %v338_v35  ;;  %v337_v55 = vadd.f32 1.0, %v2079_v23 }
 0x189   :  { %v2083_v62 = vpop.eup %2082  ;;  %v347_v60 = vadd.f32 1.0, %v2081_v49 }
 0x18a   :  { %2102 = vrcp.f32 %v337_v55  ;;  %v346_v53 = vadd.f32 1.0, %v2083_v62 }
 0x18b   :  { %v2085_v61 = vpop.eup %2084  ;;  %2104 = vrcp.f32 %v343_v40 }
 0x18c   :  { %v2087_v52 = vpop.eup %2086  ;;  %2106 = vrcp.f32 %v342_v54  ;;  %v348_v46 = vadd.f32 1.0, %v2085_v61 }
 0x18d   :  { %2108 = vrcp.f32 %v340_v57  ;;  %v341_v3 = vadd.f32 1.0, %v2087_v52 }
 0x18e   :  { %2110 = vpow2.f32 %v1941_v59 }
 0x18f   :  { %v2089_v48 = vpop.eup %2088  ;;  %2112 = vrcp.f32 %v347_v60 }
 0x190   :  { %v2091_v63 = vpop.eup %2090  ;;  %2114 = vrcp.f32 %v346_v53  ;;  %v349_v50 = vadd.f32 1.0, %v2089_v48 }
 0x191   :  { %v2093_v16 = vpop.eup %2092  ;;  %2116 = vrcp.f32 %v348_v46  ;;  %v2398_v29 = vmul.f32 %v2091_v63, %v2261_v8  ;;  %v2404_v47 = vmul.f32 %v2091_v63, %v2263_v9 }
 0x192   :  { %v2095_v17 = vpop.eup %2094  ;;  %2118 = vrcp.f32 %v341_v3  ;;  %v2401_v7 = vmul.f32 %v2093_v16, %v2249_v2  ;;  %v2407_v51 = vmul.f32 %v2093_v16, %v2253_v4 }
 0x193   :  { %v2097_v10 = vpop.eup %2096  ;;  %2120 = vrcp.f32 %v349_v50  ;;  %4323 = vst [vmem:[#allocation11_spill] sm:$0xff] %v2398_v29  ;;  %v344_v28 = vadd.f32 1.0, %v2095_v17  ;;  %4325 = vst [vmem:[#allocation13_spill] sm:$0xff] %v2404_v47 }
 0x194   :  { %v2099_v11 = vpop.eup %2098  ;;  %4324 = vst [vmem:[#allocation12_spill] sm:$0xff] %v2401_v7  ;;  %4326 = vst [vmem:[#allocation14_spill] sm:$0xff] %v2407_v51  ;;  %v2413_v58 = vmul.f32 %v2097_v10, %v2255_v5  ;;  %v2416_v8 = vmul.f32 %v2097_v10, %v2257_v6  ;;  %v414_v4 = vmax.f32 %v2401_v7, %v2398_v29 }
 0x195   :  { %v2101_v22 = vpop.eup %2100  ;;  %v2410_v35 = vmul.f32 %v2099_v11, %v2285_v20  ;;  %v2427_v20 = vmul.f32 %v2099_v11, %v2287_v21  ;;  %2122 = vrcp.f32 %v344_v28  ;;  %v486_v21 = vadd.f32 %v2398_v29, %v2401_v7 }
 0x196   :  { %4328 = vst [vmem:[#allocation16_spill] sm:$0xff] %v2413_v58  ;;  %4329 = vst [vmem:[#allocation17_spill] sm:$0xff] %v2416_v8  ;;  %v2419_v2 = vmul.f32 %v2101_v22, %v2245_v0  ;;  %v2422_v23 = vmul.f32 %v2101_v22, %v2247_v1  ;;  %v423_v0 = vmax.f32 %v2407_v51, %v2404_v47 }
 0x197   :  { %v2103_v34 = vpop.eup %2102  ;;  %4327 = vst [vmem:[#allocation15_spill] sm:$0xff] %v2410_v35  ;;  %4332 = vst [vmem:[#allocation20_spill] sm:$0xff] %v2427_v20  ;;  %v495_v1 = vadd.f32 %v2404_v47, %v2407_v51  ;;  %v415_v41 = vmax.f32 %v414_v4, %v2410_v35  ;;  %v487_v63 = vadd.f32 %v486_v21, %v2410_v35 }
 0x198   :  { %v2105_v56 = vpop.eup %2104  ;;  %4330 = vst [vmem:[#allocation18_spill] sm:$0xff] %v2419_v2  ;;  %4331 = vst [vmem:[#allocation19_spill] sm:$0xff] %v2422_v23  ;;  %v2430_v40 = vmul.f32 %v2103_v34, %v2305_v30  ;;  %v2438_v49 = vmul.f32 %v2103_v34, %v2307_v31  ;;  %v432_v30 = vmax.f32 %v2419_v2, %v2413_v58 }
 0x199   :  { %v2107_v9 = vpop.eup %2106  ;;  %v441_v55 = vmax.f32 %v2422_v23, %v2416_v8  ;;  %v504_v62 = vadd.f32 %v2413_v58, %v2419_v2  ;;  %v424_v31 = vmax.f32 %v423_v0, %v2427_v20  ;;  %v496_v61 = vadd.f32 %v495_v1, %v2427_v20 }
 0x19a   :  { %4333 = vst [vmem:[#allocation21_spill] sm:$0xff] %v2430_v40  ;;  %v2109_v5 = vpop.eup %2108  ;;  %4334 = vst [vmem:[#allocation22_spill] sm:$0xff] %v2438_v49  ;;  %v416_v60 = vmax.f32 %v415_v41, %v2430_v40  ;;  %v2455_v52 = vmul.f32 %v2105_v56, %v2269_v12  ;;  %v2458_v53 = vmul.f32 %v2105_v56, %v2271_v13 }
 0x19b   :  { %v2111_v6 = vpop.eup %2110  ;;  %v2449_v59 = vmul.f32 %v2109_v5, %v2281_v18  ;;  %v2461_v46 = vmul.f32 %v2109_v5, %v2283_v19  ;;  %v2464_v18 = vmul.f32 %v2107_v9, %v2273_v14  ;;  %v425_v16 = vmax.f32 %v424_v31, %v2438_v49 }
 0x19c   :  { %v2113_v54 = vpop.eup %2112  ;;  %4336 = vst [vmem:[#allocation24_spill] sm:$0xff] %v2455_v52  ;;  %4337 = vst [vmem:[#allocation25_spill] sm:$0xff] %v2458_v53  ;;  %v345_v48 = vadd.f32 1.0, %v2111_v6  ;;  %v497_v17 = vadd.f32 %v496_v61, %v2438_v49  ;;  %v2482_v11 = vmul.f32 %v2107_v9, %v2275_v15  ;;  %v417_v28 = vrot.slane %v416_v60, 4 }
 0x19d   :  { %v2115_v57 = vpop.eup %2114  ;;  %4335 = vst [vmem:[#allocation23_spill] sm:$0xff] %v2449_v59  ;;  %4338 = vst [vmem:[#allocation26_spill] sm:$0xff] %v2461_v46  ;;  %v2470_v12 = vmul.f32 %v2113_v54, %v2293_v24  ;;  %v2473_v13 = vmul.f32 %v2113_v54, %v2295_v25  ;;  %v433_v22 = vmax.f32 %v432_v30, %v2449_v59 }
 0x19e   :  { %v2117_v3 = vpop.eup %2116  ;;  %4339 = vst [vmem:[#allocation27_spill] sm:$0xff] %v2464_v18  ;;  %v2476_v19 = vmul.f32 %v2115_v57, %v2297_v26  ;;  %v2479_v10 = vmul.f32 %v2115_v57, %v2299_v27  ;;  %4344 = vst [vmem:[#allocation32_spill] sm:$0xff] %v2482_v11  ;;  %v488_v34 = vadd.f32 %v487_v63, %v2430_v40  ;;  %2124 = vrcp.f32 %v345_v48 }
 0x19f   :  { %v2119_v50 = vpop.eup %2118  ;;  %4340 = vst [vmem:[#allocation28_spill] sm:$0xff] %v2470_v12  ;;  %4341 = vst [vmem:[#allocation29_spill] sm:$0xff] %v2473_v13  ;;  %v442_v24 = vmax.f32 %v441_v55, %v2461_v46  ;;  %v2488_v25 = vmul.f32 %v2117_v3, %v2317_v36  ;;  %v2491_v26 = vmul.f32 %v2117_v3, %v2319_v37  ;;  %v426_v27 = vrot.slane %v425_v16, 4 }
 0x1a0   :  { %4342 = vst [vmem:[#allocation30_spill] sm:$0xff] %v2476_v19  ;;  %4343 = vst [vmem:[#allocation31_spill] sm:$0xff] %v2479_v10  ;;  %v2121_v14 = vpop.eup %2120  ;;  %v498_v56 = vrot.slane %v497_v17, 4  ;;  %v2494_v4 = vmul.f32 %v2119_v50, %v2321_v38  ;;  %v2497_v15 = vmul.f32 %v2119_v50, %v2323_v39  ;;  %v468_v9 = vmax.f32 %v2476_v19, %v2470_v12 }
 0x1a1   :  { %4345 = vst [vmem:[#allocation33_spill] sm:$0xff] %v2488_v25  ;;  %4346 = vst [vmem:[#allocation34_spill] sm:$0xff] %v2491_v26  ;;  %v477_v5 = vmax.f32 %v2479_v10, %v2473_v13  ;;  %v2504_v36 = vmul.f32 %v2121_v14, %v2329_v42  ;;  %v2507_v37 = vmul.f32 %v2121_v14, %v2331_v43  ;;  %v489_v0 = vrot.slane %v488_v34, 4 }
 0x1a2   :  { %4347 = vst [vmem:[#allocation35_spill] sm:$0xff] %v2494_v4  ;;  %4348 = vst [vmem:[#allocation36_spill] sm:$0xff] %v2497_v15  ;;  %v513_v6 = vadd.f32 %v2416_v8, %v2422_v23  ;;  %v450_v38 = vmax.f32 %v2464_v18, %v2455_v52  ;;  %v418_v39 = vmax.f32 %v416_v60, %v417_v28  ;;  %v2123_v1 = vpop.eup %2122 }
 0x1a3   :  { %4349 = vst [vmem:[#allocation37_spill] sm:$0xff] %v2504_v36  ;;  %4350 = vst [vmem:[#allocation38_spill] sm:$0xff] %v2507_v37  ;;  %v469_v41 = vmax.f32 %v468_v9, %v2488_v25  ;;  %v478_v54 = vmax.f32 %v477_v5, %v2491_v26  ;;  %v434_v21 = vmax.f32 %v433_v22, %v2494_v4 }
 0x1a4   :  { %v443_v42 = vmax.f32 %v442_v24, %v2497_v15  ;;  %v459_v43 = vmax.f32 %v2482_v11, %v2458_v53  ;;  %v505_v30 = vadd.f32 %v504_v62, %v2449_v59  ;;  %v427_v55 = vmax.f32 %v425_v16, %v426_v27 }
 0x1a5   :  { %v499_v57 = vadd.f32 %v498_v56, %v497_v17  ;;  %v514_v31 = vadd.f32 %v513_v6, %v2461_v46  ;;  %v549_v61 = vadd.f32 %v2473_v13, %v2479_v10  ;;  %v470_v60 = vmax.f32 %v469_v41, %v2504_v36 }
 0x1a6   :  { %v479_v48 = vmax.f32 %v478_v54, %v2507_v37  ;;  %v540_v3 = vadd.f32 %v2470_v12, %v2476_v19  ;;  %v419_v63 = vrot.slane %v418_v39, 2  ;;  %v490_v50 = vadd.f32 %v489_v0, %v488_v34 }
 0x1a7   :  { %v2528_v14 = vmul.f32 %v2123_v1, %v2309_v32  ;;  %v550_v62 = vadd.f32 %v549_v61, %v2491_v26  ;;  %v435_v16 = vrot.slane %v434_v21, 4  ;;  %v444_v17 = vrot.slane %v443_v42, 4 }
 0x1a8   :  { %v515_v22 = vadd.f32 %v514_v31, %v2497_v15  ;;  %v428_v28 = vrot.slane %v427_v55, 2  ;;  %v500_v24 = vrot.slane %v499_v57, 2  ;;  %v2533_v27 = vmul.f32 %v2123_v1, %v2311_v33 }
 0x1a9   :  { %4351 = vst [vmem:[#allocation39_spill] sm:$0xff] %v2528_v14  ;;  %v541_v56 = vadd.f32 %v540_v3, %v2488_v25  ;;  %v506_v9 = vadd.f32 %v505_v30, %v2494_v4  ;;  %v471_v5 = vrot.slane %v470_v60, 4  ;;  %v480_v34 = vrot.slane %v479_v48, 4 }
 0x1aa   :  { %4352 = vst [vmem:[#allocation40_spill] sm:$0xff] %v2533_v27  ;;  %v551_v32 = vadd.f32 %v550_v62, %v2507_v37  ;;  %v522_v6 = vadd.f32 %v2455_v52, %v2464_v18  ;;  %v531_v0 = vadd.f32 %v2458_v53, %v2482_v11  ;;  %v420_v41 = vmax.f32 %v418_v39, %v419_v63 }
 0x1ab   :  { %v491_v54 = vrot.slane %v490_v50, 2  ;;  %v436_v31 = vmax.f32 %v434_v21, %v435_v16  ;;  %v445_v61 = vmax.f32 %v443_v42, %v444_v17  ;;  %v516_v33 = vrot.slane %v515_v22, 4  ;;  %v2125_v3 = vpop.eup %2124 }
 0x1ac   :  { %v542_v1 = vadd.f32 %v541_v56, %v2504_v36  ;;  %v2543_v26 = vmax.f32 %v427_v55, %v428_v28  ;;  %v2545_v30 = vadd.f32 %v500_v24, %v499_v57  ;;  %v451_v62 = vmax.f32 %v450_v38, %v2528_v14 }
 0x1ad   :  { %v460_v37 = vmax.f32 %v459_v43, %v2533_v27  ;;  %v507_v25 = vrot.slane %v506_v9, 4  ;;  %v472_v13 = vmax.f32 %v470_v60, %v471_v5  ;;  %v481_v12 = vmax.f32 %v479_v48, %v480_v34 }
 0x1ae   :  { %v552_v10 = vrot.slane %v551_v32, 4  ;;  %v421_v39 = vrot.slane %v420_v41, 1  ;;  %v2549_v63 = vadd.f32 %v491_v54, %v490_v50  ;;  %v523_v21 = vadd.f32 %v522_v6, %v2528_v14 }
 0x1af   :  { %v532_v42 = vadd.f32 %v531_v0, %v2533_v27  ;;  %v437_v16 = vrot.slane %v436_v31, 2  ;;  %v446_v55 = vrot.slane %v445_v61, 2  ;;  %v517_v17 = vadd.f32 %v516_v33, %v515_v22 }
 0x1b0   :  { %v543_v57 = vrot.slane %v542_v1, 4  ;;  %v430_v28 = vrot.slane %v2543_v26, 1  ;;  %v2556_v43 = vmul.f32 %v2125_v3, %v2333_v44  ;;  %v2559_v60 = vmul.f32 %v2125_v3, %v2335_v45 }
 0x1b1   :  { %v508_v48 = vadd.f32 %v507_v25, %v506_v9  ;;  %v473_v50 = vrot.slane %v472_v13, 2  ;;  %v482_v24 = vrot.slane %v481_v12, 2  ;;  %v553_v56 = vadd.f32 %v552_v10, %v551_v32 }
 0x1b2   :  { %4353 = vst [vmem:[#allocation41_spill] sm:$0xff] %v2556_v43  ;;  %4354 = vst [vmem:[#allocation42_spill] sm:$0xff] %v2559_v60  ;;  %v452_v5 = vmax.f32 %v451_v62, %v2556_v43  ;;  %v461_v34 = vmax.f32 %v460_v37, %v2559_v60  ;;  %v524_v22 = vadd.f32 %v523_v21, %v2556_v43  ;;  %v518_v33 = vrot.slane %v517_v17, 2 }
 0x1b3   :  { %v533_v6 = vadd.f32 %v532_v42, %v2559_v60  ;;  %v438_v0 = vmax.f32 %v436_v31, %v437_v16  ;;  %v447_v54 = vmax.f32 %v445_v61, %v446_v55  ;;  %v544_v44 = vadd.f32 %v543_v57, %v542_v1 }
 0x1b4   :  { %v453_v38 = vrot.slane %v452_v5, 4  ;;  %v462_v36 = vrot.slane %v461_v34, 4  ;;  %v525_v45 = vrot.slane %v524_v22, 4  ;;  %v509_v25 = vrot.slane %v508_v48, 2 }
 0x1b5   :  { %v534_v3 = vrot.slane %v533_v6, 4  ;;  %v474_v9 = vmax.f32 %v472_v13, %v473_v50  ;;  %v483_v10 = vmax.f32 %v481_v12, %v482_v24  ;;  %v554_v32 = vrot.slane %v553_v56, 2 }
 0x1b6   :  { %v454_v62 = vmax.f32 %v452_v5, %v453_v38  ;;  %v463_v37 = vmax.f32 %v461_v34, %v462_v36  ;;  %v526_v19 = vadd.f32 %v525_v45, %v524_v22  ;;  %v439_v42 = vrot.slane %v438_v0, 1 }
 0x1b7   :  { %v535_v21 = vadd.f32 %v534_v3, %v533_v6  ;;  %v448_v31 = vrot.slane %v447_v54, 1  ;;  %v519_v61 = vadd.f32 %v518_v33, %v517_v17  ;;  %v545_v16 = vrot.slane %v544_v44, 2 }
 0x1b8   :  { %v455_v1 = vrot.slane %v454_v62, 2  ;;  %v464_v55 = vrot.slane %v463_v37, 2  ;;  %v527_v57 = vrot.slane %v526_v19, 2  ;;  %v2565_v43 = vmax.f32 %v420_v41, %v421_v39 }
 0x1b9   :  { %v536_v60 = vrot.slane %v535_v21, 2  ;;  %v475_v27 = vrot.slane %v474_v9, 1  ;;  %v484_v13 = vrot.slane %v483_v10, 1  ;;  %v555_v12 = vadd.f32 %v554_v32, %v553_v56 }
 0x1ba   :  { %v510_v50 = vadd.f32 %v509_v25, %v508_v48  ;;  %v456_v24 = vmax.f32 %v454_v62, %v455_v1  ;;  %v465_v38 = vmax.f32 %v463_v37, %v464_v55  ;;  %v2569_v5 = vmax.f32 %v438_v0, %v439_v42 }
 0x1bb   :  { %v537_v36 = vadd.f32 %v536_v60, %v535_v21  ;;  %v2571_v34 = vmax.f32 %v447_v54, %v448_v31  ;;  %v546_v17 = vadd.f32 %v545_v16, %v544_v44  ;;  %v528_v22 = vadd.f32 %v527_v57, %v526_v19 }
 0x1bc   :  { %v2574_v6 = vmax.f32 %v2543_v26, %v430_v28  ;;  %v520_v41 = vrot.slane %v519_v61, 1  ;;  %v457_v39 = vrot.slane %v456_v24, 1  ;;  %v466_v33 = vrot.slane %v465_v38, 1 }
 0x1bd   :  { %v2576_v45 = vmax.f32 %v474_v9, %v475_v27  ;;  %v2578_v48 = vmax.f32 %v483_v10, %v484_v13  ;;  %v556_v56 = vrot.slane %v555_v12, 1  ;;  %v538_v60 = vrot.slane %v537_v36, 1 }
 0x1be   :  { %v493_v0 = vrot.slane %v2549_v63, 1  ;;  %v511_v54 = vrot.slane %v510_v50, 1  ;;  %v2583_v3 = vmax.f32 %v456_v24, %v457_v39  ;;  %v2585_v19 = vmax.f32 %v465_v38, %v466_v33 }
 0x1bf   :  { %v547_v26 = vrot.slane %v546_v17, 1  ;;  %v529_v28 = vrot.slane %v528_v22, 1  ;;  %v584_v27 = vsel %vm578_vm1, %v2571_v34, %v2574_v6  ;;  %v579_v44 = vsel %vm578_vm1, %v2569_v5, %v2565_v43 }
 0x1c0   :  { %v4355_v25 = vrot.slane %v2545_v30, 1  ;;  %v521_v10 = vadd.f32 %v520_v41, %v519_v61  ;;  %v585_v32 = vsel %vm580_vm2, %v2585_v19, %v584_v27  ;;  %v581_v62 = vsel %vm580_vm2, %v2583_v3, %v579_v44 }
 0x1c1   :  { %v557_v37 = vadd.f32 %v556_v56, %v555_v12  ;;  %v539_v21 = vadd.f32 %v538_v60, %v537_v36  ;;  %v2602_v42 = vsel %vm582_vm3, %v2578_v48, %v585_v32  ;;  %v2606_v31 = vsel %vm582_vm3, %v2576_v45, %v581_v62 }
 0x1c2   :  { %v503_v9 = vadd.f32 %v4355_v25, %v2545_v30  ;;  %591 = vrot.lane.b32.xlu1 %v2602_v42, %s2198_s16  ;;  %589 = vrot.lane.b32.xlu0 %v2606_v31, %s2198_s16  ;;  %v795_v30 = vstv %s2567_s1  ;;  %v494_v61 = vadd.f32 %v493_v0, %v2549_v63  ;;  %v512_v16 = vadd.f32 %v511_v54, %v510_v50  ;;  %s2899_s1 = sld [smem:[#allocation6 + $0x1]] }
 0x1c3   :  { %v548_v1 = vadd.f32 %v547_v26, %v546_v17  ;;  %v530_v55 = vadd.f32 %v529_v28, %v528_v22  ;;  %v2618_v13 = vmul.f32 0.03125, %v521_v10  ;;  %v799_v12 = vmul.f32 %v795_v30, %v2571_v34 }
 0x1c4   :  { %v2616_v57 = vmul.f32 0.03125, %v503_v9  ;;  %v2621_v24 = vmul.f32 0.03125, %v557_v37  ;;  %v2623_v38 = vmul.f32 0.03125, %v539_v21  ;;  %v822_v36 = vstv %s2580_s15  ;;  %s2907_s15 = sld [smem:[#allocation6 + $0x8]] }
 0x1c5   :  { %v797_v63 = vmul.f32 %v795_v30, %v2574_v6  ;;  %v801_v50 = vmul.f32 %v795_v30, %v2585_v19  ;;  %v2634_v17 = vmul.f32 0.03125, %v494_v61  ;;  %v2636_v22 = vmul.f32 0.03125, %v512_v16 }
 0x1c6   :  { %634 = vrot.lane.b32.xlu1 %v2602_v42, %s2199_s18  ;;  %632 = vrot.lane.b32.xlu0 %v2606_v31, %s2199_s18  ;;  %v2638_v41 = vmul.f32 0.03125, %v548_v1  ;;  %v2640_v39 = vmul.f32 0.03125, %v530_v55  ;;  %v803_v33 = vmul.f32 %v795_v30, %v2578_v48  ;;  %v824_v60 = vmul.f32 %v822_v36, %v2616_v57 }
 0x1c7   :  { %v815_v56 = vsel %vm578_vm1, %v799_v12, %v797_v63  ;;  %v826_v0 = vmul.f32 %v822_v36, %v2618_v13  ;;  %v828_v26 = vmul.f32 %v822_v36, %v2623_v38  ;;  %v830_v28 = vmul.f32 %v822_v36, %v2621_v24 }
 0x1c8   :  { %v816_v54 = vsel %vm580_vm2, %v801_v50, %v815_v56  ;;  %v796_v27 = vmul.f32 %v795_v30, %v2565_v43  ;;  %v798_v9 = vmul.f32 %v795_v30, %v2569_v5  ;;  %v942_v10 = vstv %s2613_s17  ;;  %4375 = sst [smem:[#allocation62_spill]] %s2899_s1 }
 0x1c9   :  { %v2655_v44 = vsel %vm582_vm3, %v803_v33, %v816_v54  ;;  %v842_v25 = vsel %vm578_vm1, %v826_v0, %v824_v60  ;;  %v800_v62 = vmul.f32 %v795_v30, %v2583_v3  ;;  %v802_v37 = vmul.f32 %v795_v30, %v2576_v45  ;;  %s2920_s17 = sld [smem:[#allocation6 + $0x1d]] }
 0x1ca   :  { %659 = vrot.lane.b32.xlu1 %v2602_v42, %s2200_s20  ;;  %657 = vrot.lane.b32.xlu0 %v2606_v31, %s2200_s20  ;;  %v843_v32 = vsel %vm580_vm2, %v828_v26, %v842_v25  ;;  %v823_v21 = vmul.f32 %v822_v36, %v2634_v17  ;;  %v812_v16 = vsel %vm578_vm1, %v798_v9, %v796_v27  ;;  %v969_v0 = vstv %s2632_s19  ;;  %4376 = sst [smem:[#allocation63_spill]] %s2907_s15 }
 0x1cb   :  { %v2665_v61 = vsel %vm582_vm3, %v830_v28, %v843_v32  ;;  %v825_v1 = vmul.f32 %v822_v36, %v2636_v22  ;;  %v827_v55 = vmul.f32 %v822_v36, %v2640_v39  ;;  %v813_v12 = vsel %vm580_vm2, %v800_v62, %v812_v16  ;;  %s2932_s19 = sld [smem:[#allocation6 + $0x2b]] }
 0x1cc   :  { %v829_v63 = vmul.f32 %v822_v36, %v2638_v41  ;;  %v944_v50 = vmul.f32 %v942_v10, %v2574_v6  ;;  %v946_v30 = vmul.f32 %v942_v10, %v2571_v34  ;;  %v2679_v33 = vsel %vm582_vm3, %v802_v37, %v813_v12  ;;  %s3160_s15 = sld [smem:[#allocation6 + $0x5c]] }
 0x1cd   :  { %v839_v56 = vsel %vm578_vm1, %v825_v1, %v823_v21  ;;  %v948_v60 = vmul.f32 %v942_v10, %v2585_v19  ;;  %v606_v36 = vsel %vm578_vm1, %v2636_v22, %v2634_v17  ;;  %v950_v26 = vmul.f32 %v942_v10, %v2578_v48  ;;  %s4496_s1 = sld [smem:[#allocation55_spill]] }
 0x1ce   :  { %684 = vrot.lane.b32.xlu1 %v2602_v42, %s2201_s23  ;;  %682 = vrot.lane.b32.xlu0 %v2606_v31, %s2201_s23  ;;  %v840_v54 = vsel %vm580_vm2, %v827_v55, %v839_v56  ;;  %v962_v28 = vsel %vm578_vm1, %v946_v30, %v944_v50  ;;  %v607_v27 = vsel %vm580_vm2, %v2640_v39, %v606_v36 }
 0x1cf   :  { %v2695_v25 = vsel %vm582_vm3, %v829_v63, %v840_v54  ;;  %v963_v9 = vsel %vm580_vm2, %v948_v60, %v962_v28  ;;  %v971_v62 = vmul.f32 %v969_v0, %v2616_v57  ;;  %v973_v37 = vmul.f32 %v969_v0, %v2618_v13  ;;  %4379 = sst [smem:[#allocation66_spill]] %s2920_s17 }
 0x1d0   :  { %v2701_v32 = vsel %vm582_vm3, %v950_v26, %v963_v9  ;;  %v975_v21 = vmul.f32 %v969_v0, %v2623_v38  ;;  %v977_v16 = vmul.f32 %v969_v0, %v2621_v24  ;;  %v943_v1 = vmul.f32 %v942_v10, %v2565_v43 }
 0x1d1   :  { %v945_v55 = vmul.f32 %v942_v10, %v2569_v5  ;;  %v609_v12 = vsel %vm578_vm1, %v2618_v13, %v2616_v57  ;;  %v989_v63 = vsel %vm578_vm1, %v973_v37, %v971_v62  ;;  %v947_v50 = vmul.f32 %v942_v10, %v2583_v3  ;;  %4382 = sst [smem:[#allocation69_spill]] %s2932_s19 }
 0x1d2   :  { %709 = vrot.lane.b32.xlu1 %v2602_v42, %s2202_s3  ;;  %707 = vrot.lane.b32.xlu0 %v2606_v31, %s2202_s3  ;;  %v949_v30 = vmul.f32 %v942_v10, %v2576_v45  ;;  %v2721_v56 = vsel %vm582_vm3, %v2638_v41, %v607_v27  ;;  %v610_v60 = vsel %vm580_vm2, %v2623_v38, %v609_v12  ;;  %v1116_v12 = vstv %s2698_s25  ;;  %s2956_s25 = sld [smem:[#allocation6 + $0x38]] }
 0x1d3   :  { %v990_v36 = vsel %vm580_vm2, %v975_v21, %v989_v63  ;;  %v959_v54 = vsel %vm578_vm1, %v945_v55, %v943_v1  ;;  %v970_v10 = vmul.f32 %v969_v0, %v2634_v17  ;;  %v972_v9 = vmul.f32 %v969_v0, %v2636_v22  ;;  %4444 = sst [smem:[#allocation129_spill]] %s3160_s15 }
 0x1d4   :  { %v2728_v26 = vsel %vm582_vm3, %v977_v16, %v990_v36  ;;  %v960_v28 = vsel %vm580_vm2, %v947_v50, %v959_v54  ;;  %v974_v62 = vmul.f32 %v969_v0, %v2640_v39  ;;  %v976_v37 = vmul.f32 %v969_v0, %v2638_v41  ;;  %s4491_s15 = sld [smem:[#allocation132_spill]] }
 0x1d5   :  { %v2738_v27 = vsel %vm582_vm3, %v949_v30, %v960_v28  ;;  %v1089_v21 = vstv %s2684_s24  ;;  %v986_v16 = vsel %vm578_vm1, %v972_v9, %v970_v10  ;;  %v2749_v63 = vsel %vm582_vm3, %v2621_v24, %v610_v60  ;;  %s2949_s24 = sld [smem:[#allocation6 + $0x31]] }
 0x1d6   :  { %614 = vrot.lane.b32.xlu1 %v2721_v56, %s2198_s16  ;;  %639 = vrot.lane.b32.xlu0 %v2721_v56, %s2199_s18  ;;  %4356 = vst [vmem:[#allocation43_spill] sm:$0xff] %v2738_v27  ;;  %v987_v1 = vsel %vm580_vm2, %v974_v62, %v986_v16  ;;  %v1093_v55 = vmul.f32 %v1089_v21, %v2571_v34  ;;  %s4497_s19 = sld [smem:[#allocation56_spill]] }
 0x1d7   :  { %v2752_v50 = vsel %vm582_vm3, %v976_v37, %v987_v1  ;;  %v1091_v30 = vmul.f32 %v1089_v21, %v2574_v6  ;;  %v1095_v0 = vmul.f32 %v1089_v21, %v2585_v19  ;;  %v1097_v36 = vmul.f32 %v1089_v21, %v2578_v48 }
 0x1d8   :  { %4357 = vst [vmem:[#allocation44_spill] sm:$0xff] %v2752_v50  ;;  %v1118_v60 = vmul.f32 %v1116_v12, %v2616_v57  ;;  %v1120_v28 = vmul.f32 %v1116_v12, %v2618_v13  ;;  %v1122_v10 = vmul.f32 %v1116_v12, %v2623_v38  ;;  %v1124_v62 = vmul.f32 %v1116_v12, %v2621_v24  ;;  %4388 = sst [smem:[#allocation75_spill]] %s2956_s25 }
 0x1d9   :  { %v1109_v54 = vsel %vm578_vm1, %v1093_v55, %v1091_v30  ;;  %v1366_v37 = vstv %s2007_s0  ;;  %v1090_v14 = vmul.f32 %v1089_v21, %v2565_v43  ;;  %v1092_v55 = vmul.f32 %v1089_v21, %v2569_v5  ;;  %s2966_s0 = sld [smem:[#allocation6 + $0x46]] }
 0x1da   :  { %616 = vrot.lane.b32.xlu1 %v2749_v63, %s2198_s16  ;;  %664 = vrot.lane.b32.xlu0 %v2721_v56, %s2200_s20  ;;  %v1110_v9 = vsel %vm580_vm2, %v1095_v0, %v1109_v54  ;;  %v1136_v1 = vsel %vm578_vm1, %v1120_v28, %v1118_v60  ;;  %v1094_v0 = vmul.f32 %v1089_v21, %v2583_v3  ;;  %v1393_v54 = vstv %s2008_s26  ;;  %s2914_s16 = sld [smem:[#allocation6 + $0x16]] }
 0x1db   :  { %v2768_v16 = vsel %vm582_vm3, %v1097_v36, %v1110_v9  ;;  %v1137_v30 = vsel %vm580_vm2, %v1122_v10, %v1136_v1  ;;  %v1096_v36 = vmul.f32 %v1089_v21, %v2576_v45  ;;  %v1106_v28 = vsel %vm578_vm1, %v1092_v55, %v1090_v14  ;;  %4386 = sst [smem:[#allocation73_spill]] %s2949_s24 }
 0x1dc   :  { %4358 = vst [vmem:[#allocation45_spill] sm:$0xff] %v2768_v16  ;;  %v2783_v60 = vsel %vm582_vm3, %v1124_v62, %v1137_v30  ;;  %v1117_v9 = vmul.f32 %v1116_v12, %v2634_v17  ;;  %v1119_v53 = vmul.f32 %v1116_v12, %v2636_v22  ;;  %v1121_v10 = vmul.f32 %v1116_v12, %v2640_v39  ;;  %s2974_s26 = sld [smem:[#allocation6 + $0x4d]] }
 0x1dd   :  { %4359 = vst [vmem:[#allocation46_spill] sm:$0xff] %v2783_v60  ;;  %v1123_v1 = vmul.f32 %v1116_v12, %v2638_v41  ;;  %v1368_v21 = vmul.f32 %v1366_v37, %v2574_v6  ;;  %v1370_v30 = vmul.f32 %v1366_v37, %v2571_v34  ;;  %v1372_v14 = vmul.f32 %v1366_v37, %v2585_v19  ;;  %s4484_s24 = sld [smem:[#allocation118_spill]] }
 0x1de   :  { %641 = vrot.lane.b32.xlu1 %v2749_v63, %s2199_s18  ;;  %732 = vrot.lane.b32.xlu0 %v2606_v31, %s2203_s27  ;;  %v1107_v31 = vsel %vm580_vm2, %v1094_v0, %v1106_v28  ;;  %v1133_v62 = vsel %vm578_vm1, %v1119_v53, %v1117_v9  ;;  %v1374_v55 = vmul.f32 %v1366_v37, %v2578_v48  ;;  %s2924_s18 = sld [smem:[#allocation6 + $0x24]] }
 0x1df   :  { %v2793_v52 = vsel %vm582_vm3, %v1096_v36, %v1107_v31  ;;  %v1134_v12 = vsel %vm580_vm2, %v1121_v10, %v1133_v62  ;;  %v1395_v0 = vmul.f32 %v1393_v54, %v2616_v57  ;;  %v1386_v36 = vsel %vm578_vm1, %v1370_v30, %v1368_v21  ;;  %4390 = sst [smem:[#allocation77_spill]] %s2966_s0 }
 0x1e0   :  { %4360 = vst [vmem:[#allocation47_spill] sm:$0xff] %v2793_v52  ;;  %v2808_v53 = vsel %vm582_vm3, %v1123_v1, %v1134_v12  ;;  %v1397_v28 = vmul.f32 %v1393_v54, %v2618_v13  ;;  %v1399_v9 = vmul.f32 %v1393_v54, %v2623_v38  ;;  %v1387_v31 = vsel %vm580_vm2, %v1372_v14, %v1386_v36  ;;  %4378 = sst [smem:[#allocation65_spill]] %s2914_s16 }
 0x1e1   :  { %4361 = vst [vmem:[#allocation48_spill] sm:$0xff] %v2808_v53  ;;  %v1401_v11 = vmul.f32 %v1393_v54, %v2621_v24  ;;  %v2816_v10 = vsel %vm582_vm3, %v1374_v55, %v1387_v31  ;;  %v1367_v18 = vmul.f32 %v1366_v37, %v2565_v43  ;;  %v1369_v1 = vmul.f32 %v1366_v37, %v2569_v5  ;;  %s3211_s16 = sld [smem:[#allocation6 + $0x59]] }
 0x1e2   :  { %666 = vrot.lane.b32.xlu1 %v2749_v63, %s2200_s20  ;;  %689 = vrot.lane.b32.xlu0 %v2721_v56, %s2201_s23  ;;  %4362 = vst [vmem:[#allocation49_spill] sm:$0xff] %v2816_v10  ;;  %v1413_v62 = vsel %vm578_vm1, %v1397_v28, %v1395_v0  ;;  %v1371_v30 = vmul.f32 %v1366_v37, %v2583_v3  ;;  %v1513_v12 = vstv %s2780_s28  ;;  %s2937_s20 = sld [smem:[#allocation6 + $0x17]] }
 0x1e3   :  { %v1414_v21 = vsel %vm580_vm2, %v1399_v9, %v1413_v62  ;;  %v1373_v14 = vmul.f32 %v1366_v37, %v2576_v45  ;;  %v1383_v0 = vsel %vm578_vm1, %v1369_v1, %v1367_v18  ;;  %v1396_v36 = vmul.f32 %v1393_v54, %v2636_v22  ;;  %4392 = sst [smem:[#allocation79_spill]] %s2974_s26 }
 0x1e4   :  { %v2832_v55 = vsel %vm582_vm3, %v1401_v11, %v1414_v21  ;;  %v1384_v28 = vsel %vm580_vm2, %v1371_v30, %v1383_v0  ;;  %v1398_v9 = vmul.f32 %v1393_v54, %v2640_v39  ;;  %v1400_v37 = vmul.f32 %v1393_v54, %v2638_v41  ;;  %4380 = sst [smem:[#allocation67_spill]] %s2924_s18 }
 0x1e5   :  { %4363 = vst [vmem:[#allocation50_spill] sm:$0xff] %v2832_v55  ;;  %v2845_v31 = vsel %vm582_vm3, %v1373_v14, %v1384_v28  ;;  %v1515_v18 = vmul.f32 %v1513_v12, %v2574_v6  ;;  %v1540_v62 = vstv %s2798_s29  ;;  %v1517_v1 = vmul.f32 %v1513_v12, %v2571_v34  ;;  %s2988_s28 = sld [smem:[#allocation6 + $0x5b]] }
 0x1e6   :  { %734 = vrot.lane.b32.xlu1 %v2602_v42, %s2203_s27  ;;  %714 = vrot.lane.b32.xlu0 %v2721_v56, %s2202_s3  ;;  %v1394_v42 = vmul.f32 %v1393_v54, %v2634_v17  ;;  %4364 = vst [vmem:[#allocation51_spill] sm:$0xff] %v2845_v31  ;;  %v1519_v21 = vmul.f32 %v1513_v12, %v2585_v19  ;;  %s2993_s29 = sld [smem:[#allocation6 + $0x4]] }
 0x1e7   :  { %v1521_v14 = vmul.f32 %v1513_v12, %v2578_v48  ;;  %v1533_v0 = vsel %vm578_vm1, %v1517_v1, %v1515_v18  ;;  %v1514_v18 = vmul.f32 %v1513_v12, %v2565_v43  ;;  %v1541_v15 = vmul.f32 %v1540_v62, %v2634_v17  ;;  %s3053_s26 = sld [smem:[#allocation6 + $0x35]] }
 0x1e8   :  { %v1410_v11 = vsel %vm578_vm1, %v1396_v36, %v1394_v42  ;;  %v1544_v42 = vmul.f32 %v1540_v62, %v2618_v13  ;;  %v1546_v36 = vmul.f32 %v1540_v62, %v2623_v38  ;;  %v1534_v28 = vsel %vm580_vm2, %v1519_v21, %v1533_v0  ;;  %4383 = sst [smem:[#allocation70_spill]] %s2937_s20 }
 0x1e9   :  { %v1411_v54 = vsel %vm580_vm2, %v1398_v9, %v1410_v11  ;;  %v1548_v9 = vmul.f32 %v1540_v62, %v2621_v24  ;;  %v1518_v21 = vmul.f32 %v1513_v12, %v2583_v3  ;;  %v1520_v0 = vmul.f32 %v1513_v12, %v2576_v45  ;;  %s3172_s20 = sld [smem:[#allocation6 + $0x52]] }
 0x1ea   :  { %691 = vrot.lane.b32.xlu1 %v2749_v63, %s2201_s23  ;;  %739 = vrot.lane.b32.xlu0 %v2721_v56, %s2203_s27  ;;  %v2864_v30 = vsel %vm582_vm3, %v1400_v37, %v1411_v54  ;;  %v1542_v56 = vmul.f32 %v1540_v62, %v2616_v57  ;;  %v2882_v37 = vsel %vm582_vm3, %v1521_v14, %v1534_v28  ;;  %s2943_s23 = sld [smem:[#allocation6 + $0x2]] }
 0x1eb   :  { %4367 = vst [vmem:[#allocation54_spill] sm:$0xff] %v2864_v30  ;;  %4371 = vst [vmem:[#allocation58_spill] sm:$0xff] %v2882_v37  ;;  %v1516_v54 = vmul.f32 %v1513_v12, %v2569_v5  ;;  %4395 = sst [smem:[#allocation82_spill]] %s2988_s28 }
 0x1ec   :  { %v1560_v11 = vsel %vm578_vm1, %v1544_v42, %v1542_v56  ;;  %v1660_v42 = vstv %s2829_s30  ;;  %4396 = sst [smem:[#allocation83_spill]] %s2993_s29 }
 0x1ed   :  { %v1561_v1 = vsel %vm580_vm2, %v1546_v36, %v1560_v11  ;;  %v1530_v56 = vsel %vm578_vm1, %v1516_v54, %v1514_v18  ;;  %v1543_v36 = vmul.f32 %v1540_v62, %v2636_v22  ;;  %v1545_v11 = vmul.f32 %v1540_v62, %v2640_v39  ;;  %s2997_s30 = sld [smem:[#allocation6 + $0x5]] }
 0x1ee   :  { %716 = vrot.lane.b32.xlu1 %v2749_v63, %s2202_s3  ;;  %v2895_v14 = vsel %vm582_vm3, %v1548_v9, %v1561_v1  ;;  %v1531_v28 = vsel %vm580_vm2, %v1518_v21, %v1530_v56  ;;  %v1547_v9 = vmul.f32 %v1540_v62, %v2638_v41  ;;  %v1687_v18 = vstv %s2837_s5  ;;  %s2962_s3 = sld [smem:[#allocation6 + $0x3f]] }
 0x1ef   :  { %4374 = vst [vmem:[#allocation61_spill] sm:$0xff] %v2895_v14  ;;  %v2910_v12 = vsel %vm582_vm3, %v1520_v0, %v1531_v28  ;;  %v1557_v54 = vsel %vm578_vm1, %v1543_v36, %v1541_v15  ;;  %v1662_v1 = vmul.f32 %v1660_v42, %v2574_v6  ;;  %v1664_v21 = vmul.f32 %v1660_v42, %v2571_v34  ;;  %s3007_s5 = sld [smem:[#allocation6 + $0x47]] }
 0x1f0   :  { %4377 = vst [vmem:[#allocation64_spill] sm:$0xff] %v2910_v12  ;;  %v1666_v56 = vmul.f32 %v1660_v42, %v2585_v19  ;;  %v1668_v0 = vmul.f32 %v1660_v42, %v2578_v48  ;;  %v1689_v15 = vmul.f32 %v1687_v18, %v2616_v57  ;;  %v1691_v36 = vmul.f32 %v1687_v18, %v2618_v13  ;;  %4385 = sst [smem:[#allocation72_spill]] %s2943_s23 }
 0x1f1   :  { %v1680_v28 = vsel %vm578_vm1, %v1664_v21, %v1662_v1  ;;  %v1663_v46 = vmul.f32 %v1660_v42, %v2569_v5  ;;  %s3041_s29 = sld [smem:[#allocation6 + $0x12]] }
 0x1f2   :  { %741 = vrot.lane.b32.xlu1 %v2749_v63, %s2203_s27  ;;  %v1558_v63 = vsel %vm580_vm2, %v1545_v11, %v1557_v54  ;;  %v1681_v4 = vsel %vm580_vm2, %v1666_v56, %v1680_v28  ;;  %v1693_v11 = vmul.f32 %v1687_v18, %v2623_v38  ;;  %v1695_v54 = vmul.f32 %v1687_v18, %v2621_v24  ;;  %s2980_s27 = sld [smem:[#allocation6 + $0x54]] }
 0x1f3   :  { %v2927_v62 = vsel %vm582_vm3, %v1547_v9, %v1558_v63  ;;  %v2940_v9 = vsel %vm582_vm3, %v1668_v0, %v1681_v4  ;;  %v1707_v1 = vsel %vm578_vm1, %v1691_v36, %v1689_v15  ;;  %v1661_v63 = vmul.f32 %v1660_v42, %v2565_v43  ;;  %4397 = sst [smem:[#allocation84_spill]] %s2997_s30 }
 0x1f4   :  { %4381 = vst [vmem:[#allocation68_spill] sm:$0xff] %v2927_v62  ;;  %4384 = vst [vmem:[#allocation71_spill] sm:$0xff] %v2940_v9  ;;  %v1708_v21 = vsel %vm580_vm2, %v1693_v11, %v1707_v1  ;;  %v1665_v56 = vmul.f32 %v1660_v42, %v2583_v3  ;;  %v1667_v4 = vmul.f32 %v1660_v42, %v2576_v45  ;;  %v1236_v0 = vstv %s2842_s6  ;;  %4389 = sst [smem:[#allocation76_spill]] %s2962_s3 }
 0x1f5   :  { %v2952_v28 = vsel %vm582_vm3, %v1695_v54, %v1708_v21  ;;  %v1677_v15 = vsel %vm578_vm1, %v1663_v46, %v1661_v63  ;;  %v1688_v36 = vmul.f32 %v1687_v18, %v2634_v17  ;;  %v1690_v11 = vmul.f32 %v1687_v18, %v2636_v22  ;;  %4400 = sst [smem:[#allocation87_spill]] %s3007_s5 }
 0x1f6   :  { %4387 = vst [vmem:[#allocation74_spill] sm:$0xff] %v2952_v28  ;;  %v1692_v1 = vmul.f32 %v1687_v18, %v2640_v39  ;;  %v1678_v59 = vsel %vm580_vm2, %v1665_v56, %v1677_v15  ;;  %v1694_v54 = vmul.f32 %v1687_v18, %v2638_v41  ;;  %v1237_v21 = vmul.f32 %v1236_v0, %v2565_v43  ;;  %s3013_s6 = sld [smem:[#allocation6 + $0x32]] }
 0x1f7   :  { %v2969_v42 = vsel %vm582_vm3, %v1667_v4, %v1678_v59  ;;  %v1704_v46 = vsel %vm578_vm1, %v1690_v11, %v1688_v36  ;;  %v1239_v63 = vmul.f32 %v1236_v0, %v2569_v5  ;;  %v1238_v56 = vmul.f32 %v1236_v0, %v2574_v6  ;;  %s3039_s30 = sld [smem:[#allocation6 + $0x39]] }
 0x1f8   :  { %4391 = vst [vmem:[#allocation78_spill] sm:$0xff] %v2969_v42  ;;  %v1705_v8 = vsel %vm580_vm2, %v1692_v1, %v1704_v46  ;;  %v1240_v15 = vmul.f32 %v1236_v0, %v2571_v34  ;;  %v1241_v18 = vmul.f32 %v1236_v0, %v2583_v3  ;;  %4393 = sst [smem:[#allocation80_spill]] %s2980_s27  ;;  %v1242_v4 = vmul.f32 %v1236_v0, %v2585_v19 }
 0x1f9   :  { %v2983_v59 = vsel %vm582_vm3, %v1694_v54, %v1705_v8  ;;  %v1243_v43 = vmul.f32 %v1236_v0, %v2576_v45  ;;  %v1263_v5 = vstv %s2850_s7  ;;  %v1244_v36 = vmul.f32 %v1236_v0, %v2578_v48  ;;  %s3018_s7 = sld [smem:[#allocation6 + $0x9]] }
 0x1fa   :  { %4394 = vst [vmem:[#allocation81_spill] sm:$0xff] %v2983_v59  ;;  %v1253_v6 = vsel %vm578_vm1, %v1239_v63, %v1237_v21  ;;  %v1256_v34 = vsel %vm578_vm1, %v1240_v15, %v1238_v56  ;;  %v1264_v48 = vmul.f32 %v1263_v5, %v2634_v17  ;;  %v1266_v0 = vmul.f32 %v1263_v5, %v2636_v22  ;;  %4411 = sst [smem:[#allocation98_spill]] %s3041_s29  ;;  %v566_v15 = vld [vmem:[%s4172_s2] sm:$0xff] }
 0x1fb   :  { %v1254_v3 = vsel %vm580_vm2, %v1241_v18, %v1253_v6  ;;  %v1257_v8 = vsel %vm580_vm2, %v1242_v4, %v1256_v34  ;;  %v1265_v11 = vmul.f32 %v1263_v5, %v2616_v57  ;;  %v1267_v1 = vmul.f32 %v1263_v5, %v2618_v13  ;;  %s3045_s5 = sld [smem:[#allocation6 + $0x3a]]  ;;  %v567_v18 = vld [vmem:[%s4172_s2 + $0x8] sm:$0xff]  ;;  %v568_v34 = vld [vmem:[%s4172_s2 + $0x10] sm:$0x3f] }
 0x1fc   :  { %v3000_v19 = vsel %vm582_vm3, %v1243_v43, %v1254_v3  ;;  %v3003_v45 = vsel %vm582_vm3, %v1244_v36, %v1257_v8  ;;  %v1268_v54 = vmul.f32 %v1263_v5, %v2640_v39  ;;  %v1269_v46 = vmul.f32 %v1263_v5, %v2623_v38  ;;  %4401 = sst [smem:[#allocation88_spill]] %s3013_s6 }
 0x1fd   :  { %4398 = vst [vmem:[#allocation85_spill] sm:$0xff] %v3000_v19  ;;  %4399 = vst [vmem:[#allocation86_spill] sm:$0xff] %v3003_v45  ;;  %v1270_v21 = vmul.f32 %v1263_v5, %v2638_v41  ;;  %v1271_v63 = vmul.f32 %v1263_v5, %v2621_v24  ;;  %v1280_v17 = vsel %vm578_vm1, %v1266_v0, %v1264_v48  ;;  %s3035_s6 = sld [smem:[#allocation6 + $0xc]]  ;;  %v593_v24 = vlaneseq  ;;  %v569_v0 = vld [vmem:[%s4172_s2 + $0x18] sm:$0x3f] }
 0x1fe   :  { %v1281_v22 = vsel %vm580_vm2, %v1268_v54, %v1280_v17  ;;  %v1283_v57 = vsel %vm578_vm1, %v1267_v1, %v1265_v11  ;;  %4410 = sst [smem:[#allocation97_spill]] %s3039_s30  ;;  %v4505_v8 = vstv %s4496_s1 }
 0x1ff   :  { %4402 = sst [smem:[#allocation89_spill]] %s3018_s7  ;;  %v3025_v13 = vsel %vm582_vm3, %v1270_v21, %v1281_v22  ;;  %v1284_v38 = vsel %vm580_vm2, %v1269_v46, %v1283_v57  ;;  %v3081_v39 = vshrl.u32 %v593_v24, 7  ;;  %v3107_v43 = vand.u32 127, %v593_v24 }
 0x200   :  { %4404 = vst [vmem:[#allocation91_spill] sm:$0xff] %v3025_v13  ;;  %v3031_v41 = vsel %vm582_vm3, %v1271_v63, %v1284_v38  ;;  %s3037_s7 = sld [smem:[#allocation6 + $0x10]] }
 0x201   :  { %4406 = vst [vmem:[#allocation93_spill] sm:$0xff] %v3031_v41  ;;  %4413 = sst [smem:[#allocation100_spill]] %s3045_s5  ;;  %4430 = vst [vmem:[#allocation117_spill] sm:$0xff] %v3081_v39  ;;  %v622_v56 = vsub.s32 7, %v3081_v39  ;;  %v3103_v4 = vsub.s32 0, %v3081_v39  ;;  %v3125_v11 = vsub.s32 1, %v3081_v39  ;;  %v4517_v41 = vstv %s4499_s8 }
 0x202   :  { %s3047_s28 = sld [smem:[#allocation6 + $0x6]]  ;;  %v697_v21 = vsub.s32 3, %v3081_v39  ;;  %v3142_v57 = vsub.s32 4, %v3081_v39  ;;  %vm595_vm4 = vcmp.lt.s32.totalorder %v3107_v43, 3  ;;  %vm636_vm5 = vcmp.lt.s32.totalorder %v3107_v43, 2 }
 0x203   :  { %4408 = sst [smem:[#allocation95_spill]] %s3035_s6  ;;  %4435 = vst [vmem:[#allocation122_spill] sm:$0xff] %v3103_v4  ;;  %v3117_v3 = vrot.slane %v566_v15, %v622_v56  ;;  %4438 = vst [vmem:[#allocation125_spill] sm:$0xff] %v3125_v11  ;;  %v3129_v1 = vrot.slane %v567_v18, %v622_v56  ;;  %v3137_v63 = vrot.slane %v568_v34, %v3103_v4  ;;  %v3170_v18 = vsub.s32 5, %v3081_v39 }
 0x204   :  { %s3051_s27 = sld [smem:[#allocation6 + $0x20]]  ;;  %4440 = vst [vmem:[#allocation127_spill] sm:$0xff] %v3142_v57  ;;  %v3147_v38 = vrot.slane %v569_v0, %v3103_v4  ;;  %v3156_v17 = vrot.slane %v568_v34, %v3125_v11  ;;  %v3163_v24 = vrot.slane %v569_v0, %v3125_v11  ;;  %v3165_v15 = vrot.slane %v568_v34, %v697_v21 }
 0x205   :  { %4416 = sst [smem:[#allocation103_spill]] %s3053_s26  ;;  %v3167_v56 = vrot.slane %v569_v0, %v697_v21  ;;  %4448 = vst [vmem:[#allocation130_spill] sm:$0xff] %v3170_v18  ;;  %v3176_v46 = vrot.slane %v568_v34, %v3142_v57  ;;  %v3179_v22 = vrot.slane %v569_v0, %v3142_v57  ;;  %v3198_v48 = vrot.slane %v568_v34, %v3170_v18 }
 0x206   :  { %4409 = sst [smem:[#allocation96_spill]] %s3037_s7  ;;  %v3201_v6 = vrot.slane %v569_v0, %v3170_v18  ;;  %vm661_vm6 = vcmp.lt.s32.totalorder %v3107_v43, 1  ;;  %vm686_vm7 = vcmp.lt.s32.totalorder %v3107_v43, 127  ;;  %vm711_vm8 = vcmp.lt.s32.totalorder %v3107_v43, 126 }
 0x207   :  { %s3057_s6 = sld [smem:[#allocation6 + $0x40]]  ;;  %v4502_v18 = vstv %s4495_s21  ;;  %v4510_v57 = vstv %s4497_s19  ;;  %v4519_v13 = vmov %v4517_v41  ;;  %vm736_vm9 = vcmp.lt.s32.totalorder %v3107_v43, 125 }
 0x208   :  { %4414 = sst [smem:[#allocation101_spill]] %s3047_s28  ;;  %v4511_v4 = vmov %v4510_v57  ;;  %vm1036_vm10 = vcmp.lt.s32.totalorder %v3107_v43, 32  ;;  %vm889_vm11 = vcmp.lt.s32.totalorder %v3107_v43, 48  ;;  %vm1183_vm12 = vcmp.lt.s32.totalorder %v3107_v43, 16 }
 0x209   :  { %s3059_s7 = sld [smem:[#allocation6 + $0x37]]  ;;  %vm1460_vm13 = vcmp.lt.s32.totalorder %v3107_v43, 112  ;;  %vm1607_vm14 = vcmp.lt.s32.totalorder %v3107_v43, 96  ;;  %vm1754_vm15 = vcmp.lt.s32.totalorder %v3107_v43, 80 }
 0x20a   :  { %s3061_s30 = sld [smem:[#allocation6 + $0x21]] }
 0x20b   :  { %s3063_s29 = sld [smem:[#allocation6 + $0xd]] }
 0x20c   :  { %s3067_s5 = sld [smem:[#allocation6 + $0x25]] }
 0x20d   :  { %4418 = sst [smem:[#allocation105_spill]] %s3057_s6 }
 0x20e   :  { %s3069_s28 = sld [smem:[#allocation6 + $0x27]] }
 0x20f   :  { %4419 = sst [smem:[#allocation106_spill]] %s3059_s7 }
 0x210   :  { %4420 = sst [smem:[#allocation107_spill]] %s3061_s30 }
 0x211   :  { %4421 = sst [smem:[#allocation108_spill]] %s3063_s29 }
 0x212   :  { %4423 = sst [smem:[#allocation110_spill]] %s3067_s5 }
 0x213   :  { %s3073_s26 = sld [smem:[#allocation6 + $0x3d]] }
 0x214   :  { %4424 = sst [smem:[#allocation111_spill]] %s3069_s28 }
 0x215   :  { %s3077_s6 = sld [smem:[#allocation6 + $0x4e]] }
 0x216   :  { %s3079_s30 = sld [smem:[#allocation6 + $0x28]] }
 0x217   :  { %s3085_s5 = sld [smem:[#allocation6 + $0x14]] }
 0x218   :  { %s3087_s28 = sld [smem:[#allocation6 + $0x4f]] }
 0x219   :  { %4426 = sst [smem:[#allocation113_spill]] %s3073_s26 }
 0x21a   :  { %s3134_s26 = sld [smem:[#allocation6 + $0x56]] }
 0x21b   :  { %4428 = sst [smem:[#allocation115_spill]] %s3077_s6 }
 0x21c   :  { %4429 = sst [smem:[#allocation116_spill]] %s3079_s30 }
 0x21d   :  { %4432 = sst [smem:[#allocation119_spill]] %s3085_s5 }
 0x21e   :  { %4433 = sst [smem:[#allocation120_spill]] %s3087_s28 }
 0x21f   :  { %s3097_s30 = sld [smem:[#allocation6 + $0x44]] }
 0x220   :  { %4439 = sst [smem:[#allocation126_spill]] %s3134_s26 }
 0x221   :  { %s3152_s6 = sld [smem:[#allocation6 + $0x51]] }
 0x222   :  { %4450 = sst [smem:[#allocation131_spill]] %s3172_s20 }
 0x223   :  { %s4460_s20 = sld [smem:[#allocation96_spill]] }
 0x224   :  { %4463 = sst [smem:[#allocation96_spill]] %s3195_s22 }
 0x225   :  { %s3205_s18 = sld [smem:[#allocation6 + $0x58]] }
 0x226   :  { %s4468_s17 = sld [smem:[#allocation103_spill]] }
 0x227   :  { %4470 = sst [smem:[#allocation103_spill]] %s3211_s16 }
 0x228   :  { %s4474_s22 = sld [smem:[#allocation107_spill]] }
 0x229   :  { %4475 = sst [smem:[#allocation107_spill]] %s3218_s14  ;;  %v4578_v53 = vstv %s4460_s20 }
 0x22a   :  { %s4476_s13 = sld [smem:[#allocation110_spill]] }
 0x22b   :  { %4467 = sst [smem:[#allocation134_spill]] %s3205_s18 }
 0x22c   :  { %s3224_s16 = sld [smem:[#allocation6 + $0x30]] }
 0x22d   :  { %s4481_s18 = sld [smem:[#allocation111_spill]] }
 0x22e   :  { %s4483_s25 = sld [smem:[#allocation116_spill]] }
 0x22f   :  { %s3230_s3 = sld [smem:[#allocation6 + $0x48]] }
 0x230   :  { %s3236_s2 = sld [smem:[#allocation6 + $0x5f]] }
 0x231   :  { %s4485_s29 = sld [smem:[#allocation121_spill]] }
 0x232   :  { %4480 = sst [smem:[#allocation110_spill]] %s3224_s16 }
 0x233   :  { %s4486_s7 = sld [smem:[#allocation123_spill]] }
 0x234   :  { %v592_v34 = vpop.permute.xlu1 %591  ;;  %v590_v0 = vpop.permute.xlu0 %589  ;;  %s3242_s0 = sld [smem:[#allocation6 + $0x60]] }
 0x235   :  { %v596_v40 = vsel %vm595_vm4, %v590_v0, %v592_v34  ;;  %v597_v54 = vsel %vm595_vm4, %v592_v34, %v590_v0  ;;  %s4488_s9 = sld [smem:[#allocation131_spill]]  ;;  %v4507_v34 = vmov %v4505_v8 }
 0x236   :  { %s4490_s5 = sld [smem:[#allocation134_spill]]  ;;  %v628_v47 = vmul.f32 %v3117_v3, %v597_v54  ;;  %v629_v23 = vmul.f32 %v3129_v1, %v596_v40 }
 0x237   :  { %s4492_s23 = sld [smem:[#allocation96_spill]] }
 0x238   :  { %v635_v49 = vpop.permute.xlu1 %634  ;;  %v633_v36 = vpop.permute.xlu0 %632  ;;  %s4493_s12 = sld [smem:[#allocation103_spill]]  ;;  %v3301_v29 = vmul.f32 %v4505_v8, %v628_v47  ;;  %v3305_v0 = vmul.f32 %v4507_v34, %v629_v23  ;;  %v3315_v11 = vmul.f32 %v4511_v4, %v629_v23  ;;  %v3331_v45 = vmul.f32 %v4519_v13, %v629_v23 }
 0x239   :  { %s4494_s28 = sld [smem:[#allocation52_spill]]  ;;  %v637_v40 = vsel %vm636_vm5, %v633_v36, %v635_v49  ;;  %v638_v58 = vsel %vm636_vm5, %v635_v49, %v633_v36  ;;  %v3293_v49 = vmul.f32 %v4502_v18, %v628_v47  ;;  %v4503_v36 = vmov %v4502_v18 }
 0x23a   :  { %s4498_s26 = sld [smem:[#allocation57_spill]]  ;;  %v3297_v35 = vmul.f32 %v4503_v36, %v629_v23  ;;  %4506 = vst [vmem:[#allocation135_spill] sm:$0xff] %v3301_v29  ;;  %v3311_v36 = vmul.f32 %v4510_v57, %v628_v47  ;;  %4520 = vst [vmem:[#allocation139_spill] sm:$0xff] %v3331_v45 }
 0x23b   :  { %s4504_s14 = sld [smem:[#allocation60_spill]] }
 0x23c   :  { %v660_v5 = vpop.permute.xlu1 %659  ;;  %v658_v21 = vpop.permute.xlu0 %657  ;;  %s4509_s16 = sld [smem:[#allocation63_spill]] }
 0x23d   :  { %s4515_s1 = sld [smem:[#allocation65_spill]]  ;;  %v662_v57 = vsel %vm661_vm6, %v658_v21, %v660_v5  ;;  %v663_v4 = vsel %vm661_vm6, %v660_v5, %v658_v21 }
 0x23e   :  { %s4521_s19 = sld [smem:[#allocation66_spill]] }
 0x23f   :  { %v4500_v51 = vstv %s4494_s28  ;;  %s4508_s28 = sld [smem:[#allocation62_spill]] }
 0x240   :  { %v3285_v54 = vmul.f32 %v4500_v51, %v628_v47  ;;  %v4501_v20 = vmov %v4500_v51  ;;  %v653_v51 = vmul.f32 %v3137_v63, %v638_v58  ;;  %v685_v2 = vpop.permute.xlu1 %684  ;;  %v683_v18 = vpop.permute.xlu0 %682  ;;  %v4512_v8 = vstv %s4498_s26  ;;  %s4526_s8 = sld [smem:[#allocation67_spill]] }
 0x241   :  { %v3289_v7 = vmul.f32 %v4501_v20, %v629_v23  ;;  %v654_v20 = vmul.f32 %v3147_v38, %v637_v40  ;;  %v3319_v39 = vmul.f32 %v4512_v8, %v628_v47  ;;  %v4514_v34 = vmov %v4512_v8  ;;  %s4535_s21 = sld [smem:[#allocation94_spill]] }
 0x242   :  { %v3323_v58 = vmul.f32 %v4514_v34, %v629_v23  ;;  %v3327_v40 = vmul.f32 %v4517_v41, %v628_v47  ;;  %v4522_v8 = vstv %s4504_s14  ;;  %v687_v41 = vsel %vm686_vm7, %v683_v18, %v685_v2  ;;  %s4531_s14 = sld [smem:[#allocation69_spill]] }
 0x243   :  { %4513 = vst [vmem:[#allocation136_spill] sm:$0xff] %v3319_v39  ;;  %v3339_v19 = vmul.f32 %v4522_v8, %v628_v47  ;;  %v4524_v34 = vmov %v4522_v8  ;;  %v688_v13 = vsel %vm686_vm7, %v685_v2, %v683_v18  ;;  %v4529_v21 = vstv %s4509_s16  ;;  %s4537_s26 = sld [smem:[#allocation70_spill]] }
 0x244   :  { %4516 = vst [vmem:[#allocation137_spill] sm:$0xff] %v3323_v58  ;;  %4518 = vst [vmem:[#allocation138_spill] sm:$0xff] %v3327_v40  ;;  %v3343_v59 = vmul.f32 %v4524_v34, %v629_v23  ;;  %v3359_v47 = vmul.f32 %v4529_v21, %v653_v51  ;;  %v4530_v8 = vmov %v4529_v21  ;;  %v710_v34 = vpop.permute.xlu1 %709  ;;  %v708_v62 = vpop.permute.xlu0 %707  ;;  %v3377_v18 = vmul.f32 %v3163_v24, %v662_v57  ;;  %s4541_s16 = sld [smem:[#allocation72_spill]] }
 0x245   :  { %4523 = vst [vmem:[#allocation140_spill] sm:$0xff] %v3339_v19  ;;  %v4527_v42 = vstv %s4508_s28  ;;  %v3363_v23 = vmul.f32 %v4530_v8, %v654_v20  ;;  %v4532_v19 = vstv %s4515_s1  ;;  %v4538_v21 = vstv %s4521_s19  ;;  %s4547_s28 = sld [smem:[#allocation83_spill]] }
 0x246   :  { %4525 = vst [vmem:[#allocation141_spill] sm:$0xff] %v3343_v59  ;;  %v3351_v28 = vmul.f32 %v4527_v42, %v653_v51  ;;  %v4528_v9 = vmov %v4527_v42  ;;  %v3367_v12 = vmul.f32 %v4532_v19, %v653_v51  ;;  %v4534_v2 = vmov %v4532_v19  ;;  %s4549_s1 = sld [smem:[#allocation89_spill]] }
 0x247   :  { %v3355_v5 = vmul.f32 %v4528_v9, %v654_v20  ;;  %v3371_v42 = vmul.f32 %v4534_v2, %v654_v20  ;;  %v3374_v9 = vmul.f32 %v3156_v17, %v663_v4  ;;  %v3381_v8 = vmul.f32 %v4538_v21, %v653_v51  ;;  %s4551_s19 = sld [smem:[#allocation90_spill]] }
 0x248   :  { %4533 = vst [vmem:[#allocation142_spill] sm:$0xff] %v3367_v12  ;;  %v4540_v14 = vmov %v4538_v21  ;;  %v3388_v2 = vmul.f32 %v3165_v15, %v687_v41  ;;  %v4544_v4 = vstv %s4526_s8  ;;  %v712_v21 = vsel %vm711_vm8, %v708_v62, %v710_v34  ;;  %s4560_s8 = sld [smem:[#allocation98_spill]] }
 0x249   :  { %4536 = vst [vmem:[#allocation143_spill] sm:$0xff] %v3371_v42  ;;  %4539 = vst [vmem:[#allocation144_spill] sm:$0xff] %v3381_v8  ;;  %v3385_v19 = vmul.f32 %v4540_v14, %v654_v20  ;;  %v3391_v42 = vmul.f32 %v3167_v56, %v688_v13  ;;  %v3395_v12 = vmul.f32 %v4544_v4, %v653_v51  ;;  %v4546_v57 = vmov %v4544_v4  ;;  %s4590_s20 = sld [smem:[#allocation77_spill]] }
 0x24a   :  { %v3399_v59 = vmul.f32 %v4546_v57, %v654_v20  ;;  %v713_v14 = vsel %vm711_vm8, %v710_v34, %v708_v62  ;;  %v4550_v41 = vstv %s4531_s14  ;;  %v640_v57 = vpop.permute.xlu0 %639  ;;  %v4555_v30 = vstv %s4535_s21  ;;  %s4567_s14 = sld [smem:[#allocation99_spill]] }
 0x24b   :  { %4542 = vst [vmem:[#allocation145_spill] sm:$0xff] %v3385_v19  ;;  %4543 = vst [vmem:[#allocation146_spill] sm:$0xff] %v3391_v42  ;;  %v3407_v37 = vmul.f32 %v4550_v41, %v653_v51  ;;  %v4553_v13 = vmov %v4550_v41  ;;  %v3415_v40 = vmul.f32 %v4555_v30, %v654_v20  ;;  %v4557_v31 = vmov %v4555_v30  ;;  %s4572_s21 = sld [smem:[#allocation84_spill]] }
 0x24c   :  { %4545 = vst [vmem:[#allocation147_spill] sm:$0xff] %v3395_v12  ;;  %4548 = vst [vmem:[#allocation148_spill] sm:$0xff] %v3399_v59  ;;  %v3411_v4 = vmul.f32 %v4553_v13, %v654_v20  ;;  %v615_v12 = vpop.permute.xlu1 %614  ;;  %v3419_v55 = vmul.f32 %v4557_v31, %v653_v51  ;;  %v4559_v62 = vstv %s4537_s26  ;;  %v3442_v31 = vmul.f32 %v3176_v46, %v712_v21  ;;  %s4575_s26 = sld [smem:[#allocation95_spill]] }
 0x24d   :  { %4552 = vst [vmem:[#allocation149_spill] sm:$0xff] %v3407_v37  ;;  %4556 = vst [vmem:[#allocation151_spill] sm:$0xff] %v3415_v40  ;;  %v3424_v34 = vmul.f32 %v4559_v62, %v3374_v9  ;;  %v4562_v41 = vmov %v4559_v62  ;;  %v4564_v37 = vstv %s4541_s16  ;;  %v3445_v51 = vmul.f32 %v3179_v22, %v713_v14  ;;  %s4577_s16 = sld [smem:[#allocation102_spill]] }
 0x24e   :  { %4554 = vst [vmem:[#allocation150_spill] sm:$0xff] %v3411_v4  ;;  %4558 = vst [vmem:[#allocation152_spill] sm:$0xff] %v3419_v55  ;;  %v3429_v13 = vmul.f32 %v4562_v41, %v3377_v18  ;;  %v3434_v4 = vmul.f32 %v4564_v37, %v3377_v18  ;;  %v4565_v30 = vmov %v4564_v37  ;;  %v4568_v62 = vstv %s4547_s28  ;;  %s4581_s28 = sld [smem:[#allocation73_spill]] }
 0x24f   :  { %4561 = vst [vmem:[#allocation153_spill] sm:$0xff] %v3424_v34  ;;  %v3439_v20 = vmul.f32 %v4565_v30, %v3374_v9  ;;  %4566 = vst [vmem:[#allocation155_spill] sm:$0xff] %v3442_v31  ;;  %v3450_v41 = vmul.f32 %v4568_v62, %v3391_v42  ;;  %v4570_v34 = vstv %s4549_s1  ;;  %v4571_v21 = vstv %s4551_s19  ;;  %s4603_s1 = sld [smem:[#allocation75_spill]] }
 0x250   :  { %4563 = vst [vmem:[#allocation154_spill] sm:$0xff] %v3429_v13  ;;  %v4569_v13 = vmov %v4568_v62  ;;  %v3460_v30 = vmul.f32 %v4570_v34, %v3377_v18  ;;  %v3465_v59 = vmul.f32 %v4571_v21, %v3391_v42  ;;  %v4573_v14 = vmov %v4570_v34  ;;  %v665_v34 = vpop.permute.xlu0 %664  ;;  %s4629_s19 = sld [smem:[#allocation79_spill]] }
 0x251   :  { %v3455_v37 = vmul.f32 %v4569_v13, %v3388_v2  ;;  %v3470_v10 = vmul.f32 %v4573_v14, %v3374_v9  ;;  %v4574_v62 = vmov %v4571_v21  ;;  %v617_v13 = vpop.permute.xlu1 %616  ;;  %v3480_v52 = vmul.f32 %v4578_v53, %v3377_v18 }
 0x252   :  { %v3475_v45 = vmul.f32 %v4574_v62, %v3388_v2  ;;  %v4580_v21 = vstv %s4560_s8  ;;  %v4583_v14 = vmov %v4578_v53  ;;  %v618_v19 = vsel %vm595_vm4, %v615_v12, %v617_v13  ;;  %s4636_s8 = sld [smem:[#allocation100_spill]] }
 0x253   :  { %4579 = vst [vmem:[#allocation157_spill] sm:$0xff] %v3480_v52  ;;  %v3485_v8 = vmul.f32 %v4580_v21, %v3391_v42  ;;  %v3490_v39 = vmul.f32 %v4583_v14, %v3374_v9  ;;  %v4585_v62 = vmov %v4580_v21  ;;  %v619_v53 = vsel %vm595_vm4, %v617_v13, %v615_v12 }
 0x254   :  { %4576 = vst [vmem:[#allocation156_spill] sm:$0xff] %v3475_v45  ;;  %v3495_v60 = vmul.f32 %v4585_v62, %v3388_v2  ;;  %v4587_v16 = vstv %s4567_s14  ;;  %v3512_v62 = vmul.f32 %v3117_v3, %v619_v53  ;;  %v4592_v12 = vstv %s4572_s21  ;;  %s4654_s21 = sld [smem:[#allocation113_spill]] }
 0x255   :  { %4582 = vst [vmem:[#allocation158_spill] sm:$0xff] %v3485_v8  ;;  %4584 = vst [vmem:[#allocation159_spill] sm:$0xff] %v3490_v39  ;;  %v3504_v21 = vmul.f32 %v4587_v16, %v3377_v18  ;;  %v4589_v8 = vstv %s3051_s27  ;;  %v3520_v13 = vmul.f32 %v4592_v12, %v3445_v51  ;;  %v4593_v16 = vmov %v4592_v12  ;;  %v642_v45 = vpop.permute.xlu1 %641 }
 0x256   :  { %4586 = vst [vmem:[#allocation160_spill] sm:$0xff] %v3495_v60  ;;  %v3509_v14 = vmul.f32 %v4589_v8, %v3391_v42  ;;  %v3515_v60 = vmul.f32 %v3129_v1, %v618_v19  ;;  %v4594_v8 = vstv %s4575_s26  ;;  %v4598_v1 = vstv %s4577_s16  ;;  %s4655_s26 = sld [smem:[#allocation80_spill]] }
 0x257   :  { %4588 = vst [vmem:[#allocation161_spill] sm:$0xff] %v3504_v21  ;;  %v3525_v21 = vmul.f32 %v4593_v16, %v3442_v31  ;;  %v4596_v3 = vmov %v4594_v8  ;;  %v3540_v19 = vmul.f32 %v4598_v1, %v3445_v51  ;;  %v4600_v12 = vmov %v4598_v1  ;;  %s4656_s16 = sld [smem:[#allocation108_spill]] }
 0x258   :  { %4591 = vst [vmem:[#allocation162_spill] sm:$0xff] %v3509_v14  ;;  %v3530_v14 = vmul.f32 %v4594_v8, %v3445_v51  ;;  %v3535_v53 = vmul.f32 %v4596_v3, %v3442_v31  ;;  %v3545_v16 = vmul.f32 %v4600_v12, %v3442_v31  ;;  %v4602_v39 = vstv %s4581_s28  ;;  %s4658_s28 = sld [smem:[#allocation105_spill]] }
 0x259   :  { %4599 = vst [vmem:[#allocation165_spill] sm:$0xff] %v3540_v19  ;;  %v765_v8 = vmul.f32 %v4602_v39, %v3512_v62  ;;  %v4604_v58 = vmov %v4602_v39  ;;  %v4605_v3 = vstv %s4474_s22  ;;  %v4607_v19 = vstv %s4567_s14  ;;  %s4626_s22 = sld [smem:[#allocation76_spill]] }
 0x25a   :  { %4595 = vst [vmem:[#allocation163_spill] sm:$0xff] %v3530_v14  ;;  %4597 = vst [vmem:[#allocation164_spill] sm:$0xff] %v3535_v53  ;;  %v766_v55 = vmul.f32 %v4604_v58, %v3515_v60  ;;  %v3557_v1 = vmul.f32 %v4605_v3, %v3445_v51  ;;  %v3562_v53 = vmul.f32 %v4607_v19, %v3374_v9  ;;  %v4609_v12 = vstv %s4590_s20  ;;  %s4653_s14 = sld [smem:[#allocation106_spill]] }
 0x25b   :  { %4601 = vst [vmem:[#allocation166_spill] sm:$0xff] %v3545_v16  ;;  %v1206_v16 = vmul.f32 %v4609_v12, %v3512_v62  ;;  %v4610_v39 = vmov %v4609_v12  ;;  %v4611_v58 = vstv %s3051_s27  ;;  %v4613_v50 = vmov %v4605_v3  ;;  %v733_v3 = vpop.permute.xlu0 %732  ;;  %s4623_s27 = sld [smem:[#allocation88_spill]] }
 0x25c   :  { %4606 = vst [vmem:[#allocation167_spill] sm:$0xff] %v3557_v1  ;;  %4608 = vst [vmem:[#allocation168_spill] sm:$0xff] %v3562_v53  ;;  %v1207_v52 = vmul.f32 %v4610_v39, %v3515_v60  ;;  %v3573_v29 = vmul.f32 %v4611_v58, %v3388_v2  ;;  %v3578_v27 = vmul.f32 %v4613_v50, %v3442_v31  ;;  %v4615_v1 = vstv %s4476_s13  ;;  %s4624_s13 = sld [smem:[#allocation97_spill]] }
 0x25d   :  { %v3583_v14 = vmul.f32 %v4615_v1, %v3377_v18  ;;  %v4616_v19 = vstv %s4481_s18  ;;  %v4618_v12 = vstv %s4483_s25  ;;  %v4619_v58 = vmov %v4615_v1  ;;  %s4625_s18 = sld [smem:[#allocation92_spill]] }
 0x25e   :  { %4612 = vst [vmem:[#allocation169_spill] sm:$0xff] %v3573_v29  ;;  %4614 = vst [vmem:[#allocation170_spill] sm:$0xff] %v3578_v27  ;;  %v3588_v53 = vmul.f32 %v4616_v19, %v3391_v42  ;;  %v3593_v39 = vmul.f32 %v4618_v12, %v3445_v51  ;;  %v3598_v29 = vmul.f32 %v4619_v58, %v3374_v9  ;;  %v4620_v50 = vstv %s4603_s1  ;;  %s3779_s20 = sld [smem:[#allocation6 + $0x61]] }
 0x25f   :  { %v913_v27 = vmul.f32 %v4620_v50, %v3515_v60  ;;  %v3604_v40 = vadd.f32 %v1206_v16, %v3311_v36  ;;  %v3607_v1 = vadd.f32 %v1207_v52, %v3315_v11  ;;  %v643_v12 = vsel %vm636_vm5, %v640_v57, %v642_v45  ;;  %v667_v50 = vpop.permute.xlu1 %666 }
 0x260   :  { %4617 = vst [vmem:[#allocation171_spill] sm:$0xff] %v3588_v53  ;;  %v3612_v53 = vmul.f32 %v4616_v19, %v3388_v2  ;;  %v644_v58 = vsel %vm636_vm5, %v642_v45, %v640_v57  ;;  %v768_v36 = vadd.f32 %v766_v55, %v3289_v7  ;;  %v767_v16 = vadd.f32 %v765_v8, %v3285_v54 }
 0x261   :  { %4621 = vst [vmem:[#allocation172_spill] sm:$0xff] %v3604_v40  ;;  %4622 = vst [vmem:[#allocation173_spill] sm:$0xff] %v3607_v1  ;;  %v3621_v52 = vmul.f32 %v3137_v63, %v644_v58  ;;  %v3624_v11 = vmul.f32 %v3147_v38, %v643_v12  ;;  %v668_v19 = vsel %vm661_vm6, %v665_v34, %v667_v50  ;;  %v4627_v54 = vstv %s4603_s1  ;;  %s4662_s1 = sld [smem:[#allocation114_spill]] }
 0x262   :  { %v669_v45 = vsel %vm661_vm6, %v667_v50, %v665_v34  ;;  %v3634_v55 = vmul.f32 %v3163_v24, %v668_v19  ;;  %v775_v63 = vadd.f32 %v3355_v5, %v768_v36  ;;  %v774_v38 = vadd.f32 %v3351_v28, %v767_v16  ;;  %v690_v50 = vpop.permute.xlu0 %689 }
 0x263   :  { %v3631_v7 = vmul.f32 %v3156_v17, %v669_v45  ;;  %v912_v57 = vmul.f32 %v4627_v54, %v3512_v62  ;;  %v4628_v8 = vstv %s4623_s27  ;;  %v4631_v24 = vstv %s4483_s25  ;;  %v735_v5 = vpop.permute.xlu1 %734  ;;  %s4647_s25 = sld [smem:[#allocation104_spill]] }
 0x264   :  { %v778_v34 = vmul.f32 %v4628_v8, %v3624_v11  ;;  %v4630_v17 = vmov %v4628_v8  ;;  %v3650_v58 = vmul.f32 %v4631_v24, %v3442_v31  ;;  %v915_v36 = vadd.f32 %v913_v27, %v3297_v35  ;;  %s4664_s27 = sld [smem:[#allocation109_spill]] }
 0x265   :  { %v777_v12 = vmul.f32 %v4630_v17, %v3621_v52  ;;  %v4632_v28 = vstv %s4624_s13  ;;  %v4633_v19 = vstv %s4484_s24  ;;  %v4634_v54 = vstv %s4485_s29 }
 0x266   :  { %v925_v16 = vmul.f32 %v4632_v28, %v3624_v11  ;;  %v3659_v45 = vmul.f32 %v4633_v19, %v3377_v18  ;;  %v3664_v8 = vmul.f32 %v4634_v54, %v3391_v42  ;;  %v780_v17 = vadd.f32 %v778_v34, %v775_v63 }
 0x267   :  { %v4637_v24 = vstv %s4625_s18  ;;  %v779_v1 = vadd.f32 %v777_v12, %v774_v38  ;;  %v4639_v28 = vstv %s4626_s22  ;;  %v4641_v54 = vstv %s4629_s19  ;;  %s4681_s18 = sld [smem:[#allocation115_spill]] }
 0x268   :  { %4635 = vst [vmem:[#allocation174_spill] sm:$0xff] %v3664_v8  ;;  %v790_v31 = vmul.f32 %v4637_v24, %v3634_v55  ;;  %v4638_v35 = vmov %v4637_v24  ;;  %v3675_v40 = vmul.f32 %v4639_v28, %v3512_v62  ;;  %v4640_v18 = vmov %v4639_v28  ;;  %v692_v28 = vpop.permute.xlu1 %691  ;;  %s4687_s22 = sld [smem:[#allocation120_spill]] }
 0x269   :  { %v789_v27 = vmul.f32 %v4638_v35, %v3631_v7  ;;  %v1060_v19 = vmul.f32 %v4640_v18, %v3515_v60  ;;  %v3683_v42 = vmul.f32 %v4641_v54, %v3512_v62  ;;  %v922_v63 = vadd.f32 %v3363_v23, %v915_v36 }
 0x26a   :  { %v737_v34 = vsel %vm736_vm9, %v733_v3, %v735_v5  ;;  %v787_v38 = vadd.f32 %v3434_v4, %v780_v17  ;;  %v786_v12 = vadd.f32 %v3439_v20, %v779_v1  ;;  %v914_v24 = vadd.f32 %v912_v57, %v3293_v49  ;;  %v715_v57 = vpop.permute.xlu0 %714 }
 0x26b   :  { %v738_v35 = vsel %vm736_vm9, %v735_v5, %v733_v3  ;;  %v927_v18 = vadd.f32 %v925_v16, %v922_v63  ;;  %v4642_v54 = vstv %s4636_s8  ;;  %v4643_v23 = vstv %s4624_s13  ;;  %s4670_s13 = sld [smem:[#allocation82_spill]] }
 0x26c   :  { %v937_v8 = vmul.f32 %v4642_v54, %v3634_v55  ;;  %v924_v36 = vmul.f32 %v4643_v23, %v3621_v52  ;;  %v693_v4 = vsel %vm686_vm7, %v690_v50, %v692_v28  ;;  %v694_v20 = vsel %vm686_vm7, %v692_v28, %v690_v50 }
 0x26d   :  { %v792_v49 = vadd.f32 %v790_v31, %v787_v38  ;;  %v791_v1 = vadd.f32 %v789_v27, %v786_v12  ;;  %v3704_v3 = vmul.f32 %v3165_v15, %v693_v4  ;;  %v3707_v5 = vmul.f32 %v3167_v56, %v694_v20  ;;  %v717_v56 = vpop.permute.xlu1 %716 }
 0x26e   :  { %v934_v16 = vadd.f32 %v3460_v30, %v927_v18  ;;  %v921_v17 = vadd.f32 %v3359_v47, %v914_v24  ;;  %v4644_v63 = vstv %s4629_s19  ;;  %v3717_v23 = vmul.f32 %v3198_v48, %v737_v34  ;;  %s4693_s19 = sld [smem:[#allocation119_spill]] }
 0x26f   :  { %v3714_v54 = vmul.f32 %v4644_v63, %v3515_v60  ;;  %v821_v31 = vadd.f32 %v2655_v44, %v792_v49  ;;  %v820_v50 = vadd.f32 %v2679_v33, %v791_v1  ;;  %v3722_v15 = vmul.f32 %v3201_v6, %v738_v35 }
 0x270   :  { %v4645_v30 = vstv %s4468_s17  ;;  %v939_v12 = vadd.f32 %v937_v8, %v934_v16  ;;  %v718_v44 = vsel %vm711_vm8, %v715_v57, %v717_v56  ;;  %v719_v33 = vsel %vm711_vm8, %v717_v56, %v715_v57  ;;  %s4650_s17 = sld [smem:[#allocation101_spill]] }
 0x271   :  { %v858_v47 = vmul.f32 %v4645_v30, %v3707_v5  ;;  %v4646_v27 = vmov %v4645_v30  ;;  %v848_v34 = vadd.f32 %v2665_v61, %v821_v31  ;;  %v847_v24 = vadd.f32 %v2695_v25, %v820_v50  ;;  %v740_v25 = vpop.permute.xlu0 %739 }
 0x272   :  { %v857_v38 = vmul.f32 %v4646_v27, %v3704_v3  ;;  %v3737_v35 = vmul.f32 %v3176_v46, %v718_v44  ;;  %v3740_v28 = vmul.f32 %v3179_v22, %v719_v33  ;;  %v968_v18 = vadd.f32 %v2701_v32, %v939_v12  ;;  %v742_v46 = vpop.permute.xlu1 %741  ;;  %v4663_v33 = vld [vmem:[#allocation151_spill] sm:$0xff] }
 0x273   :  { %v926_v8 = vadd.f32 %v924_v36, %v921_v17  ;;  %v855_v4 = vadd.f32 %v3450_v41, %v848_v34  ;;  %v854_v20 = vadd.f32 %v3455_v37, %v847_v24  ;;  %v4648_v49 = vstv %s4477_s11 }
 0x274   :  { %v1005_v1 = vmul.f32 %v4648_v49, %v3707_v5  ;;  %v4649_v61 = vstv %s4636_s8  ;;  %v4651_v16 = vstv %s4647_s25  ;;  %v995_v41 = vadd.f32 %v2728_v26, %v968_v18  ;;  %s2205_s8 = smov 32   ;;  %s4740_s25 = smov 16  }
 0x275   :  { %v936_v57 = vmul.f32 %v4649_v61, %v3631_v7  ;;  %v870_v22 = vmul.f32 %v4651_v16, %v3740_v28  ;;  %v4652_v32 = vmov %v4651_v16  ;;  %v1062_v37 = vadd.f32 %v1060_v19, %v3305_v0  ;;  %v4667_v61 = vld [vmem:[#allocation163_spill] sm:$0xff] }
 0x276   :  { %v869_v36 = vmul.f32 %v4652_v32, %v3737_v35  ;;  %v743_v17 = vsel %vm736_vm9, %v740_v25, %v742_v46  ;;  %v744_v63 = vsel %vm736_vm9, %v742_v46, %v740_v25  ;;  %v860_v31 = vadd.f32 %v858_v47, %v855_v4 }
 0x277   :  { %v859_v50 = vadd.f32 %v857_v38, %v854_v20  ;;  %v3764_v56 = vmul.f32 %v3198_v48, %v743_v17  ;;  %v3767_v30 = vmul.f32 %v3201_v6, %v744_v63  ;;  %v1002_v26 = vadd.f32 %v3465_v59, %v995_v41  ;;  %v4671_v41 = vld [vmem:[#allocation43_spill] sm:$0xff] }
 0x278   :  { %v933_v0 = vadd.f32 %v3470_v10, %v926_v8  ;;  %v867_v19 = vadd.f32 %v3520_v13, %v860_v31  ;;  %v4657_v27 = vstv %s4650_s17  ;;  %v4660_v6 = vstv %s4653_s14  ;;  %s4765_s17 = sld [smem:[#allocation87_spill]]  ;;  %s2206_s14 = smov 112  }
 0x279   :  { %v877_v47 = vmul.f32 %v4657_v27, %v3722_v15  ;;  %v866_v38 = vadd.f32 %v3525_v21, %v859_v50  ;;  %v4659_v48 = vmov %v4657_v27  ;;  %v882_v59 = vmul.f32 %v4660_v6, %v3767_v30 }
 0x27a   :  { %v876_v12 = vmul.f32 %v4659_v48, %v3717_v23  ;;  %v1007_v44 = vadd.f32 %v1005_v1, %v1002_v26  ;;  %v4661_v10 = vstv %s4654_s21  ;;  %v1069_v34 = vadd.f32 %v4663_v33, %v1062_v37  ;;  %v4678_v33 = vld [vmem:[#allocation157_spill] sm:$0xff] }
 0x27b   :  { %v1017_v13 = vmul.f32 %v4661_v10, %v3740_v28  ;;  %v872_v24 = vadd.f32 %v870_v22, %v867_v19  ;;  %v871_v18 = vadd.f32 %v869_v36, %v866_v38  ;;  %v4665_v21 = vmov %v4660_v6  ;;  %v4675_v38 = vld [vmem:[#allocation44_spill] sm:$0xff] }
 0x27c   :  { %v881_v8 = vmul.f32 %v4665_v21, %v3764_v56  ;;  %v938_v4 = vadd.f32 %v936_v57, %v933_v0  ;;  %v4666_v20 = vstv %s4655_s26  ;;  %v1014_v1 = vadd.f32 %v4667_v61, %v1007_v44 }
 0x27d   :  { %v3794_v49 = vmul.f32 %v4666_v20, %v3512_v62  ;;  %v4668_v25 = vstv %s4656_s16  ;;  %v4669_v16 = vstv %s4658_s28  ;;  %v879_v22 = vadd.f32 %v877_v47, %v872_v24 }
 0x27e   :  { %v1024_v46 = vmul.f32 %v4668_v25, %v3722_v15  ;;  %v1072_v32 = vmul.f32 %v4669_v16, %v3624_v11  ;;  %v878_v36 = vadd.f32 %v876_v12, %v871_v18  ;;  %v967_v37 = vadd.f32 %v4671_v41, %v938_v4  ;;  %v4676_v12 = vld [vmem:[#allocation135_spill] sm:$0xff]  ;;  %v4683_v4 = vld [vmem:[#allocation152_spill] sm:$0xff] }
 0x27f   :  { %v4672_v57 = vstv %s4477_s11  ;;  %v1019_v63 = vadd.f32 %v1017_v13, %v1014_v1  ;;  %v4673_v31 = vstv %s4662_s1  ;;  %v4674_v0 = vstv %s4664_s27  ;;  %s2204_s11 = smov 48  }
 0x280   :  { %v1004_v17 = vmul.f32 %v4672_v57, %v3704_v3  ;;  %v1029_v50 = vmul.f32 %v4673_v31, %v3767_v30  ;;  %v1074_v26 = vadd.f32 %v1072_v32, %v1069_v34  ;;  %v1084_v19 = vmul.f32 %v4674_v0, %v3634_v55  ;;  %v4688_v57 = vld [vmem:[#allocation137_spill] sm:$0xff] }
 0x281   :  { %v884_v27 = vadd.f32 %v882_v59, %v879_v22  ;;  %v883_v47 = vadd.f32 %v881_v8, %v878_v36  ;;  %v994_v48 = vadd.f32 %v4675_v38, %v967_v37  ;;  %v1061_v6 = vadd.f32 %v3675_v40, %v4676_v12  ;;  %v4682_v40 = vld [vmem:[#allocation156_spill] sm:$0xff]  ;;  %v4696_v12 = vld [vmem:[#allocation159_spill] sm:$0xff] }
 0x282   :  { %v4677_v44 = vmov %v4666_v20  ;;  %v1026_v13 = vadd.f32 %v1024_v46, %v1019_v63  ;;  %v1081_v34 = vadd.f32 %v4678_v33, %v1074_v26  ;;  %v4679_v24 = vmov %v4669_v16  ;;  %v4698_v33 = vld [vmem:[#allocation46_spill] sm:$0xff] }
 0x283   :  { %v1484_v10 = vmul.f32 %v4677_v44, %v3515_v60  ;;  %v1071_v18 = vmul.f32 %v4679_v24, %v3621_v52  ;;  %v4680_v21 = vstv %s4670_s13  ;;  %887 = vrot.lane.b32.xlu1 %v884_v27, %s2204_s11  ;;  %885 = vrot.lane.b32.xlu0 %v883_v47, %s2204_s11  ;;  %v1001_v8 = vadd.f32 %v4682_v40, %v994_v48  ;;  %v4691_v27 = vld [vmem:[#allocation45_spill] sm:$0xff]  ;;  %v4697_v44 = vld [vmem:[#allocation145_spill] sm:$0xff] }
 0x284   :  { %v3826_v59 = vmul.f32 %v4680_v21, %v3512_v62  ;;  %v1068_v20 = vadd.f32 %v4683_v4, %v1061_v6  ;;  %v1745_v61 = vstv %s3779_s20  ;;  %v4684_v1 = vmov %v4680_v21 }
 0x285   :  { %v3834_v25 = vmul.f32 %v4684_v1, %v3515_v60  ;;  %v4685_v46 = vstv %s4654_s21  ;;  %v1086_v62 = vadd.f32 %v1084_v19, %v1081_v34  ;;  %v4686_v32 = vmov %v4674_v0 }
 0x286   :  { %v1016_v16 = vmul.f32 %v4685_v46, %v3737_v35  ;;  %v1083_v22 = vmul.f32 %v4686_v32, %v3631_v7  ;;  %v1031_v36 = vadd.f32 %v1029_v50, %v1026_v13  ;;  %v1006_v41 = vadd.f32 %v1004_v17, %v1001_v8  ;;  %v4694_v17 = vld [vmem:[#allocation164_spill] sm:$0xff] }
 0x287   :  { %v1073_v37 = vadd.f32 %v1071_v18, %v1068_v20  ;;  %v1339_v63 = vadd.f32 %v3714_v54, %v4688_v57  ;;  %v4689_v31 = vstv %s4656_s16  ;;  %v4690_v60 = vstv %s4662_s1  ;;  %v4701_v8 = vld [vmem:[#allocation136_spill] sm:$0xff]  ;;  %s4805_s16 = sld [smem:[#allocation175_spill]]  ;;  %s2210_s1 = smov [#allocation7]  }
 0x288   :  { %v1023_v26 = vmul.f32 %v4689_v31, %v3717_v23  ;;  %v1028_v0 = vmul.f32 %v4690_v60, %v3764_v56  ;;  %v1115_v19 = vadd.f32 %v4691_v27, %v1086_v62  ;;  %v4692_v47 = vstv %s4681_s18  ;;  %1034 = vrot.lane.b32.xlu1 %v1031_v36, %s2205_s8  ;;  %v4703_v36 = vld [vmem:[#allocation158_spill] sm:$0xff]  ;;  %v4706_v60 = vld [vmem:[#allocation144_spill] sm:$0xff]  ;;  %s1917_s27 = sshll.u32 %s2210_s1, 4  ;;  %s1918_s27 = int_to_ptr.vmem [resolvable:$true] %s1917_s27 }
 0x289   :  { %v1349_v38 = vmul.f32 %v4692_v47, %v3624_v11  ;;  %v1013_v50 = vadd.f32 %v4694_v17, %v1006_v41  ;;  %v4695_v54 = vstv %s3092_s4  ;;  %v1080_v6 = vadd.f32 %v4696_v12, %v1073_v37  ;;  %s4716_s4 = sld [smem:[#allocation126_spill]]  ;;  %s2168_s13 = scalar_lea.vmem %s1918_s27, 4096 }
 0x28a   :  { %v1152_v48 = vmul.f32 %v4695_v54, %v3707_v5  ;;  %v1346_v13 = vadd.f32 %v4697_v44, %v1339_v63  ;;  %v1142_v34 = vadd.f32 %v4698_v33, %v1115_v19  ;;  %v4699_v24 = vstv %s3097_s30  ;;  %v4707_v19 = vld [vmem:[#allocation47_spill] sm:$0xff]  ;;  %s4723_s30 = sld [smem:[#allocation124_spill]]  ;;  %p2169_p10 = scmp.ne.s32.totalorder %s1918_s27, %s2168_s13 }
 0x28b   :  { %v1164_v18 = vmul.f32 %v4699_v24, %v3740_v28  ;;  %v4700_v21 = vstv %s4687_s22  ;;  %v1338_v4 = vadd.f32 %v3683_v42, %v4701_v8  ;;  %v1018_v20 = vadd.f32 %v1016_v16, %v1013_v50  ;;  %p2173_p11 = scmp.lt.s32.totalorder %s1918_s27, %s1918_s27  ;;  %p2174_p12 = scmp.lt.s32.totalorder %s2168_s13, %s2168_s13 }
 0x28c   :  { %v1361_v40 = vmul.f32 %v4700_v21, %v3634_v55  ;;  %v1085_v1 = vadd.f32 %v1083_v22, %v1080_v6  ;;  %v1351_v46 = vadd.f32 %v1349_v38, %v1346_v13  ;;  %v4702_v62 = vmov %v4692_v47  ;;  %v4709_v38 = vld [vmem:[#allocation161_spill] sm:$0xff] }
 0x28d   :  { %v1348_v32 = vmul.f32 %v4702_v62, %v3621_v52  ;;  %v1149_v41 = vadd.f32 %v4703_v36, %v1142_v34  ;;  %v4704_v37 = vstv %s4693_s19  ;;  %v4705_v63 = vstv %s4486_s7  ;;  %s4728_s7 = sld [smem:[#allocation133_spill]]  ;;  %p2175_p13 = por %p2174_p12, %p2173_p11 }
 0x28e   :  { %v1171_v57 = vmul.f32 %v4704_v37, %v3722_v15  ;;  %v1176_v31 = vmul.f32 %v4705_v63, %v3767_v30  ;;  %v1345_v27 = vadd.f32 %v4706_v60, %v1338_v4  ;;  %v1025_v42 = vadd.f32 %v1023_v26, %v1018_v20  ;;  %v4712_v26 = vld [vmem:[#allocation48_spill] sm:$0xff]  ;;  %v4722_v60 = vld [vmem:[#allocation148_spill] sm:$0xff] }
 0x28f   :  { %v1114_v16 = vadd.f32 %v4707_v19, %v1085_v1  ;;  %v4708_v22 = vmov %v4695_v54  ;;  %v1358_v17 = vadd.f32 %v4709_v38, %v1351_v46  ;;  %v1154_v50 = vadd.f32 %v1152_v48, %v1149_v41  ;;  %v4714_v4 = vld [vmem:[#allocation165_spill] sm:$0xff]  ;;  %v4717_v46 = vld [vmem:[#allocation168_spill] sm:$0xff]  ;;  %p2176_p0 = pnand %p2175_p13, %p2169_p10 }
 0x290   :  { %v1151_v47 = vmul.f32 %v4708_v22, %v3704_v3  ;;  %v4710_v54 = vmov %v4699_v24  ;;  %v1350_v6 = vadd.f32 %v1348_v32, %v1345_v27  ;;  %v4711_v44 = vmov %v4700_v21  ;;  %v4713_v21 = vld [vmem:[#allocation139_spill] sm:$0xff]  ;;  %v4719_v41 = vld [vmem:[#allocation160_spill] sm:$0xff] }
 0x291   :  { %v1163_v12 = vmul.f32 %v4710_v54, %v3737_v35  ;;  %v1360_v13 = vmul.f32 %v4711_v44, %v3631_v7  ;;  %v1030_v33 = vadd.f32 %v1028_v0, %v1025_v42  ;;  %v1141_v34 = vadd.f32 %v4712_v26, %v1114_v16  ;;  %v4726_v54 = vld [vmem:[#allocation50_spill] sm:$0xff] }
 0x292   :  { %v1363_v24 = vadd.f32 %v1361_v40, %v1358_v17  ;;  %v1486_v8 = vadd.f32 %v1484_v10, %v4713_v21  ;;  %v1161_v20 = vadd.f32 %v4714_v4, %v1154_v50  ;;  %v4715_v1 = vmov %v4704_v37  ;;  %v4721_v10 = vld [vmem:[#allocation49_spill] sm:$0xff] }
 0x293   :  { %v1170_v48 = vmul.f32 %v4715_v1, %v3717_v23  ;;  %v1357_v62 = vadd.f32 %v4717_v46, %v1350_v6  ;;  %v4718_v32 = vstv %s3127_s10  ;;  %1032 = vrot.lane.b32.xlu0 %v1030_v33, %s2205_s8  ;;  %v1148_v0 = vadd.f32 %v4719_v41, %v1141_v34  ;;  %v4732_v1 = vld [vmem:[#allocation166_spill] sm:$0xff]  ;;  %v4735_v41 = vld [vmem:[#allocation54_spill] sm:$0xff]  ;;  %s4738_s10 = sld [smem:[#allocation129_spill]] }
 0x294   :  { %v1496_v36 = vmul.f32 %v4718_v32, %v3624_v11  ;;  %v4720_v40 = vmov %v4705_v63  ;;  %v1392_v63 = vadd.f32 %v4721_v10, %v1363_v24  ;;  %v1493_v27 = vadd.f32 %v4722_v60, %v1486_v8  ;;  %v4729_v24 = vld [vmem:[#allocation51_spill] sm:$0xff]  ;;  %v4737_v10 = vld [vmem:[#allocation147_spill] sm:$0xff] }
 0x295   :  { %v1175_v37 = vmul.f32 %v4720_v40, %v3764_v56  ;;  %v1166_v42 = vadd.f32 %v1164_v18, %v1161_v20  ;;  %v4724_v19 = vstv %s3152_s6  ;;  %v4725_v22 = vstv %s4488_s9  ;;  %v4730_v18 = vld [vmem:[#allocation138_spill] sm:$0xff]  ;;  %s4762_s6 = sld [smem:[#allocation107_spill]] }
 0x296   :  { %v1429_v16 = vmul.f32 %v4724_v19, %v3707_v5  ;;  %v1441_v38 = vmul.f32 %v4725_v22, %v3740_v28  ;;  %v1362_v17 = vadd.f32 %v1360_v13, %v1357_v62  ;;  %v1153_v50 = vadd.f32 %v1151_v47, %v1148_v0  ;;  %v4733_v47 = vld [vmem:[#allocation162_spill] sm:$0xff] }
 0x297   :  { %v1419_v6 = vadd.f32 %v4726_v54, %v1392_v63  ;;  %v1498_v44 = vadd.f32 %v1496_v36, %v1493_v27  ;;  %v4727_v33 = vstv %s4716_s4  ;;  %v1173_v34 = vadd.f32 %v1171_v57, %v1166_v42 }
 0x298   :  { %v1508_v26 = vmul.f32 %v4727_v33, %v3634_v55  ;;  %v1391_v21 = vadd.f32 %v4729_v24, %v1362_v17  ;;  %v1485_v8 = vadd.f32 %v3794_v49, %v4730_v18  ;;  %v4731_v4 = vmov %v4718_v32  ;;  %v4741_v17 = vld [vmem:[#allocation169_spill] sm:$0xff] }
 0x299   :  { %v1495_v20 = vmul.f32 %v4731_v4, %v3621_v52  ;;  %v1160_v13 = vadd.f32 %v4732_v1, %v1153_v50  ;;  %v1426_v46 = vadd.f32 %v4733_v47, %v1419_v6  ;;  %v4734_v62 = vstv %s4723_s30 }
 0x29a   :  { %v1448_v32 = vmul.f32 %v4734_v62, %v3722_v15  ;;  %v1505_v36 = vadd.f32 %v3583_v14, %v1498_v44  ;;  %v1178_v57 = vadd.f32 %v1176_v31, %v1173_v34  ;;  %v1418_v0 = vadd.f32 %v4735_v41, %v1391_v21  ;;  %v4745_v34 = vld [vmem:[#allocation58_spill] sm:$0xff]  ;;  %v4746_v21 = vld [vmem:[#allocation141_spill] sm:$0xff] }
 0x29b   :  { %v4736_v40 = vmov %v4724_v19  ;;  %v1492_v63 = vadd.f32 %v4737_v10, %v1485_v8  ;;  %v1165_v60 = vadd.f32 %v1163_v12, %v1160_v13  ;;  %v1431_v27 = vadd.f32 %v1429_v16, %v1426_v46  ;;  %v4749_v46 = vld [vmem:[#allocation61_spill] sm:$0xff]  ;;  %v4751_v41 = vld [vmem:[#allocation170_spill] sm:$0xff] }
 0x29c   :  { %v1428_v49 = vmul.f32 %v4736_v40, %v3704_v3  ;;  %v4739_v42 = vstv %s4728_s7  ;;  %v1510_v22 = vadd.f32 %v1508_v26, %v1505_v36  ;;  %1181 = vrot.lane.b32.xlu1 %v1178_v57, %s4740_s25  ;;  %v1425_v14 = vadd.f32 %v4741_v17, %v1418_v0  ;;  %v4750_v36 = vld [vmem:[#allocation150_spill] sm:$0xff] }
 0x29d   :  { %v1453_v19 = vmul.f32 %v4739_v42, %v3767_v30  ;;  %v4742_v31 = vstv %s4488_s9  ;;  %v1497_v54 = vadd.f32 %v1495_v20, %v1492_v63  ;;  %v4743_v6 = vmov %v4727_v33  ;;  %v4744_v33 = vld [vmem:[#allocation167_spill] sm:$0xff]  ;;  %s4757_s9 = sld [smem:[#allocation128_spill]] }
 0x29e   :  { %v1440_v50 = vmul.f32 %v4742_v31, %v3737_v35  ;;  %v1507_v44 = vmul.f32 %v4743_v6, %v3631_v7  ;;  %v1172_v12 = vadd.f32 %v1170_v48, %v1165_v60  ;;  %v1438_v16 = vadd.f32 %v4744_v33, %v1431_v27  ;;  %v4758_v31 = vld [vmem:[#allocation64_spill] sm:$0xff] }
 0x29f   :  { %v1539_v24 = vadd.f32 %v4745_v34, %v1510_v22  ;;  %v1633_v26 = vadd.f32 %v3834_v25, %v4746_v21  ;;  %v1430_v18 = vadd.f32 %v1428_v49, %v1425_v14  ;;  %v4747_v8 = vstv %s4490_s5  ;;  %v4759_v6 = vld [vmem:[#allocation140_spill] sm:$0xff]  ;;  %s4787_s5 = sld [smem:[#allocation110_spill]] }
 0x2a0   :  { %v1576_v4 = vmul.f32 %v4747_v8, %v3707_v5  ;;  %v1504_v1 = vadd.f32 %v3598_v29, %v1497_v54  ;;  %v4748_v20 = vstv %s4738_s10  ;;  %v1177_v47 = vadd.f32 %v1175_v37, %v1172_v12  ;;  %v4754_v37 = vld [vmem:[#allocation171_spill] sm:$0xff] }
 0x2a1   :  { %v1643_v13 = vmul.f32 %v4748_v20, %v3624_v11  ;;  %v1443_v48 = vadd.f32 %v1441_v38, %v1438_v16  ;;  %v1566_v62 = vadd.f32 %v4749_v46, %v1539_v24  ;;  %v1640_v57 = vadd.f32 %v4750_v36, %v1633_v26  ;;  %v4761_v24 = vld [vmem:[#allocation68_spill] sm:$0xff] }
 0x2a2   :  { %v1437_v0 = vadd.f32 %v4751_v41, %v1430_v18  ;;  %v4752_v25 = vstv %s4723_s30  ;;  %v4753_v49 = vmov %v4739_v42  ;;  %v1509_v29 = vadd.f32 %v1507_v44, %v1504_v1  ;;  %1179 = vrot.lane.b32.xlu0 %v1177_v47, %s4740_s25 }
 0x2a3   :  { %v1447_v40 = vmul.f32 %v4752_v25, %v3717_v23  ;;  %v1452_v10 = vmul.f32 %v4753_v49, %v3764_v56  ;;  %v1450_v63 = vadd.f32 %v1448_v32, %v1443_v48  ;;  %v1573_v38 = vadd.f32 %v4754_v37, %v1566_v62 }
 0x2a4   :  { %v1645_v60 = vadd.f32 %v1643_v13, %v1640_v57  ;;  %v4755_v27 = vstv %s4492_s23  ;;  %v1442_v22 = vadd.f32 %v1440_v50, %v1437_v0  ;;  %v4756_v17 = vstv %s4493_s12  ;;  %s4013_s23 = sld [smem:[#allocation6 + $0x4a]] }
 0x2a5   :  { %v1655_v42 = vmul.f32 %v4755_v27, %v3634_v55  ;;  %v1588_v14 = vmul.f32 %v4756_v17, %v3740_v28  ;;  %v1538_v54 = vadd.f32 %v4758_v31, %v1509_v29  ;;  %v1632_v44 = vadd.f32 %v3826_v59, %v4759_v6  ;;  %s4034_s12 = sld [smem:[#allocation6 + $0x1a]] }
 0x2a6   :  { %v1455_v12 = vadd.f32 %v1453_v19, %v1450_v63  ;;  %v1578_v33 = vadd.f32 %v1576_v4, %v1573_v38  ;;  %v1652_v32 = vadd.f32 %v3659_v45, %v1645_v60  ;;  %v4760_v16 = vmov %v4748_v20 }
 0x2a7   :  { %v1642_v34 = vmul.f32 %v4760_v16, %v3621_v52  ;;  %v1449_v50 = vadd.f32 %v1447_v40, %v1442_v22  ;;  %v1565_v21 = vadd.f32 %v4761_v24, %v1538_v54  ;;  %v4763_v26 = vmov %v4747_v8  ;;  %v4764_v8 = vld [vmem:[#allocation149_spill] sm:$0xff]  ;;  %v4771_v40 = vld [vmem:[#allocation71_spill] sm:$0xff] }
 0x2a8   :  { %v1575_v18 = vmul.f32 %v4763_v26, %v3704_v3  ;;  %v1639_v1 = vadd.f32 %v4764_v8, %v1632_v44  ;;  %1458 = vrot.lane.b32.xlu1 %v1455_v12, %s2206_s14  ;;  %v1585_v59 = vadd.f32 %v3593_v39, %v1578_v33  ;;  %v1657_v45 = vadd.f32 %v1655_v42, %v1652_v32  ;;  %v4775_v42 = vld [vmem:[#allocation74_spill] sm:$0xff]  ;;  %v4779_v32 = vld [vmem:[#allocation174_spill] sm:$0xff]  ;;  %v4782_v24 = vld [vmem:[#allocation173_spill] sm:$0xff] }
 0x2a9   :  { %v4766_v19 = vstv %s4757_s9  ;;  %v4767_v20 = vstv %s4484_s24  ;;  %v1454_v47 = vadd.f32 %v1452_v10, %v1449_v50  ;;  %v1572_v48 = vadd.f32 %v3612_v53, %v1565_v21  ;;  %s4005_s24 = sld [smem:[#allocation6 + $0x19]]  ;;  %v4783_v21 = vld [vmem:[#allocation143_spill] sm:$0xff] }
 0x2aa   :  { %v1730_v4 = vmul.f32 %v4766_v19, %v3445_v51  ;;  %v1649_v13 = vmul.f32 %v4767_v20, %v3374_v9  ;;  %v1644_v46 = vadd.f32 %v1642_v34, %v1639_v1  ;;  %v4768_v62 = vmov %v4755_v27  ;;  %v4781_v34 = vld [vmem:[#allocation142_spill] sm:$0xff] }
 0x2ab   :  { %v1654_v36 = vmul.f32 %v4768_v62, %v3631_v7  ;;  %v1590_v57 = vadd.f32 %v1588_v14, %v1585_v59  ;;  %v4769_v39 = vstv %s4491_s15  ;;  %v4770_v0 = vstv %s4762_s6  ;;  %1456 = vrot.lane.b32.xlu0 %v1454_v47, %s2206_s14  ;;  %s2207_s15 = smov 96  }
 0x2ac   :  { %v1595_v41 = vmul.f32 %v4769_v39, %v3722_v15  ;;  %v1600_v25 = vmul.f32 %v4770_v0, %v3767_v30  ;;  %v1686_v9 = vadd.f32 %v4771_v40, %v1657_v45  ;;  %v4772_v53 = vstv %s4765_s17  ;;  %v4786_v45 = vld [vmem:[#allocation78_spill] sm:$0xff] }
 0x2ad   :  { %v1218_v49 = vmul.f32 %v4772_v53, %v3621_v52  ;;  %v1577_v10 = vadd.f32 %v1575_v18, %v1572_v48  ;;  %v4773_v29 = vmov %v4756_v17  ;;  %v1651_v37 = vadd.f32 %v1649_v13, %v1644_v46 }
 0x2ae   :  { %v1587_v63 = vmul.f32 %v4773_v29, %v3737_v35  ;;  %v4774_v38 = vmov %v4772_v53  ;;  %v1597_v27 = vadd.f32 %v1595_v41, %v1590_v57  ;;  %v1713_v22 = vadd.f32 %v4775_v42, %v1686_v9  ;;  %v4792_v9 = vld [vmem:[#allocation153_spill] sm:$0xff] }
 0x2af   :  { %v1219_v60 = vmul.f32 %v4774_v38, %v3624_v11  ;;  %v4776_v17 = vstv %s3236_s2  ;;  %v1584_v52 = vadd.f32 %v3650_v58, %v1577_v10  ;;  %v4777_v31 = vmov %v4769_v39  ;;  %v4780_v11 = vld [vmem:[#allocation172_spill] sm:$0xff]  ;;  %s4062_s2 = sld [smem:[#allocation6 + $0x1b]] }
 0x2b0   :  { %v1723_v14 = vmul.f32 %v4776_v17, %v3707_v5  ;;  %v1594_v54 = vmul.f32 %v4777_v31, %v3717_v23  ;;  %v1656_v6 = vadd.f32 %v1654_v36, %v1651_v37  ;;  %v4778_v44 = vstv %s4485_s29  ;;  %v4789_v36 = vld [vmem:[#allocation81_spill] sm:$0xff]  ;;  %s4053_s29 = sld [smem:[#allocation6 + $0x4b]] }
 0x2b1   :  { %v1717_v12 = vmul.f32 %v4778_v44, %v3388_v2  ;;  %v1602_v33 = vadd.f32 %v1600_v25, %v1597_v27  ;;  %v1720_v16 = vadd.f32 %v4779_v32, %v1713_v22  ;;  %v1215_v50 = vadd.f32 %v4781_v34, %v4780_v11  ;;  %v4798_v44 = vld [vmem:[#allocation85_spill] sm:$0xff] }
 0x2b2   :  { %v1216_v26 = vadd.f32 %v4783_v21, %v4782_v24  ;;  %v1589_v58 = vadd.f32 %v1587_v63, %v1584_v52  ;;  %v4784_v18 = vmov %v4770_v0  ;;  %v4785_v1 = vstv %s3242_s0  ;;  %s2208_s0 = smov 80  }
 0x2b3   :  { %v1599_v8 = vmul.f32 %v4784_v18, %v3764_v56  ;;  %v1735_v59 = vmul.f32 %v4785_v1, %v3740_v28  ;;  %v1685_v19 = vadd.f32 %v4786_v45, %v1656_v6  ;;  %1605 = vrot.lane.b32.xlu1 %v1602_v33, %s2207_s15  ;;  %v1725_v20 = vadd.f32 %v1723_v14, %v1720_v16  ;;  %v4799_v33 = vld [vmem:[#allocation86_spill] sm:$0xff] }
 0x2b4   :  { %v1220_v13 = vadd.f32 %v1218_v49, %v1215_v50  ;;  %v1221_v47 = vadd.f32 %v1219_v60, %v1216_v26  ;;  %v4788_v48 = vstv %s3230_s3  ;;  %v1596_v62 = vadd.f32 %v1594_v54, %v1589_v58  ;;  %v4793_v49 = vld [vmem:[#allocation154_spill] sm:$0xff]  ;;  %s4073_s3 = sld [smem:[#allocation6 + $0x4c]]  ;;  %v4801_v58 = vld [vmem:[#allocation91_spill] sm:$0xff] }
 0x2b5   :  { %v1230_v46 = vmul.f32 %v4788_v48, %v3631_v7  ;;  %v1712_v57 = vadd.f32 %v4789_v36, %v1685_v19  ;;  %v4790_v39 = vmov %v4776_v17  ;;  %v4791_v0 = vmov %v4788_v48  ;;  %v4795_v17 = vld [vmem:[#allocation155_spill] sm:$0xff]  ;;  %v4800_v50 = vld [vmem:[#allocation146_spill] sm:$0xff] }
 0x2b6   :  { %v1722_v41 = vmul.f32 %v4790_v39, %v3704_v3  ;;  %v1231_v25 = vmul.f32 %v4791_v0, %v3634_v55  ;;  %v1732_v40 = vadd.f32 %v1730_v4, %v1725_v20  ;;  %v1227_v53 = vadd.f32 %v4792_v9, %v1220_v13 }
 0x2b7   :  { %v1228_v10 = vadd.f32 %v4793_v49, %v1221_v47  ;;  %v1292_v7 = vstv %s4005_s24  ;;  %v1601_v29 = vadd.f32 %v1599_v8, %v1596_v62  ;;  %v4794_v63 = vstv %s4787_s5  ;;  %v4802_v8 = vld [vmem:[#allocation93_spill] sm:$0xff] }
 0x2b8   :  { %v1742_v37 = vmul.f32 %v4794_v63, %v3722_v15  ;;  %v1719_v38 = vadd.f32 %v1717_v12, %v1712_v57  ;;  %v1297_v60 = vstv %s4013_s23  ;;  %v1737_v55 = vadd.f32 %v1735_v59, %v1732_v40 }
 0x2b9   :  { %v1747_v27 = vmul.f32 %v1745_v61, %v3767_v30  ;;  %v1232_v4 = vadd.f32 %v1230_v46, %v1227_v53  ;;  %v1233_v42 = vadd.f32 %v1231_v25, %v1228_v10  ;;  %1603 = vrot.lane.b32.xlu0 %v1601_v29, %s2207_s15  ;;  %v4796_v14 = vstv %s4757_s9 }
 0x2ba   :  { %v1724_v22 = vadd.f32 %v1722_v41, %v1719_v38  ;;  %v1729_v52 = vmul.f32 %v4796_v14, %v4795_v17  ;;  %v4797_v31 = vmov %v4785_v1  ;;  %v1744_v6 = vadd.f32 %v1742_v37, %v1737_v55 }
 0x2bb   :  { %v1734_v54 = vmul.f32 %v4797_v31, %v3737_v35  ;;  %v1261_v12 = vadd.f32 %v4798_v44, %v1232_v4  ;;  %v1262_v32 = vadd.f32 %v4799_v33, %v1233_v42  ;;  %v1304_v16 = vstv %s4034_s12  ;;  %v4807_v31 = vld [vmem:[#allocation122_spill] sm:$0xff] }
 0x2bc   :  { %v1731_v11 = vadd.f32 %v1729_v52, %v1724_v22  ;;  %v1293_v34 = vmul.f32 %v1292_v7, %v3388_v2  ;;  %v1294_v24 = vmul.f32 %v1292_v7, %v4800_v50  ;;  %v1298_v21 = vmul.f32 %v1297_v60, %v3704_v3  ;;  %v2135_v22 = vld [vmem:[%s4805_s16 + $0x8] sm:$0xff] }
 0x2bd   :  { %v1749_v26 = vadd.f32 %v1747_v27, %v1744_v6  ;;  %v1288_v18 = vadd.f32 %v4801_v58, %v1261_v12  ;;  %v1289_v1 = vadd.f32 %v4802_v8, %v1262_v32  ;;  %v1299_v59 = vmul.f32 %v1297_v60, %v3707_v5 }
 0x2be   :  { %v1736_v45 = vadd.f32 %v1734_v54, %v1731_v11  ;;  %v4803_v19 = vmov %v4794_v63  ;;  %v1746_v2 = vmul.f32 %v1745_v61, %v3764_v56  ;;  %v1309_v13 = vstv %s4053_s29 }
 0x2bf   :  { %v1741_v20 = vmul.f32 %v4803_v19, %v3717_v23  ;;  %1752 = vrot.lane.b32.xlu1 %v1749_v26, %s2208_s0  ;;  %v1295_v3 = vadd.f32 %v1293_v34, %v1288_v18  ;;  %v1296_v47 = vadd.f32 %v1294_v24, %v1289_v1  ;;  %v1305_v46 = vmul.f32 %v1304_v16, %v4795_v17 }
 0x2c0   :  { %v1306_v62 = vmul.f32 %v1304_v16, %v3445_v51  ;;  %v1316_v36 = vstv %s4062_s2  ;;  %v1310_v39 = vmul.f32 %v1309_v13, %v3737_v35  ;;  %v1311_v41 = vmul.f32 %v1309_v13, %v3740_v28 }
 0x2c1   :  { %v1743_v48 = vadd.f32 %v1741_v20, %v1736_v45  ;;  %v1300_v5 = vadd.f32 %v1298_v21, %v1295_v3  ;;  %v1301_v57 = vadd.f32 %v1299_v59, %v1296_v47  ;;  %v1321_v25 = vstv %s4073_s3  ;;  %v4808_v45 = vld [vmem:[#allocation127_spill] sm:$0xff] }
 0x2c2   :  { %v1317_v9 = vmul.f32 %v1316_v36, %v3717_v23  ;;  %v1318_v53 = vmul.f32 %v1316_v36, %v3722_v15  ;;  %v1322_v51 = vmul.f32 %v1321_v25, %v3764_v56  ;;  %v1323_v7 = vmul.f32 %v1321_v25, %v3767_v30  ;;  %v4804_v23 = vld [vmem:[#allocation117_spill] sm:$0xff]  ;;  %v2134_v56 = vld [vmem:[%s4805_s16] sm:$0xff] }
 0x2c3   :  { %v1748_v0 = vadd.f32 %v1746_v2, %v1743_v48  ;;  %v1307_v61 = vadd.f32 %v1305_v46, %v1300_v5  ;;  %v1308_v40 = vadd.f32 %v1306_v62, %v1301_v57  ;;  %v1188_v4 = vsub.s32 2, %v4804_v23  ;;  %v4806_v30 = vld [vmem:[#allocation125_spill] sm:$0xff]  ;;  %v4809_v62 = vld [vmem:[#allocation130_spill] sm:$0xff] }
 0x2c4   :  { %v1042_v42 = vrot.slane %v2134_v56, %v4806_v30  ;;  %v1046_v17 = vrot.slane %v2135_v22, %v4806_v30  ;;  %v895_v54 = vrot.slane %v2134_v56, %v4807_v31  ;;  %v899_v6 = vrot.slane %v2135_v22, %v4807_v31 }
 0x2c5   :  { %1750 = vrot.lane.b32.xlu0 %v1748_v0, %s2208_s0  ;;  %v1312_v49 = vadd.f32 %v1310_v39, %v1307_v61  ;;  %v1313_v10 = vadd.f32 %v1311_v41, %v1308_v40  ;;  %v1189_v44 = vrot.slane %v2134_v56, %v1188_v4  ;;  %v1193_v12 = vrot.slane %v2135_v22, %v1188_v4 }
 0x2c6   :  { %v1466_v19 = vrot.slane %v2134_v56, %v4808_v45  ;;  %v1470_v13 = vrot.slane %v2135_v22, %v4808_v45  ;;  %v1613_v36 = vrot.slane %v2134_v56, %v4809_v62  ;;  %v1617_v5 = vrot.slane %v2135_v22, %v4809_v62  ;;  %v4811_v45 = vld [vmem:[#allocation14_spill] sm:$0xff] }
 0x2c7   :  { %v1319_v29 = vadd.f32 %v1317_v9, %v1312_v49  ;;  %v1320_v63 = vadd.f32 %v1318_v53, %v1313_v10  ;;  %v1759_v57 = vsub.s32 6, %v4804_v23 }
 0x2c9   :  { %v1324_v35 = vadd.f32 %v1322_v51, %v1319_v29  ;;  %v1325_v37 = vadd.f32 %v1323_v7, %v1320_v63  ;;  %v1760_v10 = vrot.slane %v2134_v56, %v1759_v57  ;;  %v1764_v51 = vrot.slane %v2135_v22, %v1759_v57  ;;  %v4816_v57 = vld [vmem:[#allocation21_spill] sm:$0xff] }
 0x2ca   :  { %v2209_v22 = vmov 1966171168  }
 0x2f5   :  { %v888_v28 = vpop.permute.xlu1 %887  ;;  %v886_v38 = vpop.permute.xlu0 %885 }
 0x2f6   :  { %v890_v33 = vsel %vm889_vm11, %v886_v38, %v888_v28  ;;  %v891_v32 = vsel %vm889_vm11, %v888_v28, %v886_v38 }
 0x2f7   :  { %v900_v26 = vmul.f32 %v895_v54, %v891_v32  ;;  %v901_v58 = vmul.f32 %v899_v6, %v890_v33 }
 0x2fa   :  { %v1035_v60 = vpop.permute.xlu1 %1034 }
 0x305   :  { %v1033_v55 = vpop.permute.xlu0 %1032 }
 0x306   :  { %v1037_v14 = vsel %vm1036_vm10, %v1033_v55, %v1035_v60  ;;  %v1038_v52 = vsel %vm1036_vm10, %v1035_v60, %v1033_v55 }
 0x307   :  { %v1047_v34 = vmul.f32 %v1042_v42, %v1038_v52  ;;  %v1048_v50 = vmul.f32 %v1046_v17, %v1037_v14  ;;  %v1785_v52 = vunpack.c.l.s4 %v2209_v22 }
 0x309   :  { %v1049_v1 = vadd.f32 %v1047_v34, %v900_v26  ;;  %v1050_v59 = vadd.f32 %v1048_v50, %v901_v58  ;;  %v1786_v54 = vunpack.c.0.s8 %v1785_v52  ;;  %v4832_v52 = vld [vmem:[#allocation41_spill] sm:$0xff] }
 0x30e   :  { %v1182_v27 = vpop.permute.xlu1 %1181 }
 0x314   :  { %v1180_v15 = vpop.permute.xlu0 %1179 }
 0x315   :  { %v1184_v16 = vsel %vm1183_vm12, %v1180_v15, %v1182_v27  ;;  %v1185_v11 = vsel %vm1183_vm12, %v1182_v27, %v1180_v15 }
 0x316   :  { %v1194_v18 = vmul.f32 %v1189_v44, %v1185_v11  ;;  %v1195_v8 = vmul.f32 %v1193_v12, %v1184_v16  ;;  %v1789_v44 = vsub.s32 %v1786_v54, %v4804_v23 }
 0x318   :  { %v1196_v20 = vadd.f32 %v1194_v18, %v1049_v1  ;;  %v1197_v2 = vadd.f32 %v1195_v8, %v1050_v59  ;;  %v4810_v1 = vld [vmem:[#allocation12_spill] sm:$0xff] }
 0x31a   :  { %v1459_v24 = vpop.permute.xlu1 %1458  ;;  %v1326_v0 = vadd.f32 %v1324_v35, %v1196_v20  ;;  %v1327_v25 = vadd.f32 %v1325_v37, %v1197_v2  ;;  %v4812_v20 = vld [vmem:[#allocation11_spill] sm:$0xff] }
 0x31d   :  { %v1457_v21 = vpop.permute.xlu0 %1456 }
 0x31e   :  { %v1461_v48 = vsel %vm1460_vm13, %v1457_v21, %v1459_v24  ;;  %v1462_v46 = vsel %vm1460_vm13, %v1459_v24, %v1457_v21 }
 0x31f   :  { %v1471_v61 = vmul.f32 %v1466_v19, %v1461_v48  ;;  %v1472_v40 = vmul.f32 %v1470_v13, %v1462_v46  ;;  %v4814_v46 = vld [vmem:[#allocation15_spill] sm:$0xff] }
 0x321   :  { %v1473_v7 = vadd.f32 %v1471_v61, %v1326_v0  ;;  %v1474_v29 = vadd.f32 %v1472_v40, %v1327_v25  ;;  %v4818_v25 = vld [vmem:[#allocation18_spill] sm:$0xff]  ;;  %v4819_v40 = vld [vmem:[#allocation19_spill] sm:$0xff] }
 0x325   :  { %v1606_v3 = vpop.permute.xlu1 %1605 }
 0x32b   :  { %v1604_v47 = vpop.permute.xlu0 %1603 }
 0x32c   :  { %v1608_v39 = vsel %vm1607_vm14, %v1604_v47, %v1606_v3  ;;  %v1609_v41 = vsel %vm1607_vm14, %v1606_v3, %v1604_v47  ;;  %v4813_v47 = vld [vmem:[#allocation13_spill] sm:$0xff] }
 0x32d   :  { %v1618_v9 = vmul.f32 %v1613_v36, %v1608_v39  ;;  %v1619_v53 = vmul.f32 %v1617_v5, %v1609_v41  ;;  %v4815_v36 = vld [vmem:[#allocation20_spill] sm:$0xff]  ;;  %v4817_v41 = vld [vmem:[#allocation22_spill] sm:$0xff] }
 0x32f   :  { %v1620_v60 = vadd.f32 %v1618_v9, %v1473_v7  ;;  %v1621_v55 = vadd.f32 %v1619_v53, %v1474_v29  ;;  %v4823_v7 = vld [vmem:[#allocation26_spill] sm:$0xff] }
 0x331   :  { %v1753_v49 = vpop.permute.xlu1 %1752 }
 0x337   :  { %v1751_v63 = vpop.permute.xlu0 %1750 }
 0x338   :  { %v1755_v28 = vsel %vm1754_vm15, %v1751_v63, %v1753_v49  ;;  %v1756_v38 = vsel %vm1754_vm15, %v1753_v49, %v1751_v63  ;;  %v4824_v63 = vld [vmem:[#allocation35_spill] sm:$0xff] }
 0x339   :  { %v1765_v27 = vmul.f32 %v1760_v10, %v1755_v28  ;;  %v1766_v4 = vmul.f32 %v1764_v51, %v1756_v38  ;;  %v4822_v10 = vld [vmem:[#allocation23_spill] sm:$0xff]  ;;  %v4825_v38 = vld [vmem:[#allocation36_spill] sm:$0xff] }
 0x33b   :  { %v1767_v35 = vadd.f32 %v1765_v27, %v1620_v60  ;;  %v1768_v37 = vadd.f32 %v1766_v4, %v1621_v55  ;;  %v4826_v55 = vld [vmem:[#allocation27_spill] sm:$0xff]  ;;  %v4827_v4 = vld [vmem:[#allocation32_spill] sm:$0xff] }
 0x33d   :  { %v2043_v15 = vmul.f32 -1.442695, %v1767_v35  ;;  %v2044_v42 = vmul.f32 -1.442695, %v1768_v37  ;;  %v4828_v37 = vld [vmem:[#allocation24_spill] sm:$0xff] }
 0x33f   :  { %2126 = vpow2.f32 %v2043_v15 }
 0x340   :  { %2128 = vpow2.f32 %v2044_v42  ;;  %v4829_v42 = vld [vmem:[#allocation25_spill] sm:$0xff] }
 0x34c   :  { %v2127_v43 = vpop.eup %2126 }
 0x34d   :  { %v2129_v17 = vpop.eup %2128  ;;  %v1775_v14 = vadd.f32 1.0, %v2127_v43 }
 0x34e   :  { %v1776_v56 = vadd.f32 1.0, %v2129_v17  ;;  %v4830_v17 = vld [vmem:[#allocation39_spill] sm:$0xff] }
 0x34f   :  { %2130 = vrcp.f32 %v1775_v14 }
 0x350   :  { %2132 = vrcp.f32 %v1776_v56  ;;  %v4831_v56 = vld [vmem:[#allocation40_spill] sm:$0xff] }
 0x35c   :  { %v2131_v6 = vpop.eup %2130 }
 0x35d   :  { %v2133_v12 = vpop.eup %2132 }
 0x35e   :  { %v1783_v33 = vcombine.low %v2131_v6, %v2133_v12  ;;  %v4833_v6 = vld [vmem:[#allocation42_spill] sm:$0xff] }
 0x35f   :  { %v4834_v12 = vld [vmem:[#allocation30_spill] sm:$0xff] }
 0x360   :  { %v1790_v32 = vrot.slane %v1783_v33, %v1789_v44 }
 0x362   :  { %v1791_v16 = vcombine.high %v1790_v32, %v1790_v32  ;;  %v1798_v11 = vrot.slane %v1790_v32, %v1789_v44  ;;  %v4835_v32 = vld [vmem:[#allocation31_spill] sm:$0xff] }
 0x364   :  { %v1805_v34 = vrot.slane %v1791_v16, %v1789_v44  ;;  %v1806_v50 = vcombine.high %v1798_v11, %v1798_v11  ;;  %v1811_v24 = vrot.slane %v1798_v11, %v4807_v31  ;;  %v1815_v21 = vrot.slane %v1798_v11, %v4806_v30  ;;  %v4836_v11 = vld [vmem:[#allocation28_spill] sm:$0xff] }
 0x366   :  { %v1807_v26 = vcombine.high %v1805_v34, %v1805_v34  ;;  %v1819_v58 = vrot.slane %v1805_v34, %v4807_v31  ;;  %v1823_v18 = vrot.slane %v1805_v34, %v4806_v30  ;;  %v1827_v8 = vrot.slane %v1806_v50, %v4807_v31 }
 0x367   :  { %v1831_v23 = vrot.slane %v1806_v50, %v4806_v30  ;;  %v1848_v59 = vmul.f32 %v1811_v24, %v4810_v1  ;;  %v1849_v19 = vmul.f32 %v1815_v21, %v4811_v45  ;;  %v1850_v2 = vmul.f32 %v1811_v24, %v4812_v20  ;;  %v4837_v50 = vld [vmem:[#allocation29_spill] sm:$0xff]  ;;  %v4841_v1 = vld [vmem:[#allocation38_spill] sm:$0xff] }
 0x368   :  { %v1835_v13 = vrot.slane %v1807_v26, %v4807_v31  ;;  %v1839_v3 = vrot.slane %v1807_v26, %v4806_v30  ;;  %v1851_v48 = vmul.f32 %v1815_v21, %v4813_v47  ;;  %v1852_v62 = vmul.f32 %v1811_v24, %v4814_v46  ;;  %v4820_v31 = vld [vmem:[#allocation16_spill] sm:$0xff]  ;;  %v4821_v30 = vld [vmem:[#allocation17_spill] sm:$0xff] }
 0x369   :  { %v1853_v5 = vmul.f32 %v1815_v21, %v4815_v36  ;;  %v1854_v39 = vmul.f32 %v1811_v24, %v4816_v57  ;;  %v1855_v0 = vmul.f32 %v1815_v21, %v4817_v41  ;;  %v1856_v61 = vmul.f32 %v1819_v58, %v4818_v25  ;;  %1880 = vst [vmem:[#allocation7] sm:$0xff] %v1848_v59  ;;  %v4838_v21 = vld [vmem:[#allocation33_spill] sm:$0xff] }
 0x36a   :  { %1881 = vst [vmem:[#allocation7 + $0x8] sm:$0xff] %v1849_v19  ;;  %1882 = vst [vmem:[#allocation7 + $0x10] sm:$0xff] %v1850_v2  ;;  %v1857_v9 = vmul.f32 %v1823_v18, %v4819_v40  ;;  %v1858_v53 = vmul.f32 %v1819_v58, %v4820_v31  ;;  %v1859_v49 = vmul.f32 %v1823_v18, %v4821_v30 }
 0x36b   :  { %v1860_v51 = vmul.f32 %v1819_v58, %v4822_v10  ;;  %1883 = vst [vmem:[#allocation7 + $0x18] sm:$0xff] %v1851_v48  ;;  %1884 = vst [vmem:[#allocation7 + $0x20] sm:$0xff] %v1852_v62  ;;  %v1861_v29 = vmul.f32 %v1823_v18, %v4823_v7  ;;  %v1862_v28 = vmul.f32 %v1819_v58, %v4824_v63  ;;  %v4839_v58 = vld [vmem:[#allocation34_spill] sm:$0xff] }
 0x36c   :  { %v1863_v60 = vmul.f32 %v1823_v18, %v4825_v38  ;;  %v1864_v27 = vmul.f32 %v1827_v8, %v4826_v55  ;;  %1885 = vst [vmem:[#allocation7 + $0x28] sm:$0xff] %v1853_v5  ;;  %1886 = vst [vmem:[#allocation7 + $0x30] sm:$0xff] %v1854_v39  ;;  %v1865_v35 = vmul.f32 %v1831_v23, %v4827_v4 }
 0x36d   :  { %1887 = vst [vmem:[#allocation7 + $0x38] sm:$0xff] %v1855_v0  ;;  %1888 = vst [vmem:[#allocation7 + $0x40] sm:$0xff] %v1856_v61  ;;  %v1866_v15 = vmul.f32 %v1827_v8, %v4828_v37  ;;  %v1867_v43 = vmul.f32 %v1831_v23, %v4829_v42  ;;  %v1868_v14 = vmul.f32 %v1827_v8, %v4830_v17 }
 0x36e   :  { %1889 = vst [vmem:[#allocation7 + $0x48] sm:$0xff] %v1857_v9  ;;  %1890 = vst [vmem:[#allocation7 + $0x50] sm:$0xff] %v1858_v53  ;;  %v1869_v22 = vmul.f32 %v1831_v23, %v4831_v56  ;;  %v1870_v54 = vmul.f32 %v1827_v8, %v4832_v52  ;;  %v1871_v44 = vmul.f32 %v1831_v23, %v4833_v6  ;;  %v4840_v8 = vld [vmem:[#allocation37_spill] sm:$0xff] }
 0x36f   :  { %1891 = vst [vmem:[#allocation7 + $0x58] sm:$0xff] %v1859_v49  ;;  %1892 = vst [vmem:[#allocation7 + $0x60] sm:$0xff] %v1860_v51  ;;  %v1872_v33 = vmul.f32 %v1835_v13, %v4834_v12  ;;  %v1873_v16 = vmul.f32 %v1839_v3, %v4835_v32  ;;  %v1874_v34 = vmul.f32 %v1835_v13, %v4836_v11 }
 0x370   :  { %1893 = vst [vmem:[#allocation7 + $0x68] sm:$0xff] %v1861_v29  ;;  %1894 = vst [vmem:[#allocation7 + $0x70] sm:$0xff] %v1862_v28  ;;  %v1875_v24 = vmul.f32 %v1839_v3, %v4837_v50  ;;  %v1876_v26 = vmul.f32 %v1835_v13, %v4838_v21  ;;  %v1877_v18 = vmul.f32 %v1839_v3, %v4839_v58 }
 0x371   :  { %1895 = vst [vmem:[#allocation7 + $0x78] sm:$0xff] %v1863_v60  ;;  %1896 = vst [vmem:[#allocation7 + $0x80] sm:$0xff] %v1864_v27  ;;  %v1878_v23 = vmul.f32 %v1835_v13, %v4840_v8  ;;  %v1879_v59 = vmul.f32 %v1839_v3, %v4841_v1 }
 0x372   :  { %1897 = vst [vmem:[#allocation7 + $0x88] sm:$0xff] %v1865_v35  ;;  %1898 = vst [vmem:[#allocation7 + $0x90] sm:$0xff] %v1866_v15 }
 0x373   :  { %1899 = vst [vmem:[#allocation7 + $0x98] sm:$0xff] %v1867_v43  ;;  %1900 = vst [vmem:[#allocation7 + $0xa0] sm:$0xff] %v1868_v14 }
 0x374   :  { %1901 = vst [vmem:[#allocation7 + $0xa8] sm:$0xff] %v1869_v22  ;;  %1902 = vst [vmem:[#allocation7 + $0xb0] sm:$0xff] %v1870_v54 }
 0x375   :  { %1903 = vst [vmem:[#allocation7 + $0xb8] sm:$0xff] %v1871_v44  ;;  %1904 = vst [vmem:[#allocation7 + $0xc0] sm:$0xff] %v1872_v33 }
 0x376   :  { %1905 = vst [vmem:[#allocation7 + $0xc8] sm:$0xff] %v1873_v16  ;;  %1906 = vst [vmem:[#allocation7 + $0xd0] sm:$0xff] %v1874_v34 }
 0x377   :  { %1907 = vst [vmem:[#allocation7 + $0xd8] sm:$0xff] %v1875_v24  ;;  %1908 = vst [vmem:[#allocation7 + $0xe0] sm:$0xff] %v1876_v26 }
 0x378   :  { %1909 = vst [vmem:[#allocation7 + $0xe8] sm:$0xff] %v1877_v18  ;;  %1910 = vst [vmem:[#allocation7 + $0xf0] sm:$0xff] %v1878_v23 }
 0x379   :  { %1911 = vst [vmem:[#allocation7 + $0xf8] sm:$0xff] %v1879_v59 }
 0x37a   :  { %2179 = shalt.err (!%p2176_p0)
}
 0x37b   :  { %s4842_s11 = smov 256   ;;  %s4843_s19 = sld [smem:[#allocation176_spill]] }
 0x381   :  { %1923 = dma.vmem_to_hbm [thread:$0]  %s1918_s27, 4096, %s4843_s19, [#allocation4], %s4842_s11, %s4842_s11, %s4740_s25  }
 0x382   :  { %2192 = dma.done.wait [#allocation4], 4096  }
 0x383   :  { %2193 = vsyncadd [#allocation4], 4294963200 }
 0x384   :  { %1927 = vsyncpa [#allocation3], 1 }
 0x385   :  { %1928 = vsyncpa [#allocation4], 1 }
 0x386   :  { %1929 = vsyncpa [#allocation5], 1 }

</bundles_post_ra>
